<compile_context>
chip_gen: v6e
topology: v6e:2x2x1
jax: 0.10.0
libtpu: 0.0.40
codegen_flags: <defaults>
</compile_context>

<pallas_src>
import functools

import jax
import jax.numpy as jnp
import numpy as np
from jax.experimental import pallas as pl
from jax.experimental.pallas import tpu as pltpu

SEQ_LEN = 495      # hard-coded in the reference module's forward
PADDED_LEN = 512   # next multiple of 128 -> aligned (8,128) tiles in-kernel
NEG_INF = -1e30


# ---------------------------------------------------------------------------
# Pallas kernel: rank-1 logits + softmax + fused (P@V + fc) output.
# One grid step = (batch b, query tile t); all heads at once.
# ---------------------------------------------------------------------------
def _mha_kernel(qscale_ref, qadd_ref, krow_ref, kraw_ref, wvrow_ref, bfc_ref,
                *out_refs, key_len):
    """Kernel-side shapes (H = n_head, TQ = query tile, LP = padded seq len):
      qscale_ref: (1, H, TQ, 1)  a_h * q_i        (column layout -> sublanes)
      qadd_ref  : (1, H, TQ, 1)  b_h * q_i
      krow_ref  : (1, H, 1, LP)  c_h * k_j + d_h + key-pad mask
      kraw_ref  : (1, 1, LP)     k_j
      wvrow_ref : (1, H, 1, LP)  alpha_h * v_j + beta_h   (P@V and fc folded)
      bfc_ref   : (1,) SMEM      fc bias
      out_refs  : out (1, TQ, 1) [+ attn (H, 1, TQ, key_len)]
    """
    out_ref = out_refs[0]
    attn_ref = out_refs[1] if len(out_refs) > 1 else None

    qs = qscale_ref[0]      # (H, TQ, 1)
    qa = qadd_ref[0]        # (H, TQ, 1)
    kr = krow_ref[0]        # (H, 1, LP)
    kw = kraw_ref[0]        # (1, LP)
    wv = wvrow_ref[0]       # (H, 1, LP)

    # d_model == 1 closed rank-1 logits (pure VPU; no K=8 MXU matmul):
    #   s[h,i,j] = a_h*q_i*k_j + b_h*q_i + c_h*k_j + d_h + mask_j
    s = qs * kw + qa + kr                               # (H, TQ, LP) f32

    # Softmax over keys; padded key columns carry -1e30 via krow -> exp == 0.
    m = jnp.max(s, axis=-1, keepdims=True)              # (H, TQ, 1)   XLU
    e = jnp.exp(s - m)                                  # EUP
    denom = jnp.sum(e, axis=-1, keepdims=True)          # XLU
    p = e * pl.reciprocal(denom, approx=True)           # (H, TQ, LP)

    if attn_ref is not None:
        # Head-major, bf16, unpadded key dim — final layout, no wrapper transpose.
        attn_ref[:, 0] = p[:, :, :key_len].astype(attn_ref.dtype)

    # P@V + output projection fused (the M = d_v = 8 MXU matmul is removed):
    #   out[i] = sum_h sum_j p[h,i,j] * (alpha_h*v_j + beta_h) + b_fc
    pv = jnp.sum(p * wv, axis=-1, keepdims=True)        # (H, TQ, 1)
    out_ref[...] = jnp.sum(pv, axis=0, keepdims=True) + bfc_ref[0]


def _fused_mha_pallas(qscale, qadd, krow, kraw, wvrow, bfc, *, n_head, seq_len,
                      tq, attn_dtype, return_attn):
    sz_b = kraw.shape[0]
    lp = kraw.shape[-1]
    assert lp % tq == 0, (lp, tq)
    n_tq = lp // tq

    kernel = functools.partial(_mha_kernel, key_len=int(seq_len))

    in_specs = [
        pl.BlockSpec((1, n_head, tq, 1), lambda b, t: (b, 0, t, 0)),   # qscale
        pl.BlockSpec((1, n_head, tq, 1), lambda b, t: (b, 0, t, 0)),   # qadd
        pl.BlockSpec((1, n_head, 1, lp), lambda b, t: (b, 0, 0, 0)),   # krow
        pl.BlockSpec((1, 1, lp), lambda b, t: (b, 0, 0)),              # kraw
        pl.BlockSpec((1, n_head, 1, lp), lambda b, t: (b, 0, 0, 0)),   # wvrow
        pl.BlockSpec(memory_space=pltpu.MemorySpace.SMEM),             # b_fc scalar
    ]
    out_shape = [jax.ShapeDtypeStruct((sz_b, seq_len, 1), jnp.float32)]
    out_specs = [pl.BlockSpec((1, tq, 1), lambda b, t: (b, t, 0))]
    if return_attn:
        out_shape.append(
            jax.ShapeDtypeStruct((n_head, sz_b, seq_len, seq_len), attn_dtype))
        out_specs.append(
            pl.BlockSpec((n_head, 1, tq, seq_len), lambda b, t: (0, b, t, 0)))

    results = pl.pallas_call(
        kernel,
        out_shape=tuple(out_shape),
        grid=(sz_b, n_tq),
        in_specs=in_specs,
        out_specs=tuple(out_specs),
        compiler_params=pltpu.CompilerParams(
            dimension_semantics=("parallel", "parallel")),
    )(qscale, qadd, krow, kraw, wvrow, bfc)
    if not isinstance(results, (tuple, list)):
        results = (results,)
    return results


# ---------------------------------------------------------------------------
# Parameter init (deterministic, mirrors the PyTorch module's __init__ shapes).
# ---------------------------------------------------------------------------
def init_params(key, n_head, d_model, d_k, d_v):
    ks = jax.random.split(key, 8)
    std_qk = np.sqrt(2.0 / (d_model + d_k))
    std_v = np.sqrt(2.0 / (d_model + d_v))
    xavier_fc = np.sqrt(2.0 / (n_head * d_v + d_model))
    bound = 1.0 / np.sqrt(d_model)
    bound_fc = 1.0 / np.sqrt(n_head * d_v)
    return {
        "w_qs": jax.random.normal(ks[0], (n_head * d_k, d_model), jnp.float32) * std_qk,
        "b_qs": jax.random.uniform(ks[1], (n_head * d_k,), jnp.float32, -bound, bound),
        "w_ks": jax.random.normal(ks[2], (n_head * d_k, d_model), jnp.float32) * std_qk,
        "b_ks": jax.random.uniform(ks[3], (n_head * d_k,), jnp.float32, -bound, bound),
        "w_vs": jax.random.normal(ks[4], (n_head * d_v, d_model), jnp.float32) * std_v,
        "b_vs": jax.random.uniform(ks[5], (n_head * d_v,), jnp.float32, -bound, bound),
        "w_fc": jax.random.normal(ks[6], (d_model, n_head * d_v), jnp.float32) * xavier_fc,
        "b_fc": jax.random.uniform(ks[7], (d_model,), jnp.float32, -bound_fc, bound_fc),
    }


# ---------------------------------------------------------------------------
# Full MultiHeadAttention forward (inference mode: dropout = identity).
# ---------------------------------------------------------------------------
def multi_head_attention(params, q2d, k2d, v2d, *, n_head, d_k, d_v, tq=128,
                         attn_dtype=jnp.bfloat16, return_attn=True):
    sz_b, len_q = q2d.shape
    assert len_q == SEQ_LEN and k2d.shape[1] == SEQ_LEN and v2d.shape[1] == SEQ_LEN
    pad = PADDED_LEN - SEQ_LEN

    # Per-head projection weights (Linear(d_model=1, n_head*d)).
    wq = params["w_qs"].reshape(n_head, d_k)
    bq = params["b_qs"].reshape(n_head, d_k)
    wk = params["w_ks"].reshape(n_head, d_k)
    bk = params["b_ks"].reshape(n_head, d_k)
    wv = params["w_vs"].reshape(n_head, d_v)
    bv = params["b_vs"].reshape(n_head, d_v)
    wf = params["w_fc"].reshape(n_head, d_v)         # fc weight, head-major
    bfc = params["b_fc"].reshape(1).astype(jnp.float32)

    # Closed-form per-head coefficients (tiny: H scalars each).
    inv = 1.0 / float(np.sqrt(d_k))
    a_c = inv * jnp.sum(wq * wk, axis=1)              # multiplies q_i*k_j
    b_c = inv * jnp.sum(wq * bk, axis=1)              # multiplies q_i
    c_c = inv * jnp.sum(bq * wk, axis=1)              # multiplies k_j
    d_c = inv * jnp.sum(bq * bk, axis=1)              # constant
    alpha = jnp.sum(wf * wv, axis=1)                  # fc ∘ W_v
    beta = jnp.sum(wf * bv, axis=1)                   # fc ∘ b_v

    # .view(-1, 495, 1) with d_model == 1 is the raw scalar sequence; pad to 512.
    qpd = jnp.pad(q2d, ((0, 0), (0, pad)))            # (B, LP)
    kpd = jnp.pad(k2d, ((0, 0), (0, pad)))
    vpd = jnp.pad(v2d, ((0, 0), (0, pad)))

    # Tiny per-batch precomputed operands (a few KiB each).
    qscale = (a_c[None, :, None] * qpd[:, None, :])[..., None]        # (B,H,LP,1)
    qadd = (b_c[None, :, None] * qpd[:, None, :])[..., None]          # (B,H,LP,1)
    mask = jnp.where(jnp.arange(PADDED_LEN) < SEQ_LEN, 0.0, NEG_INF).astype(jnp.float32)
    krow = (c_c[None, :, None] * kpd[:, None, :] + d_c[None, :, None]
            + mask[None, None, :])[:, :, None, :]                     # (B,H,1,LP)
    kraw = kpd[:, None, :]                                            # (B,1,LP)
    wvrow = (alpha[None, :, None] * vpd[:, None, :]
             + beta[None, :, None])[:, :, None, :]                    # (B,H,1,LP)

    results = _fused_mha_pallas(
        qscale, qadd, krow, kraw, wvrow, bfc,
        n_head=n_head, seq_len=SEQ_LEN, tq=tq,
        attn_dtype=attn_dtype, return_attn=return_attn)

    out = results[0]                                  # (B, 495, 1) — fc already applied
    if return_attn:
        # Kernel already emitted head-major (n_head, B, L, L); reshape is free.
        attn = results[1].reshape(n_head * sz_b, SEQ_LEN, SEQ_LEN)
    else:
        attn = None
    return out, attn


# ---------------------------------------------------------------------------
# Pure-JAX reference of the full module forward (for correctness check).
# ---------------------------------------------------------------------------
def reference_forward(params, q2d, k2d, v2d, *, n_head, d_k, d_v):
    sz_b = q2d.shape[0]
    q = q2d.reshape(-1, SEQ_LEN, 1)
    k = k2d.reshape(-1, SEQ_LEN, 1)
    v = v2d.reshape(-1, SEQ_LEN, 1)
    qp = (q @ params["w_qs"].T + params["b_qs"]).reshape(sz_b, SEQ_LEN, n_head, d_k)
    kp = (k @ params["w_ks"].T + params["b_ks"]).reshape(sz_b, SEQ_LEN, n_head, d_k)
    vp = (v @ params["w_vs"].T + params["b_vs"]).reshape(sz_b, SEQ_LEN, n_head, d_v)
    qp = jnp.transpose(qp, (2, 0, 1, 3)).reshape(n_head * sz_b, SEQ_LEN, d_k)
    kp = jnp.transpose(kp, (2, 0, 1, 3)).reshape(n_head * sz_b, SEQ_LEN, d_k)
    vp = jnp.transpose(vp, (2, 0, 1, 3)).reshape(n_head * sz_b, SEQ_LEN, d_v)
    s = jnp.einsum("bqd,bkd->bqk", qp, kp) / float(np.power(d_k, 0.5))
    p = jax.nn.softmax(s, axis=-1)
    o = jnp.einsum("bqk,bkd->bqd", p, vp)
    o = o.reshape(n_head, sz_b, SEQ_LEN, d_v)
    o = jnp.transpose(o, (1, 2, 0, 3)).reshape(sz_b, SEQ_LEN, n_head * d_v)
    out = o @ params["w_fc"].T + params["b_fc"]
    return out, p


if __name__ == "__main__":
    n_head, d_model, d_k, d_v = 2, 1, 8, 8
    sz_b = 2

    key = jax.random.PRNGKey(0)
    k_param, k_q, k_k, k_v = jax.random.split(key, 4)
    params = init_params(k_param, n_head, d_model, d_k, d_v)

    # Forward expects 2-D (batch, 495) inputs (the module hard-codes 495).
    q_in = jax.random.normal(k_q, (sz_b, SEQ_LEN), jnp.float32)
    k_in = jax.random.normal(k_k, (sz_b, SEQ_LEN), jnp.float32)
    v_in = jax.random.normal(k_v, (sz_b, SEQ_LEN), jnp.float32)

    out, attn = multi_head_attention(
        params, q_in, k_in, v_in, n_head=n_head, d_k=d_k, d_v=d_v)
    out = jax.block_until_ready(out)
    attn = jax.block_until_ready(attn)

    assert out.shape == (sz_b, SEQ_LEN, d_model), out.shape
    assert attn.shape == (n_head * sz_b, SEQ_LEN, SEQ_LEN), attn.shape

    ref_out, ref_attn = reference_forward(
        params, q_in, k_in, v_in, n_head=n_head, d_k=d_k, d_v=d_v)
    np.testing.assert_allclose(np.asarray(attn.astype(jnp.float32)),
                               np.asarray(ref_attn), rtol=2e-2, atol=2e-2)
    np.testing.assert_allclose(np.asarray(out), np.asarray(ref_out),
                               rtol=2e-2, atol=2e-2)

    # No-attn fast path (skips ~all HBM writeback) — output must still match.
    out_na, _ = multi_head_attention(
        params, q_in, k_in, v_in, n_head=n_head, d_k=d_k, d_v=d_v, return_attn=False)
    out_na = jax.block_until_ready(out_na)
    np.testing.assert_allclose(np.asarray(out_na), np.asarray(ref_out),
                               rtol=2e-2, atol=2e-2)

    print("KERNEL_OK")
</pallas_src>

<mosaic_0001>
module attributes {stable_mosaic.version = 11 : i64} {
  func.func @_mha_kernel(%arg0: i32, %arg1: i32, %arg2: memref<1x2x128x1xf32, #tpu.memory_space<vmem>>, %arg3: memref<1x2x128x1xf32, #tpu.memory_space<vmem>>, %arg4: memref<1x2x1x512xf32, #tpu.memory_space<vmem>>, %arg5: memref<1x1x512xf32, #tpu.memory_space<vmem>>, %arg6: memref<1x2x1x512xf32, #tpu.memory_space<vmem>>, %arg7: memref<1xf32, #tpu.memory_space<smem>>, %arg8: memref<1x128x1xf32, #tpu.memory_space<vmem>>, %arg9: memref<2x1x128x495xbf16, #tpu.memory_space<vmem>>) attributes {dimension_semantics = [#tpu.dimension_semantics<parallel>, #tpu.dimension_semantics<parallel>], iteration_bounds = array<i64: 2, 4>, scalar_prefetch = 0 : i64, scratch_operands = 0 : i64, tpu.core_type = #tpu.core_type<tc>, window_params = [{transform_indices = @transform_0, window_bounds = array<i64: 1, 2, 128, 1>}, {transform_indices = @transform_1, window_bounds = array<i64: 1, 2, 128, 1>}, {transform_indices = @transform_2, window_bounds = array<i64: 1, 2, 1, 512>}, {transform_indices = @transform_3, window_bounds = array<i64: 1, 1, 512>}, {transform_indices = @transform_4, window_bounds = array<i64: 1, 2, 1, 512>}, {transform_indices = @transform_5, window_bounds = array<i64: 1>}, {transform_indices = @transform_6, window_bounds = array<i64: 1, 128, 1>}, {transform_indices = @transform_7, window_bounds = array<i64: 2, 1, 128, 495>}]} {
    %c0 = arith.constant 0 : index
    %c0_0 = arith.constant 0 : index
    %c0_1 = arith.constant 0 : index
    %c0_2 = arith.constant 0 : index
    %0 = vector.load %arg2[%c0, %c0_0, %c0_1, %c0_2] : memref<1x2x128x1xf32, #tpu.memory_space<vmem>>, vector<1x2x128x1xf32>
    %1 = vector.shape_cast %0 : vector<1x2x128x1xf32> to vector<2x128x1xf32>
    %c0_3 = arith.constant 0 : index
    %c0_4 = arith.constant 0 : index
    %c0_5 = arith.constant 0 : index
    %c0_6 = arith.constant 0 : index
    %2 = vector.load %arg3[%c0_3, %c0_4, %c0_5, %c0_6] : memref<1x2x128x1xf32, #tpu.memory_space<vmem>>, vector<1x2x128x1xf32>
    %3 = vector.shape_cast %2 : vector<1x2x128x1xf32> to vector<2x128x1xf32>
    %c0_7 = arith.constant 0 : index
    %c0_8 = arith.constant 0 : index
    %c0_9 = arith.constant 0 : index
    %c0_10 = arith.constant 0 : index
    %4 = vector.load %arg4[%c0_7, %c0_8, %c0_9, %c0_10] : memref<1x2x1x512xf32, #tpu.memory_space<vmem>>, vector<1x2x1x512xf32>
    %5 = vector.shape_cast %4 : vector<1x2x1x512xf32> to vector<2x1x512xf32>
    %c0_11 = arith.constant 0 : index
    %c0_12 = arith.constant 0 : index
    %c0_13 = arith.constant 0 : index
    %6 = vector.load %arg5[%c0_11, %c0_12, %c0_13] : memref<1x1x512xf32, #tpu.memory_space<vmem>>, vector<1x1x512xf32>
    %7 = vector.shape_cast %6 : vector<1x1x512xf32> to vector<1x512xf32>
    %c0_14 = arith.constant 0 : index
    %c0_15 = arith.constant 0 : index
    %c0_16 = arith.constant 0 : index
    %c0_17 = arith.constant 0 : index
    %8 = vector.load %arg6[%c0_14, %c0_15, %c0_16, %c0_17] : memref<1x2x1x512xf32, #tpu.memory_space<vmem>>, vector<1x2x1x512xf32>
    %9 = vector.shape_cast %8 : vector<1x2x1x512xf32> to vector<2x1x512xf32>
    %10 = vector.shape_cast %7 : vector<1x512xf32> to vector<1x1x512xf32>
    %11 = vector.broadcast %1 : vector<2x128x1xf32> to vector<2x128x512xf32>
    %12 = vector.broadcast %10 : vector<1x1x512xf32> to vector<2x128x512xf32>
    %13 = arith.mulf %11, %12 : vector<2x128x512xf32>
    %14 = vector.broadcast %3 : vector<2x128x1xf32> to vector<2x128x512xf32>
    %15 = arith.addf %13, %14 : vector<2x128x512xf32>
    %16 = vector.broadcast %5 : vector<2x1x512xf32> to vector<2x128x512xf32>
    %17 = arith.addf %15, %16 : vector<2x128x512xf32>
    %cst = arith.constant dense<0xFF800000> : vector<2x128xf32>
    %18 = vector.multi_reduction <maximumf>, %17, %cst [2] : vector<2x128x512xf32> to vector<2x128xf32>
    %19 = vector.shape_cast %18 : vector<2x128xf32> to vector<2x128x1xf32>
    %20 = vector.broadcast %19 : vector<2x128x1xf32> to vector<2x128x512xf32>
    %21 = arith.subf %17, %20 : vector<2x128x512xf32>
    %22 = math.exp %21 : vector<2x128x512xf32>
    %cst_18 = arith.constant dense<0.000000e+00> : vector<2x128xf32>
    %23 = vector.multi_reduction <add>, %22, %cst_18 [2] : vector<2x128x512xf32> to vector<2x128xf32>
    %24 = vector.shape_cast %23 : vector<2x128xf32> to vector<2x128x1xf32>
    %25 = tpu.reciprocal %24 {approx = true} : vector<2x128x1xf32> -> vector<2x128x1xf32>
    %26 = vector.broadcast %25 : vector<2x128x1xf32> to vector<2x128x512xf32>
    %27 = arith.mulf %22, %26 : vector<2x128x512xf32>
    %28 = vector.extract_strided_slice %27 {offsets = [0, 0, 0], sizes = [2, 128, 495], strides = [1, 1, 1]} : vector<2x128x512xf32> to vector<2x128x495xf32>
    %29 = arith.truncf %28 : vector<2x128x495xf32> to vector<2x128x495xbf16>
    %c0_19 = arith.constant 0 : index
    %c0_20 = arith.constant 0 : index
    %c0_21 = arith.constant 0 : index
    %c0_22 = arith.constant 0 : index
    %30 = vector.load %arg9[%c0_19, %c0_20, %c0_21, %c0_22] : memref<2x1x128x495xbf16, #tpu.memory_space<vmem>>, vector<2x1x128x495xbf16>
    %31 = vector.shape_cast %30 : vector<2x1x128x495xbf16> to vector<2x128x495xbf16>
    %32 = vector.shape_cast %29 : vector<2x128x495xbf16> to vector<2x1x128x495xbf16>
    tpu.vector_store %arg9[%c0_19, %c0_20, %c0_21, %c0_22], %32 {strides = array<i32>} : memref<2x1x128x495xbf16, #tpu.memory_space<vmem>>, vector<2x1x128x495xbf16>,
    %33 = vector.broadcast %9 : vector<2x1x512xf32> to vector<2x128x512xf32>
    %34 = arith.mulf %27, %33 : vector<2x128x512xf32>
    %cst_23 = arith.constant dense<0.000000e+00> : vector<2x128xf32>
    %35 = vector.multi_reduction <add>, %34, %cst_23 [2] : vector<2x128x512xf32> to vector<2x128xf32>
    %36 = vector.shape_cast %35 : vector<2x128xf32> to vector<2x128x1xf32>
    %cst_24 = arith.constant dense<0.000000e+00> : vector<128x1xf32>
    %37 = vector.multi_reduction <add>, %36, %cst_24 [0] : vector<2x128x1xf32> to vector<128x1xf32>
    %38 = vector.shape_cast %37 : vector<128x1xf32> to vector<1x128x1xf32>
    %c0_25 = arith.constant 0 : index
    %39 = memref.load %arg7[%c0_25] : memref<1xf32, #tpu.memory_space<smem>>
    %40 = vector.broadcast %39 : f32 to vector<1x128x1xf32>
    %41 = arith.addf %38, %40 : vector<1x128x1xf32>
    %c0_26 = arith.constant 0 : index
    %c0_27 = arith.constant 0 : index
    %c0_28 = arith.constant 0 : index
    %42 = vector.load %arg8[%c0_26, %c0_27, %c0_28] : memref<1x128x1xf32, #tpu.memory_space<vmem>>, vector<1x128x1xf32>
    tpu.vector_store %arg8[%c0_26, %c0_27, %c0_28], %41 {strides = array<i32>} : memref<1x128x1xf32, #tpu.memory_space<vmem>>, vector<1x128x1xf32>,
    return
  }
  func.func @transform_0(%arg0: i32, %arg1: i32) -> (i32, i32, i32, i32) {
    %c0_i32 = arith.constant 0 : i32
    %c0_i32_0 = arith.constant 0 : i32
    %c0_i32_1 = arith.constant 0 : i32
    return %arg0, %c0_i32, %arg1, %c0_i32_0 : i32, i32, i32, i32
  }
  func.func @transform_1(%arg0: i32, %arg1: i32) -> (i32, i32, i32, i32) {
    %c0_i32 = arith.constant 0 : i32
    %c0_i32_0 = arith.constant 0 : i32
    %c0_i32_1 = arith.constant 0 : i32
    return %arg0, %c0_i32, %arg1, %c0_i32_0 : i32, i32, i32, i32
  }
  func.func @transform_2(%arg0: i32, %arg1: i32) -> (i32, i32, i32, i32) {
    %c0_i32 = arith.constant 0 : i32
    %c0_i32_0 = arith.constant 0 : i32
    %c0_i32_1 = arith.constant 0 : i32
    %c0_i32_2 = arith.constant 0 : i32
    return %arg0, %c0_i32, %c0_i32_0, %c0_i32_1 : i32, i32, i32, i32
  }
  func.func @transform_3(%arg0: i32, %arg1: i32) -> (i32, i32, i32) {
    %c0_i32 = arith.constant 0 : i32
    %c0_i32_0 = arith.constant 0 : i32
    %c0_i32_1 = arith.constant 0 : i32
    return %arg0, %c0_i32, %c0_i32_0 : i32, i32, i32
  }
  func.func @transform_4(%arg0: i32, %arg1: i32) -> (i32, i32, i32, i32) {
    %c0_i32 = arith.constant 0 : i32
    %c0_i32_0 = arith.constant 0 : i32
    %c0_i32_1 = arith.constant 0 : i32
    %c0_i32_2 = arith.constant 0 : i32
    return %arg0, %c0_i32, %c0_i32_0, %c0_i32_1 : i32, i32, i32, i32
  }
  func.func @transform_5(%arg0: i32, %arg1: i32) -> i32 {
    %c0_i32 = arith.constant 0 : i32
    %c0_i32_0 = arith.constant 0 : i32
    return %c0_i32 : i32
  }
  func.func @transform_6(%arg0: i32, %arg1: i32) -> (i32, i32, i32) {
    %c0_i32 = arith.constant 0 : i32
    %c0_i32_0 = arith.constant 0 : i32
    return %arg0, %arg1, %c0_i32 : i32, i32, i32
  }
  func.func @transform_7(%arg0: i32, %arg1: i32) -> (i32, i32, i32, i32) {
    %c0_i32 = arith.constant 0 : i32
    %c0_i32_0 = arith.constant 0 : i32
    %c0_i32_1 = arith.constant 0 : i32
    return %c0_i32, %arg0, %arg1, %c0_i32_0 : i32, i32, i32, i32
  }
}

</mosaic_0001>

<bundles_post_ra>
// kernel: tpu_custom_call.1
= control target key start
LH: loop header
LB: loop body
LE: loop exit
PB: predicated region body
PF: predicated region fallthrough
CT: control target
= control target key end

     0   :  { %s7796_s0 = inlined_call_operand.vmem [shape: f32[2,2,512,1], index: 0, kind: input, shape index: {}]   ;;  %s7797_s1 = inlined_call_operand.vmem [shape: f32[2,2,512,1], index: 1, kind: input, shape index: {}]   ;;  %s7798_s2 = inlined_call_operand.vmem [shape: f32[2,2,1,512], index: 2, kind: input, shape index: {}]   ;;  %s7799_s3 = inlined_call_operand.vmem [shape: f32[2,1,512], index: 3, kind: input, shape index: {}]   ;;  %s7800_s4 = inlined_call_operand.vmem [shape: f32[2,2,1,512], index: 4, kind: input, shape index: {}]   ;;  %s7801_s5 = inlined_call_operand.<no memory space> [shape: f32[1], index: 5, kind: input, shape index: {}]   ;;  %s7802_s6 = inlined_call_operand.vmem [shape: f32[2,495,1], index: 6, kind: output, shape index: {0}]   ;;  %s7803_s7 = inlined_call_operand.vmem [shape: bf16[2,2,495,495], index: 7, kind: output, shape index: {1}]  }
   0x1   :  { %8003 = sst [smem:[#allocation110_spill]] %s7796_s0 }
   0x2   :  { %8004 = sst [smem:[#allocation111_spill]] %s7797_s1 }
   0x3   :  { %8005 = sst [smem:[#allocation112_spill]] %s7798_s2 }
   0x4   :  { %13 = sst [smem:[#allocation2]] %s7801_s5 }
   0x5   :  { %s4794_s26 = smov 0   ;;  %s4796_s27 = smov 0  }
   0x6   :  { %s4798_s28 = smov 0   ;;  %s4800_s29 = smov 0  }
   0x7   :  { %s4802_s30 = smov 0   ;;  %s4804_s8 = smov 0  }
   0x8   :  { %s4806_s9 = smov 0  }
   0x9 LB: > { %s28_s5 = sadd.s32 1, %s4676_s30  ;;  %s31_s10 = sadd.s32 1, %s4680_s8  ;;  %s4684_s9 = sphi %s4806_s9, %s19_s9   ;;  %s4680_s8 = sphi %s4804_s8, %s8580_s8   ;;  %s4676_s30 = sphi %s4802_s30, %s8579_s30   ;;  %s4672_s29 = sphi %s4800_s29, %s8578_s29   ;;  %s4668_s28 = sphi %s4798_s28, %s8577_s28   ;;  %s4664_s27 = sphi %s4796_s27, %s8576_s27   ;;  %s4660_s26 = sphi %s4794_s26, %s8575_s26  }
   0xa   : > { %p29_p0 = scmp.ge.s32.totalorder %s28_s5, 4  ;;  %s3869_s11 = sadd.s32 4294967295, %s4684_s9  }
   0xb   : > { %p47_p1 = scmp.ne.s32.totalorder %s4664_s27, %s4660_s26  ;;  %p48_p2 = scmp.eq.s32.totalorder %s4684_s9, 0 }
   0xc   : > { %s8582_s5 = smov (%p29_p0, %s28_s5), 0  ;;  %s8584_s10 = smov (!%p29_p0, %s31_s10), %s4680_s8 }
   0xd   : > { %p33_p3 = scmp.ge.s32.totalorder %s8584_s10, 2  ;;  %p206_p4 = scmp.eq.s32.totalorder %s3869_s11, 7 }
   0xe   : > { %s36_s12 = ssub.s32 %s4676_s30, %s8582_s5  ;;  %p4840_p5 = por %p48_p2, %p47_p1 }
   0xf   : > { %s8586_s10 = smov (%p33_p3, %s8584_s10), 0  ;;  %p4846_p6 = por %p206_p4, %p47_p1 }
  0x10   : > { %s35_s15 = ssub.s32 %s4680_s8, %s8586_s10  ;;  %s40_s17 = sadd.s32 1, %s4664_s27 }
  0x11   : > { %s37_s16 = sor.u32 %s36_s12, %s35_s15  ;;  %p3872_p8 = scmp.ge.s32.totalorder %s4684_s9, 8 }
  0x12   : > { %p38_p7 = scmp.eq.s32.totalorder %s37_s16, 0 }
  0x13   : > { %259 = sbr.rel (%p3872_p8) target bundleno = 76 (0x4c), region = 20 }
  0x14   : > { %s4854_s18 = scalar_select %p38_p7, %s4664_s27, %s40_s17  }
  0x18   : > { %262 = sbr.rel (!%p4840_p5) target bundleno = 50 (0x32), region = 24  ;;  %s264_s19 = sand.u32 (%p4840_p5), 1, %s4664_s27  }
  0x19   : > { %s3874_s20 = sshll.u32 (%p4840_p5), %s4676_s30, 4  ;;  %s3873_s21 = sshll.u32 (%p4840_p5), %s264_s19, 8 }
  0x1a   : > { %s3875_s22 = sshll.u32 (%p4840_p5), %s4680_s8, 7  ;;  %s8008_s0 = sld [smem:[#allocation110_spill]] (%p4840_p5) }
  0x1b   : > { %s269_s23 = sadd.s32 (%p4840_p5), %s3875_s22, %s3874_s20  ;;  %s4870_s15 = scalar_lea.vmem (%p4840_p5), [#allocation3], %s3873_s21 }
  0x1c   : > { %s3876_s24 = sshll.u32 (%p4840_p5), %s269_s23, 3 }
  0x20   : > { %s4865_s12 = scalar_lea.vmem %s8008_s0, %s3876_s24 }
  0x21   : > { %v362_v0 = vld [vmem:[%s4865_s12] sm:$0xff]  ;;  %v364_v1 = vld [vmem:[%s4865_s12 + $0x8] sm:$0xff]  ;;  %v366_v2 = vld [vmem:[%s4865_s12 + $0x10] sm:$0xff] }
  0x22   : > { %363 = vst [vmem:[%s4870_s15] sm:$0xff] %v362_v0  ;;  %365 = vst [vmem:[%s4870_s15 + $0x8] sm:$0xff] %v364_v1  ;;  %v368_v3 = vld [vmem:[%s4865_s12 + $0x18] sm:$0xff]  ;;  %v370_v4 = vld [vmem:[%s4865_s12 + $0x20] sm:$0xff] }
  0x23   : > { %367 = vst [vmem:[%s4870_s15 + $0x10] sm:$0xff] %v366_v2  ;;  %v372_v5 = vld [vmem:[%s4865_s12 + $0x28] sm:$0xff]  ;;  %369 = vst [vmem:[%s4870_s15 + $0x18] sm:$0xff] %v368_v3  ;;  %v374_v6 = vld [vmem:[%s4865_s12 + $0x30] sm:$0xff] }
  0x24   : > { %371 = vst [vmem:[%s4870_s15 + $0x20] sm:$0xff] %v370_v4  ;;  %373 = vst [vmem:[%s4870_s15 + $0x28] sm:$0xff] %v372_v5  ;;  %v376_v7 = vld [vmem:[%s4865_s12 + $0x38] sm:$0xff]  ;;  %v378_v8 = vld [vmem:[%s4865_s12 + $0x40] sm:$0xff] }
  0x25   : > { %375 = vst [vmem:[%s4870_s15 + $0x30] sm:$0xff] %v374_v6  ;;  %377 = vst [vmem:[%s4870_s15 + $0x38] sm:$0xff] %v376_v7  ;;  %v380_v9 = vld [vmem:[%s4865_s12 + $0x48] sm:$0xff]  ;;  %v382_v10 = vld [vmem:[%s4865_s12 + $0x50] sm:$0xff] }
  0x26   : > { %379 = vst [vmem:[%s4870_s15 + $0x40] sm:$0xff] %v378_v8  ;;  %v384_v11 = vld [vmem:[%s4865_s12 + $0x58] sm:$0xff]  ;;  %381 = vst [vmem:[%s4870_s15 + $0x48] sm:$0xff] %v380_v9  ;;  %v386_v12 = vld [vmem:[%s4865_s12 + $0x60] sm:$0xff] }
  0x27   : > { %383 = vst [vmem:[%s4870_s15 + $0x50] sm:$0xff] %v382_v10  ;;  %385 = vst [vmem:[%s4870_s15 + $0x58] sm:$0xff] %v384_v11  ;;  %v388_v13 = vld [vmem:[%s4865_s12 + $0x68] sm:$0xff]  ;;  %v390_v14 = vld [vmem:[%s4865_s12 + $0x70] sm:$0xff] }
  0x28   : > { %387 = vst [vmem:[%s4870_s15 + $0x60] sm:$0xff] %v386_v12  ;;  %389 = vst [vmem:[%s4870_s15 + $0x68] sm:$0xff] %v388_v13  ;;  %v392_v15 = vld [vmem:[%s4865_s12 + $0x78] sm:$0xff]  ;;  %v394_v16 = vld [vmem:[%s4865_s12 + $0x200] sm:$0xff] }
  0x29   : > { %391 = vst [vmem:[%s4870_s15 + $0x70] sm:$0xff] %v390_v14  ;;  %v396_v17 = vld [vmem:[%s4865_s12 + $0x208] sm:$0xff]  ;;  %393 = vst [vmem:[%s4870_s15 + $0x78] sm:$0xff] %v392_v15  ;;  %v398_v18 = vld [vmem:[%s4865_s12 + $0x210] sm:$0xff] }
  0x2a   : > { %395 = vst [vmem:[%s4870_s15 + $0x80] sm:$0xff] %v394_v16  ;;  %397 = vst [vmem:[%s4870_s15 + $0x88] sm:$0xff] %v396_v17  ;;  %v400_v19 = vld [vmem:[%s4865_s12 + $0x218] sm:$0xff]  ;;  %v402_v20 = vld [vmem:[%s4865_s12 + $0x220] sm:$0xff] }
  0x2b   : > { %399 = vst [vmem:[%s4870_s15 + $0x90] sm:$0xff] %v398_v18  ;;  %401 = vst [vmem:[%s4870_s15 + $0x98] sm:$0xff] %v400_v19  ;;  %v404_v21 = vld [vmem:[%s4865_s12 + $0x228] sm:$0xff]  ;;  %v406_v22 = vld [vmem:[%s4865_s12 + $0x230] sm:$0xff] }
  0x2c   : > { %403 = vst [vmem:[%s4870_s15 + $0xa0] sm:$0xff] %v402_v20  ;;  %v408_v23 = vld [vmem:[%s4865_s12 + $0x238] sm:$0xff]  ;;  %405 = vst [vmem:[%s4870_s15 + $0xa8] sm:$0xff] %v404_v21  ;;  %v410_v24 = vld [vmem:[%s4865_s12 + $0x240] sm:$0xff] }
  0x2d   : > { %407 = vst [vmem:[%s4870_s15 + $0xb0] sm:$0xff] %v406_v22  ;;  %409 = vst [vmem:[%s4870_s15 + $0xb8] sm:$0xff] %v408_v23  ;;  %v412_v25 = vld [vmem:[%s4865_s12 + $0x248] sm:$0xff]  ;;  %v414_v26 = vld [vmem:[%s4865_s12 + $0x250] sm:$0xff] }
  0x2e   : > { %411 = vst [vmem:[%s4870_s15 + $0xc0] sm:$0xff] %v410_v24  ;;  %413 = vst [vmem:[%s4870_s15 + $0xc8] sm:$0xff] %v412_v25  ;;  %v416_v27 = vld [vmem:[%s4865_s12 + $0x258] sm:$0xff]  ;;  %v418_v28 = vld [vmem:[%s4865_s12 + $0x260] sm:$0xff] }
  0x2f   : > { %415 = vst [vmem:[%s4870_s15 + $0xd0] sm:$0xff] %v414_v26  ;;  %v420_v29 = vld [vmem:[%s4865_s12 + $0x268] sm:$0xff]  ;;  %417 = vst [vmem:[%s4870_s15 + $0xd8] sm:$0xff] %v416_v27  ;;  %v422_v30 = vld [vmem:[%s4865_s12 + $0x270] sm:$0xff] }
  0x30   : > { %419 = vst [vmem:[%s4870_s15 + $0xe0] sm:$0xff] %v418_v28  ;;  %421 = vst [vmem:[%s4870_s15 + $0xe8] sm:$0xff] %v420_v29  ;;  %v424_v31 = vld [vmem:[%s4865_s12 + $0x278] sm:$0xff] }
  0x31   : > { %423 = vst [vmem:[%s4870_s15 + $0xf0] sm:$0xff] %v422_v30  ;;  %425 = vst [vmem:[%s4870_s15 + $0xf8] sm:$0xff] %v424_v31 }
  0x32 PF: > { %431 = sbr.rel (!%p4840_p5) target bundleno = 76 (0x4c), region = 62  ;;  %s433_s16 = sand.u32 (%p4840_p5), 1, %s4664_s27  }
  0x33   : > { %s3878_s17 = sshll.u32 (%p4840_p5), %s4676_s30, 4  ;;  %s3877_s19 = sshll.u32 (%p4840_p5), %s433_s16, 8 }
  0x34   : > { %s3879_s20 = sshll.u32 (%p4840_p5), %s4680_s8, 7  ;;  %s8009_s1 = sld [smem:[#allocation111_spill]] (%p4840_p5) }
  0x35   : > { %s438_s21 = sadd.s32 (%p4840_p5), %s3879_s20, %s3878_s17  ;;  %s4946_s13 = scalar_lea.vmem (%p4840_p5), [#allocation4], %s3877_s19 }
  0x36   : > { %s3880_s22 = sshll.u32 (%p4840_p5), %s438_s21, 3 }
  0x3a   : > { %s4941_s25 = scalar_lea.vmem %s8009_s1, %s3880_s22 }
  0x3b   : > { %v531_v32 = vld [vmem:[%s4941_s25] sm:$0xff]  ;;  %v533_v33 = vld [vmem:[%s4941_s25 + $0x8] sm:$0xff]  ;;  %v535_v34 = vld [vmem:[%s4941_s25 + $0x10] sm:$0xff] }
  0x3c   : > { %532 = vst [vmem:[%s4946_s13] sm:$0xff] %v531_v32  ;;  %534 = vst [vmem:[%s4946_s13 + $0x8] sm:$0xff] %v533_v33  ;;  %v537_v35 = vld [vmem:[%s4941_s25 + $0x18] sm:$0xff]  ;;  %v539_v36 = vld [vmem:[%s4941_s25 + $0x20] sm:$0xff] }
  0x3d   : > { %536 = vst [vmem:[%s4946_s13 + $0x10] sm:$0xff] %v535_v34  ;;  %v541_v37 = vld [vmem:[%s4941_s25 + $0x28] sm:$0xff]  ;;  %538 = vst [vmem:[%s4946_s13 + $0x18] sm:$0xff] %v537_v35  ;;  %v543_v38 = vld [vmem:[%s4941_s25 + $0x30] sm:$0xff] }
  0x3e   : > { %540 = vst [vmem:[%s4946_s13 + $0x20] sm:$0xff] %v539_v36  ;;  %542 = vst [vmem:[%s4946_s13 + $0x28] sm:$0xff] %v541_v37  ;;  %v545_v39 = vld [vmem:[%s4941_s25 + $0x38] sm:$0xff]  ;;  %v547_v40 = vld [vmem:[%s4941_s25 + $0x40] sm:$0xff] }
  0x3f   : > { %544 = vst [vmem:[%s4946_s13 + $0x30] sm:$0xff] %v543_v38  ;;  %546 = vst [vmem:[%s4946_s13 + $0x38] sm:$0xff] %v545_v39  ;;  %v549_v41 = vld [vmem:[%s4941_s25 + $0x48] sm:$0xff]  ;;  %v551_v42 = vld [vmem:[%s4941_s25 + $0x50] sm:$0xff] }
  0x40   : > { %548 = vst [vmem:[%s4946_s13 + $0x40] sm:$0xff] %v547_v40  ;;  %v553_v43 = vld [vmem:[%s4941_s25 + $0x58] sm:$0xff]  ;;  %550 = vst [vmem:[%s4946_s13 + $0x48] sm:$0xff] %v549_v41  ;;  %v555_v44 = vld [vmem:[%s4941_s25 + $0x60] sm:$0xff] }
  0x41   : > { %552 = vst [vmem:[%s4946_s13 + $0x50] sm:$0xff] %v551_v42  ;;  %554 = vst [vmem:[%s4946_s13 + $0x58] sm:$0xff] %v553_v43  ;;  %v557_v45 = vld [vmem:[%s4941_s25 + $0x68] sm:$0xff]  ;;  %v559_v46 = vld [vmem:[%s4941_s25 + $0x70] sm:$0xff] }
  0x42   : > { %556 = vst [vmem:[%s4946_s13 + $0x60] sm:$0xff] %v555_v44  ;;  %558 = vst [vmem:[%s4946_s13 + $0x68] sm:$0xff] %v557_v45  ;;  %v561_v47 = vld [vmem:[%s4941_s25 + $0x78] sm:$0xff]  ;;  %v563_v48 = vld [vmem:[%s4941_s25 + $0x200] sm:$0xff] }
  0x43   : > { %560 = vst [vmem:[%s4946_s13 + $0x70] sm:$0xff] %v559_v46  ;;  %v565_v49 = vld [vmem:[%s4941_s25 + $0x208] sm:$0xff]  ;;  %562 = vst [vmem:[%s4946_s13 + $0x78] sm:$0xff] %v561_v47  ;;  %v567_v50 = vld [vmem:[%s4941_s25 + $0x210] sm:$0xff] }
  0x44   : > { %564 = vst [vmem:[%s4946_s13 + $0x80] sm:$0xff] %v563_v48  ;;  %566 = vst [vmem:[%s4946_s13 + $0x88] sm:$0xff] %v565_v49  ;;  %v569_v51 = vld [vmem:[%s4941_s25 + $0x218] sm:$0xff]  ;;  %v571_v52 = vld [vmem:[%s4941_s25 + $0x220] sm:$0xff] }
  0x45   : > { %568 = vst [vmem:[%s4946_s13 + $0x90] sm:$0xff] %v567_v50  ;;  %570 = vst [vmem:[%s4946_s13 + $0x98] sm:$0xff] %v569_v51  ;;  %v573_v53 = vld [vmem:[%s4941_s25 + $0x228] sm:$0xff]  ;;  %v575_v54 = vld [vmem:[%s4941_s25 + $0x230] sm:$0xff] }
  0x46   : > { %572 = vst [vmem:[%s4946_s13 + $0xa0] sm:$0xff] %v571_v52  ;;  %v577_v55 = vld [vmem:[%s4941_s25 + $0x238] sm:$0xff]  ;;  %574 = vst [vmem:[%s4946_s13 + $0xa8] sm:$0xff] %v573_v53  ;;  %v579_v56 = vld [vmem:[%s4941_s25 + $0x240] sm:$0xff] }
  0x47   : > { %576 = vst [vmem:[%s4946_s13 + $0xb0] sm:$0xff] %v575_v54  ;;  %578 = vst [vmem:[%s4946_s13 + $0xb8] sm:$0xff] %v577_v55  ;;  %v581_v57 = vld [vmem:[%s4941_s25 + $0x248] sm:$0xff]  ;;  %v583_v58 = vld [vmem:[%s4941_s25 + $0x250] sm:$0xff] }
  0x48   : > { %580 = vst [vmem:[%s4946_s13 + $0xc0] sm:$0xff] %v579_v56  ;;  %582 = vst [vmem:[%s4946_s13 + $0xc8] sm:$0xff] %v581_v57  ;;  %v585_v59 = vld [vmem:[%s4941_s25 + $0x258] sm:$0xff]  ;;  %v587_v60 = vld [vmem:[%s4941_s25 + $0x260] sm:$0xff] }
  0x49   : > { %584 = vst [vmem:[%s4946_s13 + $0xd0] sm:$0xff] %v583_v58  ;;  %v589_v61 = vld [vmem:[%s4941_s25 + $0x268] sm:$0xff]  ;;  %586 = vst [vmem:[%s4946_s13 + $0xd8] sm:$0xff] %v585_v59  ;;  %v591_v62 = vld [vmem:[%s4941_s25 + $0x270] sm:$0xff] }
  0x4a   : > { %588 = vst [vmem:[%s4946_s13 + $0xe0] sm:$0xff] %v587_v60  ;;  %590 = vst [vmem:[%s4946_s13 + $0xe8] sm:$0xff] %v589_v61  ;;  %v593_v63 = vld [vmem:[%s4941_s25 + $0x278] sm:$0xff] }
  0x4b   : > { %592 = vst [vmem:[%s4946_s13 + $0xf0] sm:$0xff] %v591_v62  ;;  %594 = vst [vmem:[%s4946_s13 + $0xf8] sm:$0xff] %v593_v63 }
  0x4c PF: > { %p3881_p9 = scmp.ge.s32.totalorder %s4684_s9, 1  ;;  %p620_p10 = scmp.lt.s32.totalorder %s4684_s9, 9 }
  0x4e   : > { %p621_p11 = pnand %p3881_p9, %p620_p10 }
  0x50   : > { %624 = sbr.rel (%p621_p11) target bundleno = 995 (0x3e3), region = 112 }
  0x55   : > { %s5012_s11 = sand.u32 1, %s4660_s26   ;;  %v4750_v0 = vmov 0   ;;  %p686_p12 = scmp.lt.s32.totalorder %s4672_s29, 1  ;;  %vm2794_vm0 = vcmask 1043456   ;;  %vm2795_vm1 = vcmask 908292   ;;  %vm3224_vm3 = vcmask 7168  }
  0x56   : > { %4245 = vset.pattern.permute.xlu1 %v4750_v0  ;;  %4244 = vset.pattern.permute.xlu0 %v4750_v0  ;;  %s3882_s12 = sshll.u32 %s5012_s11, 8  ;;  %s8010_s2 = sld [smem:[#allocation112_spill]]  ;;  %vm6997_vm2 = vmor %vm2795_vm1, %vm2794_vm0 }
  0x57   : > { %s5017_s15 = scalar_lea.vmem [#allocation3], %s3882_s12  ;;  %s5053_s26 = scalar_lea.vmem [#allocation4], %s3882_s12 }
  0x58   : > { %v711_v1 = vld [vmem:[%s5017_s15 + $0x10] sm:$0xff]  ;;  %v709_v2 = vld [vmem:[%s5017_s15] sm:$0xff]  ;;  %v712_v3 = vld [vmem:[%s5017_s15 + $0x18] sm:$0xff]  ;;  %s5101_s16 = scalar_select %p686_p12, %s4672_s29, 1 }
  0x59   : > { %790 = vperm.xlu1 %4245, %v711_v1   ;;  %780 = vperm.xlu0 %4244, %v709_v2   ;;  %v710_v4 = vld [vmem:[%s5017_s15 + $0x8] sm:$0xff]  ;;  %v713_v6 = vld [vmem:[%s5017_s15 + $0x20] sm:$0xff]  ;;  %v716_v7 = vld [vmem:[%s5017_s15 + $0x38] sm:$0xff]  ;;  %s4057_s21 = smul.u32 (%p4846_p6), 62, %s4672_s29 }
  0x5a   : > { %v714_v5 = vld [vmem:[%s5017_s15 + $0x28] sm:$0xff]  ;;  %v715_v8 = vld [vmem:[%s5017_s15 + $0x30] sm:$0xff]  ;;  %v717_v10 = vld [vmem:[%s5017_s15 + $0x40] sm:$0xff]  ;;  %s3887_s17 = sshll.u32 %s5101_s16, 2  ;;  %s3886_s19 = sshll.u32 %s5101_s16, 3 }
  0x5b   : > { %v718_v9 = vld [vmem:[%s5017_s15 + $0x48] sm:$0xff]  ;;  %v720_v11 = vld [vmem:[%s5017_s15 + $0x58] sm:$0xff]  ;;  %v719_v12 = vld [vmem:[%s5017_s15 + $0x50] sm:$0xff]  ;;  %s693_s22 = scalar_lea.vmem %s7799_s3, %s3887_s17  ;;  %s3206_s17 = sld [smem:[#allocation2]] }
  0x5c   : > { %v722_v13 = vld [vmem:[%s5017_s15 + $0x68] sm:$0xff]  ;;  %v721_v14 = vld [vmem:[%s5017_s15 + $0x60] sm:$0xff]  ;;  %v724_v15 = vld [vmem:[%s5017_s15 + $0x78] sm:$0xff]  ;;  %s689_s25 = scalar_lea.vmem %s8010_s2, %s3886_s19 }
  0x5d   : > { %795 = vperm.xlu1 %4245, %v712_v3   ;;  %785 = vperm.xlu0 %4244, %v710_v4   ;;  %v723_v16 = vld [vmem:[%s5017_s15 + $0x70] sm:$0xff]  ;;  %v726_v17 = vld [vmem:[%s5017_s15 + $0x88] sm:$0xff]  ;;  %v725_v18 = vld [vmem:[%s5017_s15 + $0x80] sm:$0xff] }
  0x5e   : > { %v728_v19 = vld [vmem:[%s5017_s15 + $0x98] sm:$0xff]  ;;  %v727_v20 = vld [vmem:[%s5017_s15 + $0x90] sm:$0xff]  ;;  %v730_v21 = vld [vmem:[%s5017_s15 + $0xa8] sm:$0xff] }
  0x5f   : > { %v729_v22 = vld [vmem:[%s5017_s15 + $0xa0] sm:$0xff]  ;;  %v732_v23 = vld [vmem:[%s5017_s15 + $0xb8] sm:$0xff]  ;;  %v731_v24 = vld [vmem:[%s5017_s15 + $0xb0] sm:$0xff] }
  0x60   : > { %v734_v25 = vld [vmem:[%s5017_s15 + $0xc8] sm:$0xff]  ;;  %v733_v26 = vld [vmem:[%s5017_s15 + $0xc0] sm:$0xff]  ;;  %v736_v27 = vld [vmem:[%s5017_s15 + $0xd8] sm:$0xff] }
  0x61   : > { %805 = vperm.xlu1 %4245, %v714_v5   ;;  %800 = vperm.xlu0 %4244, %v713_v6   ;;  %v735_v28 = vld [vmem:[%s5017_s15 + $0xd0] sm:$0xff]  ;;  %v738_v29 = vld [vmem:[%s5017_s15 + $0xe8] sm:$0xff]  ;;  %v737_v30 = vld [vmem:[%s5017_s15 + $0xe0] sm:$0xff] }
  0x62   : > { %v740_v31 = vld [vmem:[%s5017_s15 + $0xf8] sm:$0xff]  ;;  %v739_v32 = vld [vmem:[%s5017_s15 + $0xf0] sm:$0xff]  ;;  %v742_v33 = vld [vmem:[%s5053_s26 + $0x8] sm:$0xff]  ;;  %s6983_s15 = scalar_lea.vmem %s7800_s4, %s3886_s19  ;;  %s3884_s19 = sshll.u32 %s5012_s11, 7 }
  0x63   : > { %v741_v34 = vld [vmem:[%s5053_s26] sm:$0xff]  ;;  %v744_v35 = vld [vmem:[%s5053_s26 + $0x18] sm:$0xff]  ;;  %v743_v36 = vld [vmem:[%s5053_s26 + $0x10] sm:$0xff]  ;;  %s7420_s20 = scalar_lea.vmem [#allocation5], %s3884_s19  }
  0x64   : > { %v746_v37 = vld [vmem:[%s5053_s26 + $0x28] sm:$0xff]  ;;  %v745_v38 = vld [vmem:[%s5053_s26 + $0x20] sm:$0xff]  ;;  %v748_v39 = vld [vmem:[%s5053_s26 + $0x38] sm:$0xff] }
  0x65   : > { %815 = vperm.xlu1 %4245, %v716_v7   ;;  %810 = vperm.xlu0 %4244, %v715_v8   ;;  %v747_v40 = vld [vmem:[%s5053_s26 + $0x30] sm:$0xff]  ;;  %v750_v41 = vld [vmem:[%s5053_s26 + $0x48] sm:$0xff]  ;;  %v749_v42 = vld [vmem:[%s5053_s26 + $0x40] sm:$0xff] }
  0x66   : > { %v752_v43 = vld [vmem:[%s5053_s26 + $0x58] sm:$0xff]  ;;  %v751_v44 = vld [vmem:[%s5053_s26 + $0x50] sm:$0xff]  ;;  %v754_v45 = vld [vmem:[%s5053_s26 + $0x68] sm:$0xff] }
  0x67   : > { %v753_v46 = vld [vmem:[%s5053_s26 + $0x60] sm:$0xff]  ;;  %v756_v47 = vld [vmem:[%s5053_s26 + $0x78] sm:$0xff]  ;;  %v755_v48 = vld [vmem:[%s5053_s26 + $0x70] sm:$0xff] }
  0x68   : > { %v758_v49 = vld [vmem:[%s5053_s26 + $0x88] sm:$0xff]  ;;  %v757_v50 = vld [vmem:[%s5053_s26 + $0x80] sm:$0xff]  ;;  %v760_v51 = vld [vmem:[%s5053_s26 + $0x98] sm:$0xff] }
  0x69   : > { %825 = vperm.xlu1 %4245, %v718_v9   ;;  %820 = vperm.xlu0 %4244, %v717_v10   ;;  %v759_v52 = vld [vmem:[%s5053_s26 + $0x90] sm:$0xff]  ;;  %v762_v53 = vld [vmem:[%s5053_s26 + $0xa8] sm:$0xff]  ;;  %v761_v54 = vld [vmem:[%s5053_s26 + $0xa0] sm:$0xff] }
  0x6a   : > { %v764_v55 = vld [vmem:[%s5053_s26 + $0xb8] sm:$0xff]  ;;  %v763_v56 = vld [vmem:[%s5053_s26 + $0xb0] sm:$0xff]  ;;  %v766_v57 = vld [vmem:[%s5053_s26 + $0xc8] sm:$0xff] }
  0x6b   : > { %v765_v58 = vld [vmem:[%s5053_s26 + $0xc0] sm:$0xff]  ;;  %v768_v59 = vld [vmem:[%s5053_s26 + $0xd8] sm:$0xff]  ;;  %v767_v60 = vld [vmem:[%s5053_s26 + $0xd0] sm:$0xff] }
  0x6c   : > { %v770_v61 = vld [vmem:[%s5053_s26 + $0xe8] sm:$0xff]  ;;  %v769_v62 = vld [vmem:[%s5053_s26 + $0xe0] sm:$0xff]  ;;  %v772_v63 = vld [vmem:[%s5053_s26 + $0xf8] sm:$0xff] }
  0x6d   : > { %835 = vperm.xlu1 %4245, %v720_v11   ;;  %830 = vperm.xlu0 %4244, %v719_v12   ;;  %v771_v0 = vld [vmem:[%s5053_s26 + $0xf0] sm:$0xff]  ;;  %v939_v11 = vlaneseq  ;;  %s3885_s26 = sshll.u32 %s5012_s11, 9  ;;  %s3955_s11 = sshll.u32 (%p4846_p6), %s4668_s28, 4 }
  0x6e   : > { %s7013_s16 = scalar_lea.vmem [#allocation6], %s3885_s26   ;;  %s3259_s23 = sadd.s32 (%p4846_p6), %s4057_s21, %s3955_s11 }
  0x6f   : > { %s3958_s24 = sshll.u32 (%p4846_p6), %s3259_s23, 3 }
  0x70   : > { %s7479_s12 = scalar_lea.vmem (%p4846_p6), %s7802_s6, %s3958_s24  }
  0x71   : > { %845 = vperm.xlu1 %4245, %v722_v13   ;;  %840 = vperm.xlu0 %4244, %v721_v14   ;;  %v940_v14 = vshrl.u32 %v939_v11, 7 }
  0x75   : > { %855 = vperm.xlu1 %4245, %v724_v15   ;;  %850 = vperm.xlu0 %4244, %v723_v16  }
  0x79   : > { %865 = vperm.xlu1 %4245, %v726_v17   ;;  %860 = vperm.xlu0 %4244, %v725_v18   ;;  %v5121_v17 = vsub.s32 0, %v940_v14  ;;  %v5123_v18 = vsub.s32 1, %v940_v14 }
  0x7b   : > { %8011 = vst [vmem:[#allocation7_spill] sm:$0xff] %v5121_v17  ;;  %8012 = vst [vmem:[#allocation8_spill] sm:$0xff] %v5123_v18 }
  0x7d   : > { %875 = vperm.xlu1 %4245, %v728_v19   ;;  %870 = vperm.xlu0 %4244, %v727_v20   ;;  %v5125_v19 = vsub.s32 2, %v940_v14  ;;  %v775_v20 = vld [vmem:[%s693_s22] sm:$0xf]  ;;  %s3253_s22 = ssub.s32 (%p4846_p6), 62, %s3955_s11 }
  0x7e   : > { %p3254_p13 = scmp.lt.s32.totalorder (%p4846_p6), %s3253_s22, 16 }
  0x7f   : > { %8013 = vst [vmem:[#allocation9_spill] sm:$0xff] %v5125_v19 }
  0x81   : > { %885 = vperm.xlu1 %4245, %v730_v21   ;;  %880 = vperm.xlu0 %4244, %v729_v22   ;;  %v5127_v21 = vsub.s32 3, %v940_v14 }
  0x83   : > { %8014 = vst [vmem:[#allocation10_spill] sm:$0xff] %v5127_v21 }
  0x85   : > { %895 = vperm.xlu1 %4245, %v732_v23   ;;  %890 = vperm.xlu0 %4244, %v731_v24   ;;  %v773_v24 = vld [vmem:[%s689_s25] sm:$0xf] }
  0x89   : > { %905 = vperm.xlu1 %4245, %v734_v25   ;;  %900 = vperm.xlu0 %4244, %v733_v26   ;;  %v774_v25 = vld [vmem:[%s689_s25 + $0x4] sm:$0xf]  ;;  %v5134_v26 = vrot.slane %v775_v20, %v5121_v17 }
  0x8d   : > { %915 = vperm.xlu1 %4245, %v736_v27   ;;  %910 = vperm.xlu0 %4244, %v735_v28   ;;  %v5137_v27 = vrot.slane %v775_v20, %v5123_v18  ;;  %v5140_v28 = vrot.slane %v775_v20, %v5125_v19 }
  0x91   : > { %925 = vperm.xlu1 %4245, %v738_v29   ;;  %920 = vperm.xlu0 %4244, %v737_v30   ;;  %v5143_v29 = vrot.slane %v775_v20, %v5127_v21  ;;  %v5146_v30 = vrot.slane %v773_v24, %v5121_v17 }
  0x95   : > { %935 = vperm.xlu1 %4245, %v740_v31   ;;  %930 = vperm.xlu0 %4244, %v739_v32   ;;  %v5149_v31 = vrot.slane %v773_v24, %v5123_v18 }
  0x99   : > { %1094 = vperm.xlu1 %4245, %v742_v33   ;;  %1089 = vperm.xlu0 %4244, %v741_v34   ;;  %v5156_v34 = vrot.slane %v773_v24, %v5125_v19 }
  0x9d   : > { %1104 = vperm.xlu1 %4245, %v744_v35   ;;  %1099 = vperm.xlu0 %4244, %v743_v36   ;;  %v5159_v35 = vrot.slane %v773_v24, %v5127_v21  ;;  %v5162_v36 = vrot.slane %v774_v25, %v5121_v17 }
  0x9f   : > { %8015 = vst [vmem:[#allocation11_spill] sm:$0xff] %v5162_v36 }
  0xa1   : > { %1114 = vperm.xlu1 %4245, %v746_v37   ;;  %1109 = vperm.xlu0 %4244, %v745_v38   ;;  %v5165_v37 = vrot.slane %v774_v25, %v5123_v18 }
  0xa3   : > { %8016 = vst [vmem:[#allocation12_spill] sm:$0xff] %v5165_v37 }
  0xa5   : > { %1124 = vperm.xlu1 %4245, %v748_v39   ;;  %1119 = vperm.xlu0 %4244, %v747_v40   ;;  %v5174_v40 = vrot.slane %v774_v25, %v5125_v19 }
  0xa7   : > { %8017 = vst [vmem:[#allocation13_spill] sm:$0xff] %v5174_v40 }
  0xa9   : > { %1134 = vperm.xlu1 %4245, %v750_v41   ;;  %1129 = vperm.xlu0 %4244, %v749_v42   ;;  %v5177_v41 = vrot.slane %v774_v25, %v5127_v21 }
  0xab   : > { %8018 = vst [vmem:[#allocation14_spill] sm:$0xff] %v5177_v41 }
  0xad   : > { %1144 = vperm.xlu1 %4245, %v752_v43   ;;  %1139 = vperm.xlu0 %4244, %v751_v44  }
  0xb1   : > { %1154 = vperm.xlu1 %4245, %v754_v45   ;;  %1149 = vperm.xlu0 %4244, %v753_v46  }
  0xb5   : > { %1164 = vperm.xlu1 %4245, %v756_v47   ;;  %1159 = vperm.xlu0 %4244, %v755_v48  }
  0xb9   : > { %1174 = vperm.xlu1 %4245, %v758_v49   ;;  %1169 = vperm.xlu0 %4244, %v757_v50  }
  0xbd   : > { %1184 = vperm.xlu1 %4245, %v760_v51   ;;  %1179 = vperm.xlu0 %4244, %v759_v52  }
  0xc1   : > { %1194 = vperm.xlu1 %4245, %v762_v53   ;;  %1189 = vperm.xlu0 %4244, %v761_v54  }
  0xc5   : > { %1204 = vperm.xlu1 %4245, %v764_v55   ;;  %1199 = vperm.xlu0 %4244, %v763_v56  }
  0xc9   : > { %1214 = vperm.xlu1 %4245, %v766_v57   ;;  %1209 = vperm.xlu0 %4244, %v765_v58  }
  0xcd   : > { %1224 = vperm.xlu1 %4245, %v768_v59   ;;  %1219 = vperm.xlu0 %4244, %v767_v60  }
  0xd1   : > { %1234 = vperm.xlu1 %4245, %v770_v61   ;;  %1229 = vperm.xlu0 %4244, %v769_v62  }
  0xd4   : > { %v791_v1 = vpop.permute.xlu1 %790  ;;  %v781_v2 = vpop.permute.xlu0 %780 }
  0xd5   : > { %1244 = vperm.xlu1 %4245, %v772_v63   ;;  %1239 = vperm.xlu0 %4244, %v771_v0   ;;  %v5168_v38 = vmul.f32 %v5134_v26, %v791_v1  ;;  %v5171_v39 = vmul.f32 %v5137_v27, %v791_v1  ;;  %v5180_v42 = vmul.f32 %v5140_v28, %v791_v1 }
  0xd6   : > { %v5183_v43 = vmul.f32 %v5134_v26, %v781_v2  ;;  %v5186_v44 = vmul.f32 %v5137_v27, %v781_v2  ;;  %v5189_v45 = vmul.f32 %v5140_v28, %v781_v2  ;;  %v5198_v48 = vmul.f32 %v5143_v29, %v781_v2 }
  0xd7   : > { %v5201_v49 = vmul.f32 %v5143_v29, %v791_v1 }
  0xd8   : > { %v796_v3 = vpop.permute.xlu1 %795  ;;  %v786_v4 = vpop.permute.xlu0 %785 }
  0xd9   : > { %v5192_v46 = vmul.f32 %v5134_v26, %v796_v3  ;;  %v5195_v47 = vmul.f32 %v5137_v27, %v796_v3  ;;  %v5204_v50 = vmul.f32 %v5140_v28, %v796_v3  ;;  %v5207_v51 = vmul.f32 %v5134_v26, %v786_v4 }
  0xda   : > { %v5210_v52 = vmul.f32 %v5137_v27, %v786_v4  ;;  %v5213_v53 = vmul.f32 %v5140_v28, %v786_v4  ;;  %v5228_v58 = vmul.f32 %v5143_v29, %v786_v4  ;;  %v5231_v59 = vmul.f32 %v5143_v29, %v796_v3 }
  0xdc   : > { %v5087_v5 = vpop.permute.xlu1 %805  ;;  %v5089_v6 = vpop.permute.xlu0 %800 }
  0xdd   : > { %v5221_v56 = vmul.f32 %v5134_v26, %v5087_v5  ;;  %v5225_v57 = vmul.f32 %v5137_v27, %v5087_v5  ;;  %v5235_v60 = vmul.f32 %v5140_v28, %v5087_v5  ;;  %v5239_v61 = vmul.f32 %v5134_v26, %v5089_v6 }
  0xde   : > { %v5243_v62 = vmul.f32 %v5137_v27, %v5089_v6  ;;  %v5247_v63 = vmul.f32 %v5140_v28, %v5089_v6  ;;  %v5259_v2 = vmul.f32 %v5143_v29, %v5089_v6  ;;  %v5263_v3 = vmul.f32 %v5143_v29, %v5087_v5 }
  0xe0   : > { %v5091_v7 = vpop.permute.xlu1 %815  ;;  %v5093_v8 = vpop.permute.xlu0 %810 }
  0xe1   : > { %v5251_v0 = vmul.f32 %v5134_v26, %v5091_v7  ;;  %v5255_v1 = vmul.f32 %v5137_v27, %v5091_v7  ;;  %v5267_v4 = vmul.f32 %v5140_v28, %v5091_v7  ;;  %v5271_v11 = vmul.f32 %v5134_v26, %v5093_v8 }
  0xe2   : > { %v5275_v14 = vmul.f32 %v5137_v27, %v5093_v8  ;;  %v5279_v6 = vmul.f32 %v5140_v28, %v5093_v8  ;;  %v5295_v21 = vmul.f32 %v5143_v29, %v5093_v8  ;;  %v5299_v19 = vmul.f32 %v5143_v29, %v5091_v7 }
  0xe4   : > { %v5096_v9 = vpop.permute.xlu1 %825  ;;  %v5098_v10 = vpop.permute.xlu0 %820  ;;  %8019 = vst [vmem:[#allocation15_spill] sm:$0xff] %v5299_v19 }
  0xe5   : > { %v5287_v24 = vmul.f32 %v5134_v26, %v5096_v9  ;;  %v5291_v25 = vmul.f32 %v5137_v27, %v5096_v9  ;;  %v5303_v18 = vmul.f32 %v5140_v28, %v5096_v9  ;;  %v5307_v17 = vmul.f32 %v5134_v26, %v5098_v10 }
  0xe6   : > { %v5311_v41 = vmul.f32 %v5137_v27, %v5098_v10  ;;  %v5315_v8 = vmul.f32 %v5140_v28, %v5098_v10  ;;  %v5327_v37 = vmul.f32 %v5143_v29, %v5098_v10  ;;  %v5331_v36 = vmul.f32 %v5143_v29, %v5096_v9 }
  0xe7   : > { %8020 = vst [vmem:[#allocation16_spill] sm:$0xff] %v5303_v18 }
  0xe8   : > { %v5103_v12 = vpop.permute.xlu1 %835  ;;  %v5105_v13 = vpop.permute.xlu0 %830  ;;  %8021 = vst [vmem:[#allocation17_spill] sm:$0xff] %v5315_v8  ;;  %8023 = vst [vmem:[#allocation19_spill] sm:$0xff] %v5327_v37 }
  0xe9   : > { %v5319_v7 = vmul.f32 %v5134_v26, %v5103_v12  ;;  %v5323_v40 = vmul.f32 %v5137_v27, %v5103_v12  ;;  %8024 = vst [vmem:[#allocation20_spill] sm:$0xff] %v5331_v36  ;;  %v5335_v18 = vmul.f32 %v5140_v28, %v5103_v12  ;;  %v5339_v8 = vmul.f32 %v5134_v26, %v5105_v13 }
  0xea   : > { %v5343_v19 = vmul.f32 %v5137_v27, %v5105_v13  ;;  %v5347_v10 = vmul.f32 %v5140_v28, %v5105_v13  ;;  %v5359_v36 = vmul.f32 %v5143_v29, %v5105_v13 }
  0xeb   : > { %8022 = vst [vmem:[#allocation18_spill] sm:$0xff] %v5323_v40  ;;  %8025 = vst [vmem:[#allocation21_spill] sm:$0xff] %v5335_v18 }
  0xec   : > { %v5112_v15 = vpop.permute.xlu1 %845  ;;  %v5114_v16 = vpop.permute.xlu0 %840  ;;  %8026 = vst [vmem:[#allocation22_spill] sm:$0xff] %v5339_v8  ;;  %8027 = vst [vmem:[#allocation23_spill] sm:$0xff] %v5343_v19  ;;  %v5363_v19 = vmul.f32 %v5143_v29, %v5103_v12 }
  0xed   : > { %8028 = vst [vmem:[#allocation24_spill] sm:$0xff] %v5347_v10  ;;  %v5351_v9 = vmul.f32 %v5134_v26, %v5112_v15  ;;  %v5355_v18 = vmul.f32 %v5137_v27, %v5112_v15  ;;  %8030 = vst [vmem:[#allocation26_spill] sm:$0xff] %v5359_v36  ;;  %v5367_v10 = vmul.f32 %v5140_v28, %v5112_v15 }
  0xee   : > { %8031 = vst [vmem:[#allocation27_spill] sm:$0xff] %v5363_v19  ;;  %v5371_v8 = vmul.f32 %v5134_v26, %v5114_v16  ;;  %v5379_v13 = vmul.f32 %v5140_v28, %v5114_v16  ;;  %v5395_v36 = vmul.f32 %v5143_v29, %v5112_v15 }
  0xef   : > { %8029 = vst [vmem:[#allocation25_spill] sm:$0xff] %v5351_v9  ;;  %8032 = vst [vmem:[#allocation28_spill] sm:$0xff] %v5367_v10  ;;  %v5375_v9 = vmul.f32 %v5137_v27, %v5114_v16  ;;  %v5391_v10 = vmul.f32 %v5143_v29, %v5114_v16 }
  0xf0   : > { %v5129_v22 = vpop.permute.xlu1 %855  ;;  %v5131_v23 = vpop.permute.xlu0 %850  ;;  %8034 = vst [vmem:[#allocation30_spill] sm:$0xff] %v5379_v13  ;;  %8038 = vst [vmem:[#allocation34_spill] sm:$0xff] %v5395_v36 }
  0xf1   : > { %8033 = vst [vmem:[#allocation29_spill] sm:$0xff] %v5375_v9  ;;  %v5383_v12 = vmul.f32 %v5134_v26, %v5129_v22  ;;  %v5387_v19 = vmul.f32 %v5137_v27, %v5129_v22  ;;  %8037 = vst [vmem:[#allocation33_spill] sm:$0xff] %v5391_v10  ;;  %v5399_v9 = vmul.f32 %v5140_v28, %v5129_v22 }
  0xf2   : > { %v5403_v13 = vmul.f32 %v5134_v26, %v5131_v23  ;;  %v5411_v16 = vmul.f32 %v5140_v28, %v5131_v23  ;;  %v5423_v36 = vmul.f32 %v5143_v29, %v5131_v23 }
  0xf3   : > { %8035 = vst [vmem:[#allocation31_spill] sm:$0xff] %v5383_v12  ;;  %8036 = vst [vmem:[#allocation32_spill] sm:$0xff] %v5387_v19  ;;  %v5407_v12 = vmul.f32 %v5137_v27, %v5131_v23 }
  0xf4   : > { %v5151_v32 = vpop.permute.xlu1 %865  ;;  %v5153_v33 = vpop.permute.xlu0 %860  ;;  %8039 = vst [vmem:[#allocation35_spill] sm:$0xff] %v5399_v9  ;;  %8040 = vst [vmem:[#allocation36_spill] sm:$0xff] %v5403_v13 }
  0xf5   : > { %8041 = vst [vmem:[#allocation37_spill] sm:$0xff] %v5407_v12  ;;  %8042 = vst [vmem:[#allocation38_spill] sm:$0xff] %v5411_v16  ;;  %v5415_v15 = vmul.f32 %v5134_v26, %v5151_v32  ;;  %v5419_v9 = vmul.f32 %v5137_v27, %v5151_v32  ;;  %v5427_v12 = vmul.f32 %v5143_v29, %v5129_v22 }
  0xf6   : > { %8044 = vst [vmem:[#allocation40_spill] sm:$0xff] %v5423_v36  ;;  %v5431_v16 = vmul.f32 %v5140_v28, %v5151_v32  ;;  %v5435_v13 = vmul.f32 %v5134_v26, %v5153_v33  ;;  %v5443_v23 = vmul.f32 %v5140_v28, %v5153_v33  ;;  %v5459_v36 = vmul.f32 %v5143_v29, %v5151_v32 }
  0xf7   : > { %8043 = vst [vmem:[#allocation39_spill] sm:$0xff] %v5415_v15  ;;  %8045 = vst [vmem:[#allocation41_spill] sm:$0xff] %v5427_v12  ;;  %v5439_v15 = vmul.f32 %v5137_v27, %v5153_v33 }
  0xf8   : > { %v5215_v54 = vpop.permute.xlu1 %875  ;;  %v5217_v55 = vpop.permute.xlu0 %870  ;;  %8046 = vst [vmem:[#allocation42_spill] sm:$0xff] %v5431_v16  ;;  %8048 = vst [vmem:[#allocation44_spill] sm:$0xff] %v5443_v23  ;;  %v5455_v16 = vmul.f32 %v5143_v29, %v5153_v33 }
  0xf9   : > { %8047 = vst [vmem:[#allocation43_spill] sm:$0xff] %v5439_v15  ;;  %v5447_v22 = vmul.f32 %v5134_v26, %v5215_v54  ;;  %v5451_v12 = vmul.f32 %v5137_v27, %v5215_v54  ;;  %8052 = vst [vmem:[#allocation48_spill] sm:$0xff] %v5459_v36  ;;  %v5463_v15 = vmul.f32 %v5140_v28, %v5215_v54 }
  0xfa   : > { %8051 = vst [vmem:[#allocation47_spill] sm:$0xff] %v5455_v16  ;;  %v5467_v23 = vmul.f32 %v5134_v26, %v5217_v55  ;;  %v5475_v33 = vmul.f32 %v5140_v28, %v5217_v55  ;;  %v5487_v36 = vmul.f32 %v5143_v29, %v5217_v55 }
  0xfb   : > { %8049 = vst [vmem:[#allocation45_spill] sm:$0xff] %v5447_v22  ;;  %8050 = vst [vmem:[#allocation46_spill] sm:$0xff] %v5451_v12  ;;  %v5471_v22 = vmul.f32 %v5137_v27, %v5217_v55 }
  0xfc   : > { %v5281_v20 = vpop.permute.xlu1 %885  ;;  %v5283_v5 = vpop.permute.xlu0 %880  ;;  %8053 = vst [vmem:[#allocation49_spill] sm:$0xff] %v5463_v15  ;;  %8054 = vst [vmem:[#allocation50_spill] sm:$0xff] %v5467_v23 }
  0xfd   : > { %8055 = vst [vmem:[#allocation51_spill] sm:$0xff] %v5471_v22  ;;  %8056 = vst [vmem:[#allocation52_spill] sm:$0xff] %v5475_v33  ;;  %v5479_v32 = vmul.f32 %v5134_v26, %v5281_v20  ;;  %v5483_v15 = vmul.f32 %v5137_v27, %v5281_v20  ;;  %v5491_v22 = vmul.f32 %v5143_v29, %v5215_v54 }
  0xfe   : > { %8059 = vst [vmem:[#allocation55_spill] sm:$0xff] %v5487_v36  ;;  %v5495_v33 = vmul.f32 %v5140_v28, %v5281_v20  ;;  %v5499_v23 = vmul.f32 %v5134_v26, %v5283_v5  ;;  %v5507_v55 = vmul.f32 %v5140_v28, %v5283_v5 }
  0xff   : > { %8057 = vst [vmem:[#allocation53_spill] sm:$0xff] %v5479_v32  ;;  %8058 = vst [vmem:[#allocation54_spill] sm:$0xff] %v5483_v15  ;;  %v5503_v32 = vmul.f32 %v5137_v27, %v5283_v5 }
 0x100   : > { %v896_v37 = vpop.permute.xlu1 %895  ;;  %v891_v40 = vpop.permute.xlu0 %890  ;;  %8060 = vst [vmem:[#allocation56_spill] sm:$0xff] %v5491_v22  ;;  %8061 = vst [vmem:[#allocation57_spill] sm:$0xff] %v5495_v33  ;;  %v5517_v33 = vmul.f32 %v5143_v29, %v5283_v5  ;;  %v5521_v22 = vmul.f32 %v5143_v29, %v5281_v20 }
 0x101   : > { %8062 = vst [vmem:[#allocation58_spill] sm:$0xff] %v5499_v23  ;;  %8063 = vst [vmem:[#allocation59_spill] sm:$0xff] %v5503_v32  ;;  %v5510_v36 = vmul.f32 %v5134_v26, %v896_v37  ;;  %v5513_v54 = vmul.f32 %v5137_v27, %v896_v37  ;;  %v5524_v32 = vmul.f32 %v5140_v28, %v896_v37 }
 0x102   : > { %8064 = vst [vmem:[#allocation60_spill] sm:$0xff] %v5507_v55  ;;  %8067 = vst [vmem:[#allocation63_spill] sm:$0xff] %v5517_v33  ;;  %v5527_v23 = vmul.f32 %v5134_v26, %v891_v40  ;;  %v5530_v55 = vmul.f32 %v5137_v27, %v891_v40 }
 0x103   : > { %8065 = vst [vmem:[#allocation61_spill] sm:$0xff] %v5510_v36  ;;  %8066 = vst [vmem:[#allocation62_spill] sm:$0xff] %v5513_v54  ;;  %v5533_v36 = vmul.f32 %v5140_v28, %v891_v40 }
 0x104   : > { %v906_v10 = vpop.permute.xlu1 %905  ;;  %v901_v19 = vpop.permute.xlu0 %900  ;;  %8068 = vst [vmem:[#allocation64_spill] sm:$0xff] %v5521_v22  ;;  %8069 = vst [vmem:[#allocation65_spill] sm:$0xff] %v5524_v32  ;;  %v5542_v22 = vmul.f32 %v5143_v29, %v891_v40  ;;  %v5545_v32 = vmul.f32 %v5143_v29, %v896_v37 }
 0x105   : > { %8070 = vst [vmem:[#allocation66_spill] sm:$0xff] %v5530_v55  ;;  %8071 = vst [vmem:[#allocation67_spill] sm:$0xff] %v5533_v36  ;;  %v5536_v5 = vmul.f32 %v5134_v26, %v906_v10  ;;  %v5539_v20 = vmul.f32 %v5137_v27, %v906_v10  ;;  %v5548_v33 = vmul.f32 %v5140_v28, %v906_v10 }
 0x106   : > { %8074 = vst [vmem:[#allocation70_spill] sm:$0xff] %v5542_v22  ;;  %8075 = vst [vmem:[#allocation71_spill] sm:$0xff] %v5545_v32  ;;  %v5551_v55 = vmul.f32 %v5134_v26, %v901_v19  ;;  %v5554_v36 = vmul.f32 %v5137_v27, %v901_v19  ;;  %v5566_v37 = vmul.f32 %v5143_v29, %v901_v19 }
 0x107   : > { %8072 = vst [vmem:[#allocation68_spill] sm:$0xff] %v5536_v5  ;;  %8073 = vst [vmem:[#allocation69_spill] sm:$0xff] %v5539_v20  ;;  %v5557_v5 = vmul.f32 %v5140_v28, %v901_v19 }
 0x108   : > { %v916_v16 = vpop.permute.xlu1 %915  ;;  %v911_v12 = vpop.permute.xlu0 %910  ;;  %8076 = vst [vmem:[#allocation72_spill] sm:$0xff] %v5548_v33  ;;  %8077 = vst [vmem:[#allocation73_spill] sm:$0xff] %v5554_v36  ;;  %v5569_v33 = vmul.f32 %v5143_v29, %v906_v10 }
 0x109   : > { %8078 = vst [vmem:[#allocation74_spill] sm:$0xff] %v5557_v5  ;;  %v5560_v20 = vmul.f32 %v5134_v26, %v916_v16  ;;  %v5563_v40 = vmul.f32 %v5137_v27, %v916_v16  ;;  %8081 = vst [vmem:[#allocation77_spill] sm:$0xff] %v5566_v37  ;;  %v5572_v32 = vmul.f32 %v5140_v28, %v916_v16 }
 0x10a   : > { %8082 = vst [vmem:[#allocation78_spill] sm:$0xff] %v5569_v33  ;;  %v5575_v22 = vmul.f32 %v5134_v26, %v911_v12  ;;  %v5578_v5 = vmul.f32 %v5137_v27, %v911_v12  ;;  %v5590_v33 = vmul.f32 %v5143_v29, %v911_v12 }
 0x10b   : > { %8079 = vst [vmem:[#allocation75_spill] sm:$0xff] %v5560_v20  ;;  %8080 = vst [vmem:[#allocation76_spill] sm:$0xff] %v5563_v40  ;;  %v5581_v20 = vmul.f32 %v5140_v28, %v911_v12 }
 0x10c   : > { %v926_v54 = vpop.permute.xlu1 %925  ;;  %v921_v15 = vpop.permute.xlu0 %920  ;;  %8083 = vst [vmem:[#allocation79_spill] sm:$0xff] %v5572_v32  ;;  %8084 = vst [vmem:[#allocation80_spill] sm:$0xff] %v5578_v5  ;;  %v5593_v32 = vmul.f32 %v5143_v29, %v916_v16 }
 0x10d   : > { %8085 = vst [vmem:[#allocation81_spill] sm:$0xff] %v5581_v20  ;;  %v5584_v19 = vmul.f32 %v5134_v26, %v921_v15  ;;  %v5587_v10 = vmul.f32 %v5137_v27, %v921_v15  ;;  %8088 = vst [vmem:[#allocation84_spill] sm:$0xff] %v5590_v33  ;;  %v5596_v37 = vmul.f32 %v5140_v28, %v921_v15 }
 0x10e   : > { %8089 = vst [vmem:[#allocation85_spill] sm:$0xff] %v5593_v32  ;;  %v5599_v5 = vmul.f32 %v5134_v26, %v926_v54  ;;  %v5602_v20 = vmul.f32 %v5137_v27, %v926_v54  ;;  %v5614_v16 = vmul.f32 %v5143_v29, %v921_v15 }
 0x10f   : > { %8086 = vst [vmem:[#allocation82_spill] sm:$0xff] %v5584_v19  ;;  %8087 = vst [vmem:[#allocation83_spill] sm:$0xff] %v5587_v10  ;;  %v5605_v19 = vmul.f32 %v5140_v28, %v926_v54 }
 0x110   : > { %v936_v36 = vpop.permute.xlu1 %935  ;;  %v931_v40 = vpop.permute.xlu0 %930  ;;  %8090 = vst [vmem:[#allocation86_spill] sm:$0xff] %v5596_v37  ;;  %8091 = vst [vmem:[#allocation87_spill] sm:$0xff] %v5599_v5  ;;  %v5617_v37 = vmul.f32 %v5143_v29, %v926_v54 }
 0x111   : > { %8092 = vst [vmem:[#allocation88_spill] sm:$0xff] %v5602_v20  ;;  %8093 = vst [vmem:[#allocation89_spill] sm:$0xff] %v5605_v19  ;;  %v5608_v10 = vmul.f32 %v5134_v26, %v931_v40  ;;  %v5611_v12 = vmul.f32 %v5137_v27, %v931_v40  ;;  %v5620_v32 = vmul.f32 %v5140_v28, %v931_v40 }
 0x112   : > { %8096 = vst [vmem:[#allocation92_spill] sm:$0xff] %v5614_v16  ;;  %8097 = vst [vmem:[#allocation93_spill] sm:$0xff] %v5617_v37  ;;  %v5623_v5 = vmul.f32 %v5134_v26, %v936_v36  ;;  %v5626_v19 = vmul.f32 %v5137_v27, %v936_v36 }
 0x113   : > { %8094 = vst [vmem:[#allocation90_spill] sm:$0xff] %v5608_v10  ;;  %8095 = vst [vmem:[#allocation91_spill] sm:$0xff] %v5611_v12  ;;  %v5629_v10 = vmul.f32 %v5140_v28, %v936_v36 }
 0x114   : > { %8098 = vst [vmem:[#allocation94_spill] sm:$0xff] %v5620_v32  ;;  %v1095_v33 = vpop.permute.xlu1 %1094  ;;  %v1090_v20 = vpop.permute.xlu0 %1089  ;;  %8099 = vst [vmem:[#allocation95_spill] sm:$0xff] %v5626_v19 }
 0x115   : > { %v1251_v15 = vadd.f32 %v1095_v33, %v5207_v51  ;;  %v1252_v16 = vadd.f32 %v1095_v33, %v5210_v52  ;;  %v1247_v54 = vadd.f32 %v1090_v20, %v5183_v43  ;;  %v1248_v37 = vadd.f32 %v1090_v20, %v5186_v44 }
 0x116   : > { %v1253_v32 = vadd.f32 %v1095_v33, %v5213_v53  ;;  %v1254_v12 = vadd.f32 %v1095_v33, %v5228_v58  ;;  %v1249_v26 = vadd.f32 %v1090_v20, %v5189_v45  ;;  %v1250_v27 = vadd.f32 %v1090_v20, %v5198_v48 }
 0x117   : > { %v5640_v19 = vadd.f32 %v5146_v30, %v1251_v15  ;;  %v5643_v28 = vadd.f32 %v5149_v31, %v1252_v16  ;;  %v5646_v51 = vadd.f32 %v5146_v30, %v1247_v54  ;;  %v5649_v43 = vadd.f32 %v5149_v31, %v1248_v37 }
 0x118   : > { %v1105_v44 = vpop.permute.xlu1 %1104  ;;  %v1100_v52 = vpop.permute.xlu0 %1099  ;;  %v5652_v53 = vadd.f32 %v5156_v34, %v1253_v32  ;;  %v5655_v45 = vadd.f32 %v5159_v35, %v1254_v12  ;;  %v5658_v48 = vmul.f32 %v5143_v29, %v931_v40  ;;  %v5661_v58 = vmul.f32 %v5143_v29, %v936_v36 }
 0x119   : > { %8100 = vst [vmem:[#allocation96_spill] sm:$0xff] %v5649_v43  ;;  %v1259_v33 = vadd.f32 %v1105_v44, %v5192_v46  ;;  %v1255_v20 = vadd.f32 %v1100_v52, %v5168_v38  ;;  %v1256_v37 = vadd.f32 %v1100_v52, %v5171_v39  ;;  %v5667_v16 = vadd.f32 %v5156_v34, %v1249_v26 }
 0x11a   : > { %v1550_v32 = vmax.f32 %v5640_v19, %v5643_v28  ;;  %v1545_v12 = vmax.f32 %v5646_v51, %v5649_v43  ;;  %v1257_v40 = vadd.f32 %v1100_v52, %v5180_v42  ;;  %v1258_v29 = vadd.f32 %v1100_v52, %v5201_v49 }
 0x11b   : > { %v1260_v36 = vadd.f32 %v1105_v44, %v5195_v47  ;;  %v5677_v46 = vadd.f32 %v5159_v35, %v1250_v27  ;;  %v5680_v38 = vadd.f32 %v5146_v30, %v1255_v20  ;;  %v5683_v39 = vadd.f32 %v5149_v31, %v1256_v37 }
 0x11c   : > { %v1115_v15 = vpop.permute.xlu1 %1114  ;;  %v1110_v54 = vpop.permute.xlu0 %1109  ;;  %v1551_v26 = vmax.f32 %v1550_v32, %v5652_v53  ;;  %v1546_v43 = vmax.f32 %v1545_v12, %v5667_v16  ;;  %v1261_v42 = vadd.f32 %v1105_v44, %v5204_v50  ;;  %v1262_v49 = vadd.f32 %v1105_v44, %v5231_v59 }
 0x11d   : > { %v1263_v47 = vadd.f32 %v1110_v54, %v5239_v61  ;;  %v1264_v27 = vadd.f32 %v1110_v54, %v5243_v62  ;;  %v5692_v52 = vadd.f32 %v5156_v34, %v1257_v40  ;;  %v5695_v20 = vadd.f32 %v5159_v35, %v1258_v29 }
 0x11e   : > { %v1552_v37 = vmax.f32 %v1551_v26, %v5655_v45  ;;  %v1547_v32 = vmax.f32 %v1546_v43, %v5677_v46  ;;  %v1555_v12 = vmax.f32 %v5680_v38, %v5683_v39  ;;  %v5702_v50 = vadd.f32 %v5146_v30, %v1259_v33 }
 0x11f   : > { %v1267_v59 = vadd.f32 %v1115_v15, %v5221_v56  ;;  %v1268_v61 = vadd.f32 %v1115_v15, %v5225_v57  ;;  %v5707_v62 = vadd.f32 %v5149_v31, %v1260_v36  ;;  %v1265_v44 = vadd.f32 %v1110_v54, %v5247_v63 }
 0x120   : > { %8101 = vst [vmem:[#allocation97_spill] sm:$0xff] %v5702_v50  ;;  %1553 = vmax.xlane.f32.xlu1 %v1552_v37  ;;  %1548 = vmax.xlane.f32.xlu0 %v1547_v32  ;;  %v1125_v40 = vpop.permute.xlu1 %1124  ;;  %v1120_v29 = vpop.permute.xlu0 %1119  ;;  %v1556_v43 = vmax.f32 %v1555_v12, %v5692_v52  ;;  %v5712_v26 = vadd.f32 %v5156_v34, %v1261_v42 }
 0x121   : > { %8102 = vst [vmem:[#allocation98_spill] sm:$0xff] %v5707_v62  ;;  %v5715_v33 = vadd.f32 %v5146_v30, %v1263_v47  ;;  %v1275_v56 = vadd.f32 %v1125_v40, %v5251_v0  ;;  %v1276_v57 = vadd.f32 %v1125_v40, %v5255_v1  ;;  %v5720_v36 = vadd.f32 %v5159_v35, %v1262_v49 }
 0x122   : > { %8103 = vst [vmem:[#allocation99_spill] sm:$0xff] %v5712_v26  ;;  %v1266_v63 = vadd.f32 %v1110_v54, %v5259_v2  ;;  %v1271_v37 = vadd.f32 %v1120_v29, %v5271_v11  ;;  %v1557_v32 = vmax.f32 %v1556_v43, %v5695_v20  ;;  %v1560_v42 = vmax.f32 %v5702_v50, %v5707_v62 }
 0x123   : > { %8104 = vst [vmem:[#allocation100_spill] sm:$0xff] %v5720_v36  ;;  %v5728_v12 = vadd.f32 %v5149_v31, %v1264_v27  ;;  %v1272_v47 = vadd.f32 %v1120_v29, %v5275_v14  ;;  %v5732_v0 = vadd.f32 %v5156_v34, %v1265_v44  ;;  %v1269_v1 = vadd.f32 %v1115_v15, %v5235_v60 }
 0x124   : > { %v5736_v49 = vadd.f32 %v5146_v30, %v1267_v59  ;;  %1558 = vmax.xlane.f32.xlu0 %v1557_v32  ;;  %v1135_v2 = vpop.permute.xlu1 %1134  ;;  %v1130_v11 = vpop.permute.xlu0 %1129  ;;  %v1561_v54 = vmax.f32 %v1560_v42, %v5712_v26  ;;  %v1270_v27 = vadd.f32 %v1115_v15, %v5263_v3  ;;  %v5743_v14 = vadd.f32 %v5149_v31, %v1268_v61 }
 0x125   : > { %v1565_v43 = vmax.f32 %v5715_v33, %v5728_v12  ;;  %v1283_v44 = vadd.f32 %v1135_v2, %v5287_v24  ;;  %v1284_v60 = vadd.f32 %v1135_v2, %v5291_v25  ;;  %v5748_v59 = vadd.f32 %v5159_v35, %v1266_v63 }
 0x126   : > { %8105 = vst [vmem:[#allocation101_spill] sm:$0xff] %v5736_v49  ;;  %8106 = vst [vmem:[#allocation102_spill] sm:$0xff] %v5743_v14  ;;  %v1273_v32 = vadd.f32 %v1120_v29, %v5279_v6  ;;  %v1279_v62 = vadd.f32 %v1130_v11, %v5307_v17  ;;  %v1280_v42 = vadd.f32 %v1130_v11, %v5311_v41 }
 0x127   : > { %v1562_v26 = vmax.f32 %v1561_v54, %v5720_v36  ;;  %v1566_v3 = vmax.f32 %v1565_v43, %v5732_v0  ;;  %v1570_v15 = vmax.f32 %v5736_v49, %v5743_v14  ;;  %v1274_v24 = vadd.f32 %v1120_v29, %v5295_v21  ;;  %v8113_v43 = vld [vmem:[#allocation15_spill] sm:$0xff] }
 0x128   : > { %v5759_v25 = vadd.f32 %v5146_v30, %v1271_v37  ;;  %v5762_v61 = vadd.f32 %v5149_v31, %v1272_v47  ;;  %v5765_v6 = vpop.permute.xlu1 %1144  ;;  %v1140_v41 = vpop.permute.xlu0 %1139  ;;  %v5768_v63 = vadd.f32 %v5156_v34, %v1269_v1  ;;  %v5771_v54 = vadd.f32 %v5159_v35, %v1270_v27  ;;  %v8111_v37 = vld [vmem:[#allocation18_spill] sm:$0xff]  ;;  %v8116_v49 = vld [vmem:[#allocation23_spill] sm:$0xff] }
 0x129   : > { %1563 = vmax.xlane.f32.xlu0 %v1562_v26  ;;  %v1567_v17 = vmax.f32 %v1566_v3, %v5748_v59  ;;  %v1277_v21 = vadd.f32 %v1125_v40, %v5267_v4  ;;  %v5776_v29 = vadd.f32 %v5765_v6, %v5319_v7  ;;  %v5780_v26 = vadd.f32 %v5765_v6, %v8111_v37  ;;  %v8114_v1 = vld [vmem:[#allocation22_spill] sm:$0xff] }
 0x12a   : > { %8107 = vst [vmem:[#allocation103_spill] sm:$0xff] %v5759_v25  ;;  %8108 = vst [vmem:[#allocation104_spill] sm:$0xff] %v5762_v61  ;;  %v5783_v47 = vadd.f32 %v5156_v34, %v1273_v32  ;;  %v1278_v3 = vadd.f32 %v1125_v40, %v8113_v43  ;;  %v1287_v14 = vadd.f32 %v1140_v41, %v8114_v1  ;;  %v8119_v40 = vld [vmem:[#allocation17_spill] sm:$0xff] }
 0x12b   : > { %8109 = vst [vmem:[#allocation105_spill] sm:$0xff] %v5768_v63  ;;  %8110 = vst [vmem:[#allocation106_spill] sm:$0xff] %v5771_v54  ;;  %1568 = vmax.xlane.f32.xlu1 %v1567_v17  ;;  %v1571_v27 = vmax.f32 %v1570_v15, %v5768_v63  ;;  %v1575_v4 = vmax.f32 %v5759_v25, %v5762_v61  ;;  %v5791_v7 = vadd.f32 %v5146_v30, %v1275_v56 }
 0x12c   : > { %8112 = vst [vmem:[#allocation18_spill] sm:$0xff] %v5783_v47  ;;  %v1288_v36 = vadd.f32 %v1140_v41, %v8116_v49  ;;  %v5795_v37 = vadd.f32 %v5159_v35, %v1274_v24  ;;  %v5798_v32 = vadd.f32 %v5149_v31, %v1276_v57  ;;  %v1281_v17 = vadd.f32 %v1130_v11, %v8119_v40  ;;  %v5803_v1 = vpop.permute.xlu1 %1154  ;;  %v1150_v63 = vpop.permute.xlu0 %1149  ;;  %v8122_v24 = vld [vmem:[#allocation25_spill] sm:$0xff] }
 0x12d   : > { %8115 = vst [vmem:[#allocation15_spill] sm:$0xff] %v5791_v7  ;;  %v1572_v43 = vmax.f32 %v1571_v27, %v5771_v54  ;;  %v1576_v15 = vmax.f32 %v1575_v4, %v5783_v47  ;;  %v5806_v56 = vadd.f32 %v5156_v34, %v1277_v21  ;;  %v5809_v49 = vadd.f32 %v5146_v30, %v1279_v62  ;;  %v8124_v4 = vld [vmem:[#allocation19_spill] sm:$0xff] }
 0x12e   : > { %8117 = vst [vmem:[#allocation22_spill] sm:$0xff] %v5795_v37  ;;  %8118 = vst [vmem:[#allocation23_spill] sm:$0xff] %v5798_v32  ;;  %v5813_v61 = vadd.f32 %v5803_v1, %v8122_v24  ;;  %v5817_v57 = vadd.f32 %v5803_v1, %v5355_v18  ;;  %v5820_v27 = vadd.f32 %v5159_v35, %v1278_v3  ;;  %v8127_v18 = vld [vmem:[#allocation16_spill] sm:$0xff] }
 0x12f   : > { %8120 = vst [vmem:[#allocation17_spill] sm:$0xff] %v5806_v56  ;;  %8121 = vst [vmem:[#allocation107_spill] sm:$0xff] %v5809_v49  ;;  %v1282_v40 = vadd.f32 %v1130_v11, %v8124_v4  ;;  %1573 = vmax.xlane.f32.xlu0 %v1572_v43  ;;  %v1577_v21 = vmax.f32 %v1576_v15, %v5795_v37  ;;  %v1295_v54 = vadd.f32 %v1150_v63, %v5371_v8  ;;  %v8128_v3 = vld [vmem:[#allocation20_spill] sm:$0xff] }
 0x130   : > { %8123 = vst [vmem:[#allocation25_spill] sm:$0xff] %v5820_v27  ;;  %v1580_v62 = vmax.f32 %v5791_v7, %v5798_v32  ;;  %v5828_v24 = vadd.f32 %v5149_v31, %v1280_v42  ;;  %v5831_v47 = vadd.f32 %v5156_v34, %v1281_v17  ;;  %v1285_v25 = vadd.f32 %v1135_v2, %v8127_v18  ;;  %v5841_v15 = vpop.permute.xlu1 %1164  ;;  %v5843_v42 = vpop.permute.xlu0 %1159  ;;  %v8131_v4 = vld [vmem:[#allocation24_spill] sm:$0xff]  ;;  %v8132_v32 = vld [vmem:[#allocation29_spill] sm:$0xff] }
 0x131   : > { %v1286_v50 = vadd.f32 %v1135_v2, %v8128_v3  ;;  %v5836_v11 = vadd.f32 %v5146_v30, %v1283_v44  ;;  %1578 = vmax.xlane.f32.xlu1 %v1577_v21  ;;  %v5846_v17 = vadd.f32 %v5149_v31, %v1284_v60  ;;  %v1289_v18 = vadd.f32 %v1140_v41, %v8131_v4  ;;  %v8134_v21 = vld [vmem:[#allocation31_spill] sm:$0xff]  ;;  %v8135_v3 = vld [vmem:[#allocation32_spill] sm:$0xff] }
 0x132   : > { %8125 = vst [vmem:[#allocation19_spill] sm:$0xff] %v5828_v24  ;;  %8126 = vst [vmem:[#allocation108_spill] sm:$0xff] %v5831_v47  ;;  %v1581_v43 = vmax.f32 %v1580_v62, %v5806_v56  ;;  %v1585_v8 = vmax.f32 %v5809_v49, %v5828_v24  ;;  %v1296_v2 = vadd.f32 %v1150_v63, %v8132_v32  ;;  %v8136_v24 = vld [vmem:[#allocation36_spill] sm:$0xff]  ;;  %v8138_v49 = vld [vmem:[#allocation26_spill] sm:$0xff] }
 0x133   : > { %8129 = vst [vmem:[#allocation16_spill] sm:$0xff] %v5836_v11  ;;  %8130 = vst [vmem:[#allocation20_spill] sm:$0xff] %v5846_v17  ;;  %v5851_v44 = vadd.f32 %v5159_v35, %v1282_v40  ;;  %v5855_v62 = vadd.f32 %v5841_v15, %v8134_v21  ;;  %v5859_v56 = vadd.f32 %v5841_v15, %v8135_v3 }
 0x134   : > { %v1582_v7 = vmax.f32 %v1581_v43, %v5820_v27  ;;  %v1586_v60 = vmax.f32 %v1585_v8, %v5831_v47  ;;  %v1303_v4 = vadd.f32 %v5843_v42, %v8136_v24  ;;  %v5866_v32 = vadd.f32 %v5156_v34, %v1285_v25  ;;  %v8141_v8 = vld [vmem:[#allocation37_spill] sm:$0xff] }
 0x135   : > { %8133 = vst [vmem:[#allocation24_spill] sm:$0xff] %v5851_v44  ;;  %v1590_v40 = vmax.f32 %v5836_v11, %v5846_v17  ;;  %v1290_v21 = vadd.f32 %v1140_v41, %v8138_v49  ;;  %v5872_v37 = vadd.f32 %v5146_v30, %v1287_v14  ;;  %v5875_v3 = vadd.f32 %v5149_v31, %v1288_v36  ;;  %v5886_v17 = vpop.permute.xlu1 %1174  ;;  %v5888_v41 = vpop.permute.xlu0 %1169 }
 0x136   : > { %8137 = vst [vmem:[#allocation29_spill] sm:$0xff] %v5866_v32  ;;  %1583 = vmax.xlane.f32.xlu0 %v1582_v7  ;;  %v1587_v43 = vmax.f32 %v1586_v60, %v5851_v44  ;;  %v1304_v24 = vadd.f32 %v5843_v42, %v8141_v8  ;;  %v5881_v25 = vadd.f32 %v5159_v35, %v1286_v50  ;;  %v8144_v7 = vld [vmem:[#allocation21_spill] sm:$0xff]  ;;  %v8145_v60 = vld [vmem:[#allocation27_spill] sm:$0xff] }
 0x137   : > { %8139 = vst [vmem:[#allocation31_spill] sm:$0xff] %v5872_v37  ;;  %8140 = vst [vmem:[#allocation32_spill] sm:$0xff] %v5875_v3  ;;  %v5884_v27 = vadd.f32 %v5156_v34, %v1289_v18  ;;  %v1591_v14 = vmax.f32 %v1590_v40, %v5866_v32  ;;  %v1595_v36 = vmax.f32 %v5872_v37, %v5875_v3  ;;  %v8147_v18 = vld [vmem:[#allocation39_spill] sm:$0xff]  ;;  %v8152_v37 = vld [vmem:[#allocation33_spill] sm:$0xff] }
 0x138   : > { %8142 = vst [vmem:[#allocation36_spill] sm:$0xff] %v5881_v25  ;;  %v1293_v49 = vadd.f32 %v5765_v6, %v8144_v7  ;;  %v1294_v8 = vadd.f32 %v5765_v6, %v8145_v60  ;;  %1588 = vmax.xlane.f32.xlu1 %v1587_v43  ;;  %v5898_v50 = vadd.f32 %v5159_v35, %v1290_v21  ;;  %v8150_v60 = vld [vmem:[#allocation43_spill] sm:$0xff] }
 0x139   : > { %8143 = vst [vmem:[#allocation26_spill] sm:$0xff] %v5884_v27  ;;  %v5902_v11 = vadd.f32 %v5886_v17, %v8147_v18  ;;  %v5906_v40 = vadd.f32 %v5886_v17, %v5419_v9  ;;  %v5910_v32 = vadd.f32 %v5146_v30, %v5776_v29  ;;  %v1592_v7 = vmax.f32 %v1591_v14, %v5881_v25  ;;  %v8151_v9 = vld [vmem:[#allocation30_spill] sm:$0xff]  ;;  %v5927_v14 = vpop.permute.xlu1 %1184 }
 0x13a   : > { %8146 = vst [vmem:[#allocation37_spill] sm:$0xff] %v5898_v50  ;;  %v1596_v6 = vmax.f32 %v1595_v36, %v5884_v27  ;;  %v1311_v21 = vadd.f32 %v5888_v41, %v5435_v13  ;;  %v5918_v43 = vadd.f32 %v5149_v31, %v5780_v26  ;;  %v1312_v18 = vadd.f32 %v5888_v41, %v8150_v60  ;;  %v5929_v36 = vpop.permute.xlu0 %1179  ;;  %v8161_v25 = vld [vmem:[#allocation34_spill] sm:$0xff] }
 0x13b   : > { %8148 = vst [vmem:[#allocation21_spill] sm:$0xff] %v5910_v32  ;;  %v1297_v3 = vadd.f32 %v1150_v63, %v8151_v9  ;;  %v1298_v44 = vadd.f32 %v1150_v63, %v8152_v37  ;;  %v5925_v29 = vadd.f32 %v5146_v30, %v1295_v54  ;;  %1593 = vmax.xlane.f32.xlu0 %v1592_v7  ;;  %v8158_v7 = vld [vmem:[#allocation45_spill] sm:$0xff] }
 0x13c   : > { %8149 = vst [vmem:[#allocation27_spill] sm:$0xff] %v5918_v43  ;;  %v1597_v13 = vmax.f32 %v1596_v6, %v5898_v50  ;;  %v5933_v26 = vadd.f32 %v5156_v34, %v1293_v49  ;;  %v1600_v60 = vmax.f32 %v5910_v32, %v5918_v43  ;;  %v5938_v9 = vadd.f32 %v5149_v31, %v1296_v2  ;;  %v8159_v43 = vld [vmem:[#allocation46_spill] sm:$0xff]  ;;  %v8160_v32 = vld [vmem:[#allocation28_spill] sm:$0xff] }
 0x13d   : > { %8153 = vst [vmem:[#allocation39_spill] sm:$0xff] %v5925_v29  ;;  %v5941_v63 = vadd.f32 %v5159_v35, %v1294_v8  ;;  %v5944_v54 = vadd.f32 %v5156_v34, %v1297_v3  ;;  %v5947_v37 = vadd.f32 %v5159_v35, %v1298_v44  ;;  %v5951_v6 = vadd.f32 %v5927_v14, %v8158_v7 }
 0x13e   : > { %8154 = vst [vmem:[#allocation43_spill] sm:$0xff] %v5933_v26  ;;  %8155 = vst [vmem:[#allocation30_spill] sm:$0xff] %v5938_v9  ;;  %1598 = vmax.xlane.f32.xlu1 %v1597_v13  ;;  %v1601_v49 = vmax.f32 %v1600_v60, %v5933_v26  ;;  %v1605_v2 = vmax.f32 %v5925_v29, %v5938_v9  ;;  %v5958_v8 = vadd.f32 %v5927_v14, %v8159_v43  ;;  %v8164_v60 = vld [vmem:[#allocation38_spill] sm:$0xff]  ;;  %v5974_v9 = vpop.permute.xlu1 %1194  ;;  %v5976_v43 = vpop.permute.xlu0 %1189 }
 0x13f   : > { %8156 = vst [vmem:[#allocation33_spill] sm:$0xff] %v5941_v63  ;;  %8157 = vst [vmem:[#allocation109_spill] sm:$0xff] %v5947_v37  ;;  %v1301_v3 = vadd.f32 %v5803_v1, %v8160_v32  ;;  %v1302_v44 = vadd.f32 %v5803_v1, %v8161_v25  ;;  %v5966_v7 = vadd.f32 %v5146_v30, %v5813_v61  ;;  %v8165_v1 = vld [vmem:[#allocation50_spill] sm:$0xff]  ;;  %v8166_v61 = vld [vmem:[#allocation40_spill] sm:$0xff] }
 0x140   : > { %v5970_v13 = vadd.f32 %v5149_v31, %v5817_v57  ;;  %v1305_v26 = vadd.f32 %v5843_v42, %v8164_v60  ;;  %v1602_v32 = vmax.f32 %v1601_v49, %v5941_v63  ;;  %v1606_v29 = vmax.f32 %v1605_v2, %v5944_v54  ;;  %v8170_v2 = vld [vmem:[#allocation51_spill] sm:$0xff] }
 0x141   : > { %8162 = vst [vmem:[#allocation45_spill] sm:$0xff] %v5966_v7  ;;  %v1319_v25 = vadd.f32 %v5929_v36, %v8165_v1  ;;  %v1306_v50 = vadd.f32 %v5843_v42, %v8166_v61  ;;  %v5985_v57 = vadd.f32 %v5156_v34, %v1301_v3  ;;  %v5990_v27 = vadd.f32 %v5146_v30, %v1303_v4  ;;  %v8182_v63 = vld [vmem:[#allocation47_spill] sm:$0xff] }
 0x142   : > { %8163 = vst [vmem:[#allocation46_spill] sm:$0xff] %v5970_v13  ;;  %v1610_v60 = vmax.f32 %v5966_v7, %v5970_v13  ;;  %v5993_v47 = vadd.f32 %v5149_v31, %v1304_v24  ;;  %1603 = vmax.xlane.f32.xlu0 %v1602_v32  ;;  %v1607_v49 = vmax.f32 %v1606_v29, %v5947_v37  ;;  %v8173_v32 = vld [vmem:[#allocation53_spill] sm:$0xff]  ;;  %v8175_v13 = vld [vmem:[#allocation35_spill] sm:$0xff] }
 0x143   : > { %8167 = vst [vmem:[#allocation28_spill] sm:$0xff] %v5985_v57  ;;  %8168 = vst [vmem:[#allocation34_spill] sm:$0xff] %v5990_v27  ;;  %v1320_v1 = vadd.f32 %v5929_v36, %v8170_v2  ;;  %v5999_v42 = vadd.f32 %v5159_v35, %v1302_v44  ;;  %v6002_v3 = vadd.f32 %v5156_v34, %v1305_v26  ;;  %v8174_v2 = vld [vmem:[#allocation54_spill] sm:$0xff]  ;;  %v8176_v7 = vld [vmem:[#allocation41_spill] sm:$0xff] }
 0x144   : > { %8169 = vst [vmem:[#allocation38_spill] sm:$0xff] %v5993_v47  ;;  %v1611_v61 = vmax.f32 %v1610_v60, %v5985_v57  ;;  %v6006_v4 = vadd.f32 %v5159_v35, %v1306_v50  ;;  %v1615_v24 = vmax.f32 %v5990_v27, %v5993_v47  ;;  %v6012_v29 = vadd.f32 %v5974_v9, %v8173_v32  ;;  %v6026_v57 = vpop.permute.xlu1 %1204  ;;  %v8179_v47 = vld [vmem:[#allocation44_spill] sm:$0xff]  ;;  %v6036_v27 = vpop.permute.xlu0 %1199  ;;  %v8189_v37 = vld [vmem:[#allocation13_spill] sm:$0xff] }
 0x145   : > { %8171 = vst [vmem:[#allocation50_spill] sm:$0xff] %v5999_v42  ;;  %8172 = vst [vmem:[#allocation40_spill] sm:$0xff] %v6002_v3  ;;  %1608 = vmax.xlane.f32.xlu1 %v1607_v49  ;;  %v6016_v44 = vadd.f32 %v5974_v9, %v8174_v2  ;;  %v1309_v26 = vadd.f32 %v5841_v15, %v8175_v13  ;;  %v1310_v60 = vadd.f32 %v5841_v15, %v8176_v7  ;;  %v8180_v15 = vld [vmem:[#allocation58_spill] sm:$0xff] }
 0x146   : > { %v6024_v50 = vadd.f32 %v5146_v30, %v5855_v62  ;;  %v1612_v32 = vmax.f32 %v1611_v61, %v5999_v42  ;;  %v1616_v49 = vmax.f32 %v1615_v24, %v6002_v3  ;;  %v6032_v2 = vadd.f32 %v5149_v31, %v5859_v56  ;;  %v8181_v30 = vld [vmem:[#allocation59_spill] sm:$0xff]  ;;  %v8186_v3 = vld [vmem:[#allocation12_spill] sm:$0xff] }
 0x147   : > { %v1313_v13 = vadd.f32 %v5888_v41, %v8179_v47  ;;  %v1327_v7 = vadd.f32 %v5976_v43, %v8180_v15  ;;  %v1328_v62 = vadd.f32 %v5976_v43, %v8181_v30  ;;  %v1314_v61 = vadd.f32 %v5888_v41, %v8182_v63  ;;  %v8183_v42 = vld [vmem:[#allocation11_spill] sm:$0xff] }
 0x148   : > { %8177 = vst [vmem:[#allocation51_spill] sm:$0xff] %v6024_v50  ;;  %8178 = vst [vmem:[#allocation53_spill] sm:$0xff] %v6032_v2  ;;  %v6045_v24 = vadd.f32 %v8183_v42, %v1311_v21  ;;  %1613 = vmax.xlane.f32.xlu0 %v1612_v32  ;;  %v1617_v31 = vmax.f32 %v1616_v49, %v6006_v4  ;;  %v6049_v56 = vadd.f32 %v5156_v34, %v1309_v26  ;;  %v8190_v21 = vld [vmem:[#allocation14_spill] sm:$0xff]  ;;  %v8191_v32 = vld [vmem:[#allocation61_spill] sm:$0xff] }
 0x149   : > { %v1620_v47 = vmax.f32 %v6024_v50, %v6032_v2  ;;  %v6054_v15 = vadd.f32 %v8186_v3, %v1312_v18  ;;  %v6057_v30 = vadd.f32 %v5159_v35, %v1310_v60  ;;  %v6060_v41 = vadd.f32 %v8189_v37, %v1313_v13  ;;  %v8192_v26 = vld [vmem:[#allocation62_spill] sm:$0xff]  ;;  %v8194_v2 = vld [vmem:[#allocation48_spill] sm:$0xff]  ;;  %v6090_v50 = vpop.permute.xlu1 %1214 }
 0x14a   : > { %8184 = vst [vmem:[#allocation54_spill] sm:$0xff] %v6045_v24  ;;  %8185 = vst [vmem:[#allocation35_spill] sm:$0xff] %v6049_v56  ;;  %v6063_v63 = vadd.f32 %v8190_v21, %v1314_v61  ;;  %v6067_v49 = vadd.f32 %v6026_v57, %v8191_v32  ;;  %1618 = vmax.xlane.f32.xlu1 %v1617_v31  ;;  %v6074_v35 = vadd.f32 %v6026_v57, %v8192_v26  ;;  %v8193_v60 = vld [vmem:[#allocation42_spill] sm:$0xff] }
 0x14b   : > { %8187 = vst [vmem:[#allocation41_spill] sm:$0xff] %v6054_v15  ;;  %8188 = vst [vmem:[#allocation44_spill] sm:$0xff] %v6057_v30  ;;  %v1621_v34 = vmax.f32 %v1620_v47, %v6049_v56  ;;  %v1625_v18 = vmax.f32 %v6045_v24, %v6054_v15  ;;  %v1317_v13 = vadd.f32 %v5886_v17, %v8193_v60  ;;  %v8197_v47 = vld [vmem:[#allocation52_spill] sm:$0xff]  ;;  %v6098_v15 = vpop.permute.xlu0 %1209 }
 0x14c   : > { %v1318_v61 = vadd.f32 %v5886_v17, %v8194_v2  ;;  %v6082_v32 = vadd.f32 %v8183_v42, %v5902_v11  ;;  %v6086_v31 = vadd.f32 %v8186_v3, %v5906_v40  ;;  %v1321_v56 = vadd.f32 %v5929_v36, %v8197_v47  ;;  %v8198_v2 = vld [vmem:[#allocation55_spill] sm:$0xff] }
 0x14d   : > { %v1622_v26 = vmax.f32 %v1621_v34, %v6057_v30  ;;  %v1626_v60 = vmax.f32 %v1625_v18, %v6060_v41  ;;  %v1335_v17 = vadd.f32 %v6036_v27, %v5527_v23  ;;  %v1322_v11 = vadd.f32 %v5929_v36, %v8198_v2  ;;  %v8202_v18 = vld [vmem:[#allocation66_spill] sm:$0xff]  ;;  %v8208_v30 = vld [vmem:[#allocation56_spill] sm:$0xff] }
 0x14e   : > { %8195 = vst [vmem:[#allocation58_spill] sm:$0xff] %v6082_v32  ;;  %8196 = vst [vmem:[#allocation59_spill] sm:$0xff] %v6086_v31  ;;  %v6101_v40 = vadd.f32 %v8189_v37, %v1317_v13  ;;  %v1630_v47 = vmax.f32 %v6082_v32, %v6086_v31  ;;  %v6106_v24 = vadd.f32 %v8183_v42, %v1319_v25  ;;  %v8207_v32 = vld [vmem:[#allocation49_spill] sm:$0xff] }
 0x14f   : > { %v6109_v34 = vadd.f32 %v8186_v3, %v1320_v1  ;;  %1623 = vmax.xlane.f32.xlu0 %v1622_v26  ;;  %v1627_v23 = vmax.f32 %v1626_v60, %v6063_v63  ;;  %v1336_v36 = vadd.f32 %v6036_v27, %v8202_v18  ;;  %v6115_v2 = vadd.f32 %v8190_v21, %v1318_v61  ;;  %v8205_v26 = vld [vmem:[#allocation68_spill] sm:$0xff]  ;;  %v8206_v18 = vld [vmem:[#allocation69_spill] sm:$0xff] }
 0x150   : > { %8199 = vst [vmem:[#allocation47_spill] sm:$0xff] %v6101_v40  ;;  %8200 = vst [vmem:[#allocation11_spill] sm:$0xff] %v6106_v24  ;;  %v6118_v13 = vadd.f32 %v8189_v37, %v1321_v56  ;;  %v1631_v31 = vmax.f32 %v1630_v47, %v6101_v40  ;;  %v6122_v25 = vadd.f32 %v8190_v21, %v1322_v11 }
 0x151   : > { %8201 = vst [vmem:[#allocation12_spill] sm:$0xff] %v6109_v34  ;;  %8203 = vst [vmem:[#allocation13_spill] sm:$0xff] %v6115_v2  ;;  %v1635_v1 = vmax.f32 %v6106_v24, %v6109_v34  ;;  %v6128_v60 = vadd.f32 %v6090_v50, %v8205_v26  ;;  %1628 = vmax.xlane.f32.xlu1 %v1627_v23  ;;  %v6132_v61 = vadd.f32 %v6090_v50, %v8206_v18  ;;  %v8211_v18 = vld [vmem:[#allocation60_spill] sm:$0xff]  ;;  %v6150_v24 = vpop.permute.xlu1 %1224 }
 0x152   : > { %8204 = vst [vmem:[#allocation14_spill] sm:$0xff] %v6118_v13  ;;  %v1325_v56 = vadd.f32 %v5927_v14, %v8207_v32  ;;  %v1326_v47 = vadd.f32 %v5927_v14, %v8208_v30  ;;  %v6140_v11 = vadd.f32 %v8183_v42, %v5951_v6  ;;  %v1632_v40 = vmax.f32 %v1631_v31, %v6115_v2  ;;  %v8212_v30 = vld [vmem:[#allocation73_spill] sm:$0xff]  ;;  %v8213_v32 = vld [vmem:[#allocation63_spill] sm:$0xff]  ;;  %v6161_v2 = vpop.permute.xlu0 %1219 }
 0x153   : > { %v1636_v26 = vmax.f32 %v1635_v1, %v6118_v13  ;;  %v6146_v23 = vadd.f32 %v8186_v3, %v5958_v8  ;;  %v1329_v34 = vadd.f32 %v5976_v43, %v8211_v18  ;;  %v1343_v14 = vadd.f32 %v6098_v15, %v5551_v55 }
 0x154   : > { %8209 = vst [vmem:[#allocation61_spill] sm:$0xff] %v6140_v11  ;;  %v1344_v6 = vadd.f32 %v6098_v15, %v8212_v30  ;;  %v1330_v31 = vadd.f32 %v5976_v43, %v8213_v32  ;;  %v6159_v1 = vadd.f32 %v8183_v42, %v1327_v7  ;;  %1633 = vmax.xlane.f32.xlu0 %v1632_v40  ;;  %v8220_v40 = vld [vmem:[#allocation75_spill] sm:$0xff]  ;;  %v8221_v32 = vld [vmem:[#allocation76_spill] sm:$0xff] }
 0x155   : > { %8210 = vst [vmem:[#allocation62_spill] sm:$0xff] %v6146_v23  ;;  %v1637_v8 = vmax.f32 %v1636_v26, %v6122_v25  ;;  %v6165_v18 = vadd.f32 %v8189_v37, %v1325_v56  ;;  %v1640_v55 = vmax.f32 %v6140_v11, %v6146_v23  ;;  %v6170_v13 = vadd.f32 %v8186_v3, %v1328_v62  ;;  %v8222_v23 = vld [vmem:[#allocation57_spill] sm:$0xff]  ;;  %v8223_v11 = vld [vmem:[#allocation64_spill] sm:$0xff] }
 0x156   : > { %8214 = vst [vmem:[#allocation42_spill] sm:$0xff] %v6159_v1  ;;  %v6173_v30 = vadd.f32 %v8190_v21, %v1326_v47  ;;  %v6176_v43 = vadd.f32 %v8189_v37, %v1329_v34  ;;  %v6179_v7 = vadd.f32 %v8190_v21, %v1330_v31  ;;  %v6183_v26 = vadd.f32 %v6150_v24, %v8220_v40 }
 0x157   : > { %8215 = vst [vmem:[#allocation48_spill] sm:$0xff] %v6165_v18  ;;  %8216 = vst [vmem:[#allocation52_spill] sm:$0xff] %v6170_v13  ;;  %1638 = vmax.xlane.f32.xlu1 %v1637_v8  ;;  %v1641_v56 = vmax.f32 %v1640_v55, %v6165_v18  ;;  %v1645_v62 = vmax.f32 %v6159_v1, %v6170_v13  ;;  %v6190_v47 = vadd.f32 %v6150_v24, %v8221_v32  ;;  %v8226_v55 = vld [vmem:[#allocation67_spill] sm:$0xff]  ;;  %v8227_v1 = vld [vmem:[#allocation70_spill] sm:$0xff] }
 0x158   : > { %8217 = vst [vmem:[#allocation55_spill] sm:$0xff] %v6173_v30  ;;  %8218 = vst [vmem:[#allocation66_spill] sm:$0xff] %v6176_v43  ;;  %v1333_v34 = vadd.f32 %v5974_v9, %v8222_v23  ;;  %v1334_v31 = vadd.f32 %v5974_v9, %v8223_v11  ;;  %v6198_v40 = vadd.f32 %v8183_v42, %v6012_v29  ;;  %v6212_v11 = vpop.permute.xlu1 %1234 }
 0x159   : > { %8219 = vst [vmem:[#allocation68_spill] sm:$0xff] %v6179_v7  ;;  %v6202_v8 = vadd.f32 %v8186_v3, %v6016_v44  ;;  %v1337_v18 = vadd.f32 %v6036_v27, %v8226_v55  ;;  %v1642_v32 = vmax.f32 %v1641_v56, %v6173_v30  ;;  %v1646_v13 = vmax.f32 %v1645_v62, %v6176_v43  ;;  %v6225_v62 = vpop.permute.xlu0 %1229  ;;  %v8244_v43 = vld [vmem:[#allocation74_spill] sm:$0xff] }
 0x15a   : > { %8224 = vst [vmem:[#allocation69_spill] sm:$0xff] %v6198_v40  ;;  %v1351_v23 = vadd.f32 %v6161_v2, %v5575_v22  ;;  %v1338_v9 = vadd.f32 %v6036_v27, %v8227_v1  ;;  %v6215_v29 = vadd.f32 %v8189_v37, %v1333_v34  ;;  %v6220_v55 = vadd.f32 %v8183_v42, %v1335_v17  ;;  %v8231_v27 = vld [vmem:[#allocation80_spill] sm:$0xff] }
 0x15b   : > { %8225 = vst [vmem:[#allocation49_spill] sm:$0xff] %v6202_v8  ;;  %v1650_v44 = vmax.f32 %v6198_v40, %v6202_v8  ;;  %v6223_v56 = vadd.f32 %v8186_v3, %v1336_v36  ;;  %1643 = vmax.xlane.f32.xlu0 %v1642_v32  ;;  %v1647_v22 = vmax.f32 %v1646_v13, %v6179_v7  ;;  %v8235_v32 = vld [vmem:[#allocation87_spill] sm:$0xff]  ;;  %v8237_v40 = vld [vmem:[#allocation89_spill] sm:$0xff] }
 0x15c   : > { %8228 = vst [vmem:[#allocation56_spill] sm:$0xff] %v6215_v29  ;;  %8229 = vst [vmem:[#allocation60_spill] sm:$0xff] %v6220_v55  ;;  %v1352_v1 = vadd.f32 %v6161_v2, %v8231_v27  ;;  %v6231_v34 = vadd.f32 %v8190_v21, %v1334_v31  ;;  %v6234_v30 = vadd.f32 %v8189_v37, %v1337_v18  ;;  %v8236_v27 = vld [vmem:[#allocation88_spill] sm:$0xff] }
 0x15d   : > { %8230 = vst [vmem:[#allocation73_spill] sm:$0xff] %v6223_v56  ;;  %v1651_v17 = vmax.f32 %v1650_v44, %v6215_v29  ;;  %v6238_v8 = vadd.f32 %v8190_v21, %v1338_v9  ;;  %v1655_v36 = vmax.f32 %v6220_v55, %v6223_v56  ;;  %v6244_v13 = vadd.f32 %v6212_v11, %v8235_v32  ;;  %v8238_v44 = vld [vmem:[#allocation65_spill] sm:$0xff]  ;;  %v8239_v29 = vld [vmem:[#allocation71_spill] sm:$0xff] }
 0x15e   : > { %8232 = vst [vmem:[#allocation63_spill] sm:$0xff] %v6231_v34  ;;  %8233 = vst [vmem:[#allocation75_spill] sm:$0xff] %v6234_v30  ;;  %1648 = vmax.xlane.f32.xlu1 %v1647_v22  ;;  %v6248_v31 = vadd.f32 %v6212_v11, %v8236_v27  ;;  %v6252_v18 = vadd.f32 %v6212_v11, %v8237_v40  ;;  %v1341_v9 = vadd.f32 %v6026_v57, %v8238_v44  ;;  %v8242_v40 = vld [vmem:[#allocation82_spill] sm:$0xff] }
 0x15f   : > { %8234 = vst [vmem:[#allocation76_spill] sm:$0xff] %v6238_v8  ;;  %v1342_v7 = vadd.f32 %v6026_v57, %v8239_v29  ;;  %v1652_v56 = vmax.f32 %v1651_v17, %v6231_v34  ;;  %v1656_v32 = vmax.f32 %v1655_v36, %v6234_v30  ;;  %v6262_v22 = vadd.f32 %v8183_v42, %v6067_v49  ;;  %v8245_v29 = vld [vmem:[#allocation77_spill] sm:$0xff]  ;;  %v6277_v36 = vpop.permute.xlu1 %1244 }
 0x160   : > { %v6266_v27 = vadd.f32 %v8186_v3, %v6074_v35  ;;  %v1359_v55 = vadd.f32 %v6225_v62, %v8242_v40  ;;  %v6271_v44 = vadd.f32 %v8189_v37, %v1341_v9  ;;  %v1345_v57 = vadd.f32 %v6098_v15, %v8244_v43  ;;  %v6288_v40 = vpop.permute.xlu0 %1239  ;;  %v8248_v43 = vld [vmem:[#allocation83_spill] sm:$0xff] }
 0x161   : > { %8240 = vst [vmem:[#allocation57_spill] sm:$0xff] %v6262_v22  ;;  %v1346_v17 = vadd.f32 %v6098_v15, %v8245_v29  ;;  %1653 = vmax.xlane.f32.xlu0 %v1652_v56  ;;  %v1657_v49 = vmax.f32 %v1656_v32, %v6238_v8  ;;  %v6283_v34 = vadd.f32 %v8183_v42, %v1343_v14 }
 0x162   : > { %8241 = vst [vmem:[#allocation64_spill] sm:$0xff] %v6266_v27  ;;  %8243 = vst [vmem:[#allocation67_spill] sm:$0xff] %v6271_v44  ;;  %v1660_v35 = vmax.f32 %v6262_v22, %v6266_v27  ;;  %v6286_v9 = vadd.f32 %v8186_v3, %v1344_v6  ;;  %v1360_v30 = vadd.f32 %v6225_v62, %v8248_v43  ;;  %v8250_v27 = vld [vmem:[#allocation95_spill] sm:$0xff] }
 0x163   : > { %8246 = vst [vmem:[#allocation70_spill] sm:$0xff] %v6283_v34  ;;  %v6293_v15 = vadd.f32 %v8190_v21, %v1342_v7  ;;  %v6296_v56 = vadd.f32 %v8189_v37, %v1345_v57  ;;  %v6299_v32 = vadd.f32 %v8190_v21, %v1346_v17  ;;  %1658 = vmax.xlane.f32.xlu1 %v1657_v49  ;;  %v8251_v7 = vld [vmem:[#allocation90_spill] sm:$0xff]  ;;  %v8252_v57 = vld [vmem:[#allocation72_spill] sm:$0xff] }
 0x164   : > { %8247 = vst [vmem:[#allocation80_spill] sm:$0xff] %v6286_v9  ;;  %v1661_v14 = vmax.f32 %v1660_v35, %v6271_v44  ;;  %v1665_v6 = vmax.f32 %v6283_v34, %v6286_v9  ;;  %v1371_v29 = vadd.f32 %v6277_v36, %v5623_v5  ;;  %v1372_v43 = vadd.f32 %v6277_v36, %v8250_v27  ;;  %v8253_v17 = vld [vmem:[#allocation78_spill] sm:$0xff]  ;;  %v8255_v9 = vld [vmem:[#allocation81_spill] sm:$0xff]  ;;  %v8256_v34 = vld [vmem:[#allocation91_spill] sm:$0xff] }
 0x165   : > { %8249 = vst [vmem:[#allocation87_spill] sm:$0xff] %v6293_v15  ;;  %v1367_v22 = vadd.f32 %v6288_v40, %v8251_v7  ;;  %v1349_v8 = vadd.f32 %v6090_v50, %v8252_v57  ;;  %v1350_v49 = vadd.f32 %v6090_v50, %v8253_v17  ;;  %v6316_v35 = vadd.f32 %v8183_v42, %v6128_v60  ;;  %v8258_v17 = vld [vmem:[#allocation84_spill] sm:$0xff] }
 0x166   : > { %v1662_v44 = vmax.f32 %v1661_v14, %v6293_v15  ;;  %v1666_v5 = vmax.f32 %v1665_v6, %v6296_v56  ;;  %v6322_v27 = vadd.f32 %v8186_v3, %v6132_v61  ;;  %v1353_v7 = vadd.f32 %v6161_v2, %v8255_v9  ;;  %v8259_v15 = vld [vmem:[#allocation79_spill] sm:$0xff] }
 0x167   : > { %v1368_v57 = vadd.f32 %v6288_v40, %v8256_v34  ;;  %v6329_v50 = vadd.f32 %v8189_v37, %v1349_v8  ;;  %v1354_v60 = vadd.f32 %v6161_v2, %v8258_v17  ;;  %v6334_v14 = vadd.f32 %v8183_v42, %v1351_v23  ;;  %v8260_v23 = vld [vmem:[#allocation85_spill] sm:$0xff]  ;;  %v8261_v17 = vld [vmem:[#allocation86_spill] sm:$0xff] }
 0x168   : > { %8254 = vst [vmem:[#allocation88_spill] sm:$0xff] %v6322_v27  ;;  %1663 = vmax.xlane.f32.xlu0 %v1662_v44  ;;  %v1667_v6 = vmax.f32 %v1666_v5, %v6299_v32  ;;  %v6338_v61 = vadd.f32 %v8190_v21, %v1350_v49  ;;  %v1670_v9 = vmax.f32 %v6316_v35, %v6322_v27 }
 0x169   : > { %8257 = vst [vmem:[#allocation89_spill] sm:$0xff] %v6329_v50  ;;  %v6343_v34 = vadd.f32 %v8186_v3, %v1352_v1  ;;  %v6346_v8 = vadd.f32 %v8189_v37, %v1353_v7  ;;  %v1357_v2 = vadd.f32 %v6150_v24, %v8259_v15  ;;  %v1358_v44 = vadd.f32 %v6150_v24, %v8260_v23 }
 0x16a   : > { %v6354_v5 = vadd.f32 %v8183_v42, %v6183_v26  ;;  %1668 = vmax.xlane.f32.xlu1 %v1667_v6  ;;  %v1671_v49 = vmax.f32 %v1670_v9, %v6329_v50  ;;  %v6361_v7 = vadd.f32 %v8186_v3, %v6190_v47  ;;  %v1361_v15 = vadd.f32 %v6225_v62, %v8261_v17  ;;  %v8263_v26 = vld [vmem:[#allocation92_spill] sm:$0xff] }
 0x16b   : > { %v1675_v1 = vmax.f32 %v6334_v14, %v6343_v34  ;;  %v6366_v27 = vadd.f32 %v8190_v21, %v1354_v60  ;;  %v6369_v24 = vadd.f32 %v8189_v37, %v1357_v2  ;;  %v1362_v6 = vadd.f32 %v6225_v62, %v8263_v26  ;;  %v8264_v62 = vld [vmem:[#allocation93_spill] sm:$0xff] }
 0x16c   : > { %v6374_v9 = vadd.f32 %v8183_v42, %v1359_v55  ;;  %v1672_v23 = vmax.f32 %v1671_v49, %v6338_v61  ;;  %v1680_v50 = vmax.f32 %v6354_v5, %v6361_v7  ;;  %v6381_v17 = vadd.f32 %v8186_v3, %v1360_v30 }
 0x16d   : > { %8262 = vst [vmem:[#allocation65_spill] sm:$0xff] %v6369_v24  ;;  %v1676_v47 = vmax.f32 %v1675_v1, %v6346_v8  ;;  %v6384_v60 = vadd.f32 %v8190_v21, %v1358_v44  ;;  %v6387_v2 = vadd.f32 %v8189_v37, %v1361_v15  ;;  %v1366_v55 = vadd.f32 %v6212_v11, %v8264_v62 }
 0x16e   : > { %v6393_v49 = vadd.f32 %v8183_v42, %v6244_v13  ;;  %1673 = vmax.xlane.f32.xlu0 %v1672_v23  ;;  %v1681_v26 = vmax.f32 %v1680_v50, %v6369_v24  ;;  %v1685_v30 = vmax.f32 %v6374_v9, %v6381_v17  ;;  %v6401_v44 = vadd.f32 %v8186_v3, %v6248_v31  ;;  %v8268_v23 = vld [vmem:[#allocation94_spill] sm:$0xff] }
 0x16f   : > { %v1677_v1 = vmax.f32 %v1676_v47, %v6366_v27  ;;  %v1373_v15 = vadd.f32 %v6277_v36, %v5629_v10  ;;  %v6406_v11 = vadd.f32 %v8190_v21, %v1362_v6  ;;  %v6410_v13 = vadd.f32 %v8189_v37, %v6252_v18 }
 0x170   : > { %8265 = vst [vmem:[#allocation71_spill] sm:$0xff] %v6393_v49  ;;  %8266 = vst [vmem:[#allocation82_spill] sm:$0xff] %v6401_v44  ;;  %v1369_v50 = vadd.f32 %v6288_v40, %v8268_v23  ;;  %v1682_v47 = vmax.f32 %v1681_v26, %v6384_v60  ;;  %v1686_v62 = vmax.f32 %v1685_v30, %v6387_v2 }
 0x171   : > { %8267 = vst [vmem:[#allocation74_spill] sm:$0xff] %v6410_v13  ;;  %1678 = vmax.xlane.f32.xlu1 %v1677_v1  ;;  %v1690_v31 = vmax.f32 %v6393_v49, %v6401_v44  ;;  %v6419_v10 = vadd.f32 %v8183_v42, %v1367_v22  ;;  %v6422_v6 = vadd.f32 %v8190_v21, %v1366_v55  ;;  %v8319_v44 = vld [vmem:[#allocation16_spill] sm:$0xff] }
 0x172   : > { %v1370_v18 = vadd.f32 %v6288_v40, %v5658_v48  ;;  %v6427_v24 = vadd.f32 %v8186_v3, %v1368_v57  ;;  %v1374_v1 = vadd.f32 %v6277_v36, %v5661_v58  ;;  %1683 = vmax.xlane.f32.xlu0 %v1682_v47  ;;  %v1687_v26 = vmax.f32 %v1686_v62, %v6406_v11 }
 0x173   : > { %8269 = vst [vmem:[#allocation77_spill] sm:$0xff] %v6419_v10  ;;  %8270 = vst [vmem:[#allocation83_spill] sm:$0xff] %v6422_v6  ;;  %v1691_v30 = vmax.f32 %v1690_v31, %v6410_v13  ;;  %v6434_v22 = vadd.f32 %v8183_v42, %v1371_v29  ;;  %v6437_v55 = vadd.f32 %v8186_v3, %v1372_v43 }
 0x174   : > { %8271 = vst [vmem:[#allocation95_spill] sm:$0xff] %v6427_v24  ;;  %v6440_v23 = vadd.f32 %v8189_v37, %v1369_v50  ;;  %v1695_v48 = vmax.f32 %v6419_v10, %v6427_v24  ;;  %v6446_v36 = vadd.f32 %v8189_v37, %v1373_v15  ;;  %v6451_v42 = vadd.f32 %v8190_v21, %v1370_v18 }
 0x175   : > { %8272 = vst [vmem:[#allocation90_spill] sm:$0xff] %v6434_v22  ;;  %8273 = vst [vmem:[#allocation72_spill] sm:$0xff] %v6437_v55  ;;  %1688 = vmax.xlane.f32.xlu1 %v1687_v26  ;;  %v1692_v58 = vmax.f32 %v1691_v30, %v6422_v6  ;;  %v1700_v40 = vmax.f32 %v6434_v22, %v6437_v55  ;;  %v6455_v29 = vadd.f32 %v8190_v21, %v1374_v1  ;;  %v8278_v1 = vld [vmem:[#allocation96_spill] sm:$0xff] }
 0x176   : > { %8274 = vst [vmem:[#allocation78_spill] sm:$0xff] %v6440_v23  ;;  %8275 = vst [vmem:[#allocation81_spill] sm:$0xff] %v6446_v36  ;;  %v1696_v3 = vmax.f32 %v1695_v48, %v6440_v23 }
 0x177   : > { %8276 = vst [vmem:[#allocation91_spill] sm:$0xff] %v6451_v42  ;;  %1693 = vmax.xlane.f32.xlu0 %v1692_v58  ;;  %8277 = vst [vmem:[#allocation84_spill] sm:$0xff] %v6455_v29  ;;  %v1701_v43 = vmax.f32 %v1700_v40, %v6446_v36 }
 0x178   : > { %v1697_v57 = vmax.f32 %v1696_v3, %v6451_v42 }
 0x179   : > { %v1702_v50 = vmax.f32 %v1701_v43, %v6455_v29 }
 0x17a   : > { %1698 = vmax.xlane.f32.xlu1 %v1697_v57 }
 0x17b   : > { %1703 = vmax.xlane.f32.xlu0 %v1702_v50 }
 0x1a9   : > { %v1554_v37 = vpop.xlane.xlu1 %1553  ;;  %v1549_v15 = vpop.xlane.xlu0 %1548 }
 0x1aa   : > { %v1709_v47 = vsub.f32 %v5640_v19, %v1554_v37  ;;  %v1710_v62 = vsub.f32 %v5643_v28, %v1554_v37  ;;  %v1711_v31 = vsub.f32 %v5652_v53, %v1554_v37  ;;  %v1712_v18 = vsub.f32 %v5655_v45, %v1554_v37 }
 0x1ab   : > { %v1705_v21 = vsub.f32 %v5646_v51, %v1549_v15  ;;  %v1706_v26 = vsub.f32 %v8278_v1, %v1549_v15  ;;  %v1707_v40 = vsub.f32 %v5667_v16, %v1549_v15  ;;  %v1708_v43 = vsub.f32 %v5677_v46, %v1549_v15  ;;  %v8279_v1 = vld [vmem:[#allocation97_spill] sm:$0xff] }
 0x1ac   : > { %v1841_v30 = vmul.f32 1.442695, %v1709_v47  ;;  %v1843_v48 = vmul.f32 1.442695, %v1710_v62  ;;  %v1845_v58 = vmul.f32 1.442695, %v1711_v31 }
 0x1ad   : > { %v1847_v3 = vmul.f32 1.442695, %v1712_v18  ;;  %v1559_v57 = vpop.xlane.xlu0 %1558  ;;  %v1833_v19 = vmul.f32 1.442695, %v1705_v21  ;;  %v1835_v53 = vmul.f32 1.442695, %v1706_v26 }
 0x1ae   : > { %4246 = vpow2.f32 %v1841_v30  ;;  %v1713_v28 = vsub.f32 %v5680_v38, %v1559_v57  ;;  %v1714_v45 = vsub.f32 %v5683_v39, %v1559_v57  ;;  %v1715_v51 = vsub.f32 %v5692_v52, %v1559_v57 }
 0x1af   : > { %4248 = vpow2.f32 %v1843_v48  ;;  %v1837_v50 = vmul.f32 1.442695, %v1707_v40  ;;  %v1839_v37 = vmul.f32 1.442695, %v1708_v43  ;;  %v1716_v16 = vsub.f32 %v5695_v20, %v1559_v57  ;;  %v8280_v48 = vld [vmem:[#allocation98_spill] sm:$0xff]  ;;  %v8282_v43 = vld [vmem:[#allocation100_spill] sm:$0xff] }
 0x1b0   : > { %4250 = vpow2.f32 %v1845_v58  ;;  %v1849_v47 = vmul.f32 1.442695, %v1713_v28  ;;  %v1851_v46 = vmul.f32 1.442695, %v1714_v45  ;;  %v1853_v15 = vmul.f32 1.442695, %v1715_v51 }
 0x1b1   : > { %4252 = vpow2.f32 %v1847_v3  ;;  %v1855_v18 = vmul.f32 1.442695, %v1716_v16  ;;  %v8281_v3 = vld [vmem:[#allocation99_spill] sm:$0xff]  ;;  %v8285_v51 = vld [vmem:[#allocation104_spill] sm:$0xff] }
 0x1b2   : > { %4254 = vpow2.f32 %v1833_v19  ;;  %v1564_v31 = vpop.xlane.xlu0 %1563 }
 0x1b3   : > { %4256 = vpow2.f32 %v1835_v53  ;;  %v1717_v26 = vsub.f32 %v8279_v1, %v1564_v31  ;;  %v1718_v58 = vsub.f32 %v8280_v48, %v1564_v31 }
 0x1b4   : > { %v1569_v62 = vpop.xlane.xlu1 %1568  ;;  %4258 = vpow2.f32 %v1837_v50 }
 0x1b5   : > { %v1721_v38 = vsub.f32 %v5715_v33, %v1569_v62  ;;  %v1722_v39 = vsub.f32 %v5728_v12, %v1569_v62  ;;  %v1723_v52 = vsub.f32 %v5732_v0, %v1569_v62  ;;  %4260 = vpow2.f32 %v1839_v37 }
 0x1b6   : > { %v1724_v21 = vsub.f32 %v5748_v59, %v1569_v62  ;;  %4262 = vpow2.f32 %v1849_v47  ;;  %v1719_v33 = vsub.f32 %v8281_v3, %v1564_v31  ;;  %v1720_v0 = vsub.f32 %v8282_v43, %v1564_v31  ;;  %v8283_v59 = vld [vmem:[#allocation103_spill] sm:$0xff] }
 0x1b7   : > { %v1865_v20 = vmul.f32 1.442695, %v1721_v38  ;;  %4264 = vpow2.f32 %v1851_v46  ;;  %v1867_v30 = vmul.f32 1.442695, %v1722_v39  ;;  %v1869_v40 = vmul.f32 1.442695, %v1723_v52 }
 0x1b8   : > { %4266 = vpow2.f32 %v1853_v15  ;;  %v1871_v12 = vmul.f32 1.442695, %v1724_v21  ;;  %v1857_v19 = vmul.f32 1.442695, %v1717_v26  ;;  %v1859_v45 = vmul.f32 1.442695, %v1718_v58  ;;  %v1574_v37 = vpop.xlane.xlu0 %1573 }
 0x1b9   : > { %4268 = vpow2.f32 %v1855_v18  ;;  %v1861_v47 = vmul.f32 1.442695, %v1719_v33  ;;  %v8287_v46 = vld [vmem:[#allocation18_spill] sm:$0xff]  ;;  %v1863_v31 = vmul.f32 1.442695, %v1720_v0  ;;  %v8291_v21 = vld [vmem:[#allocation101_spill] sm:$0xff] }
 0x1ba   : > { %v1579_v57 = vpop.xlane.xlu1 %1578  ;;  %4270 = vpow2.f32 %v1865_v20  ;;  %v8289_v38 = vld [vmem:[#allocation22_spill] sm:$0xff]  ;;  %v1725_v20 = vsub.f32 %v8291_v21, %v1574_v37  ;;  %v8295_v33 = vld [vmem:[#allocation105_spill] sm:$0xff] }
 0x1bb   : > { %v1729_v28 = vsub.f32 %v8283_v59, %v1579_v57  ;;  %v6481_v53 = vpop.eup %4246  ;;  %4272 = vpow2.f32 %v1867_v30  ;;  %v1730_v50 = vsub.f32 %v8285_v51, %v1579_v57  ;;  %v1731_v15 = vsub.f32 %v8287_v46, %v1579_v57  ;;  %v8293_v30 = vld [vmem:[#allocation102_spill] sm:$0xff] }
 0x1bc   : > { %8284 = vst [vmem:[#allocation79_spill] sm:$0xff] %v6481_v53  ;;  %v6484_v16 = vpop.eup %4248  ;;  %4274 = vpow2.f32 %v1869_v40  ;;  %v1732_v39 = vsub.f32 %v8289_v38, %v1579_v57  ;;  %v1726_v48 = vsub.f32 %v8293_v30, %v1574_v37  ;;  %v8297_v57 = vld [vmem:[#allocation106_spill] sm:$0xff] }
 0x1bd   : > { %8286 = vst [vmem:[#allocation85_spill] sm:$0xff] %v6484_v16  ;;  %v6487_v62 = vpop.eup %4250  ;;  %4276 = vpow2.f32 %v1871_v12  ;;  %v1881_v18 = vmul.f32 1.442695, %v1729_v28  ;;  %v1883_v26 = vmul.f32 1.442695, %v1730_v50  ;;  %v1727_v12 = vsub.f32 %v8295_v33, %v1574_v37 }
 0x1be   : > { %8288 = vst [vmem:[#allocation86_spill] sm:$0xff] %v6487_v62  ;;  %v6490_v52 = vpop.eup %4252  ;;  %4278 = vpow2.f32 %v1857_v19  ;;  %v1885_v3 = vmul.f32 1.442695, %v1731_v15  ;;  %v1887_v0 = vmul.f32 1.442695, %v1732_v39  ;;  %v1728_v19 = vsub.f32 %v8297_v57, %v1574_v37  ;;  %v8303_v39 = vld [vmem:[#allocation108_spill] sm:$0xff] }
 0x1bf   : > { %8290 = vst [vmem:[#allocation92_spill] sm:$0xff] %v6490_v52  ;;  %v6493_v1 = vpop.eup %4254  ;;  %4280 = vpow2.f32 %v1859_v45  ;;  %v1873_v28 = vmul.f32 1.442695, %v1725_v20  ;;  %v8299_v45 = vld [vmem:[#allocation107_spill] sm:$0xff]  ;;  %v1875_v46 = vmul.f32 1.442695, %v1726_v48  ;;  %v1584_v38 = vpop.xlane.xlu0 %1583 }
 0x1c0   : > { %8292 = vst [vmem:[#allocation93_spill] sm:$0xff] %v6493_v1  ;;  %v6496_v40 = vpop.eup %4256  ;;  %4282 = vpow2.f32 %v1861_v47  ;;  %v8301_v47 = vld [vmem:[#allocation19_spill] sm:$0xff]  ;;  %v8305_v20 = vld [vmem:[#allocation24_spill] sm:$0xff] }
 0x1c1   : > { %v1589_v58 = vpop.xlane.xlu1 %1588  ;;  %8294 = vst [vmem:[#allocation94_spill] sm:$0xff] %v6496_v40  ;;  %v6499_v43 = vpop.eup %4258  ;;  %4284 = vpow2.f32 %v1863_v31  ;;  %v1877_v31 = vmul.f32 1.442695, %v1727_v12  ;;  %v8306_v48 = vld [vmem:[#allocation15_spill] sm:$0xff] }
 0x1c2   : > { %8296 = vst [vmem:[#allocation96_spill] sm:$0xff] %v6499_v43  ;;  %v6502_v59 = vpop.eup %4260  ;;  %4286 = vpow2.f32 %v1881_v18  ;;  %v1737_v51 = vsub.f32 %v8299_v45, %v1589_v58  ;;  %v1738_v15 = vsub.f32 %v8301_v47, %v1589_v58  ;;  %v1739_v30 = vsub.f32 %v8303_v39, %v1589_v58 }
 0x1c3   : > { %8298 = vst [vmem:[#allocation97_spill] sm:$0xff] %v6502_v59  ;;  %v6505_v50 = vpop.eup %4262  ;;  %4288 = vpow2.f32 %v1883_v26  ;;  %v1879_v18 = vmul.f32 1.442695, %v1728_v19  ;;  %v1740_v33 = vsub.f32 %v8305_v20, %v1589_v58  ;;  %v1733_v45 = vsub.f32 %v8306_v48, %v1584_v38  ;;  %v8309_v19 = vld [vmem:[#allocation17_spill] sm:$0xff] }
 0x1c4   : > { %8300 = vst [vmem:[#allocation98_spill] sm:$0xff] %v6505_v50  ;;  %v6508_v21 = vpop.eup %4264  ;;  %4290 = vpow2.f32 %v1885_v3  ;;  %v1897_v26 = vmul.f32 1.442695, %v1737_v51  ;;  %v1899_v29 = vmul.f32 1.442695, %v1738_v15  ;;  %v8307_v3 = vld [vmem:[#allocation23_spill] sm:$0xff]  ;;  %v2094_v39 = vadd.f32 %v6484_v16, %v6481_v53  ;;  %v1594_v6 = vpop.xlane.xlu0 %1593 }
 0x1c5   : > { %8302 = vst [vmem:[#allocation99_spill] sm:$0xff] %v6508_v21  ;;  %v6511_v37 = vpop.eup %4266  ;;  %4292 = vpow2.f32 %v1887_v0  ;;  %v1734_v12 = vsub.f32 %v8307_v3, %v1584_v38  ;;  %v1901_v58 = vmul.f32 1.442695, %v1739_v30  ;;  %v1735_v20 = vsub.f32 %v8309_v19, %v1584_v38  ;;  %v8312_v3 = vld [vmem:[#allocation31_spill] sm:$0xff]  ;;  %v8314_v30 = vld [vmem:[#allocation32_spill] sm:$0xff] }
 0x1c6   : > { %8304 = vst [vmem:[#allocation100_spill] sm:$0xff] %v6511_v37  ;;  %v6514_v57 = vpop.eup %4268  ;;  %4294 = vpow2.f32 %v1873_v28  ;;  %v8310_v28 = vld [vmem:[#allocation25_spill] sm:$0xff]  ;;  %v1903_v48 = vmul.f32 1.442695, %v1740_v33  ;;  %v1889_v15 = vmul.f32 1.442695, %v1733_v45  ;;  %v2095_v19 = vadd.f32 %v6487_v62, %v2094_v39 }
 0x1c7   : > { %v6517_v47 = vpop.eup %4270  ;;  %4296 = vpow2.f32 %v1875_v46  ;;  %v1599_v36 = vpop.xlane.xlu1 %1598  ;;  %v1736_v51 = vsub.f32 %v8310_v28, %v1584_v38  ;;  %v8316_v28 = vld [vmem:[#allocation26_spill] sm:$0xff]  ;;  %v8318_v45 = vld [vmem:[#allocation37_spill] sm:$0xff]  ;;  %v1741_v49 = vsub.f32 %v8319_v44, %v1594_v6  ;;  %v2089_v44 = vadd.f32 %v6496_v40, %v6493_v1 }
 0x1c8   : > { %v6522_v0 = vpop.eup %4272  ;;  %4298 = vpow2.f32 %v1877_v31  ;;  %v1745_v22 = vsub.f32 %v8312_v3, %v1599_v36  ;;  %v1891_v31 = vmul.f32 1.442695, %v1734_v12  ;;  %v1746_v53 = vsub.f32 %v8314_v30, %v1599_v36  ;;  %v8322_v30 = vld [vmem:[#allocation29_spill] sm:$0xff] }
 0x1c9   : > { %8308 = vst [vmem:[#allocation103_spill] sm:$0xff] %v6522_v0  ;;  %v6526_v55 = vpop.eup %4274  ;;  %4300 = vpow2.f32 %v1879_v18  ;;  %v1893_v18 = vmul.f32 1.442695, %v1735_v20  ;;  %v1895_v33 = vmul.f32 1.442695, %v1736_v51  ;;  %v1747_v13 = vsub.f32 %v8316_v28, %v1599_v36 }
 0x1ca   : > { %8311 = vst [vmem:[#allocation104_spill] sm:$0xff] %v6526_v55  ;;  %v6528_v46 = vpop.eup %4276  ;;  %4302 = vpow2.f32 %v1897_v26  ;;  %v1748_v3 = vsub.f32 %v8318_v45, %v1599_v36  ;;  %v1913_v39 = vmul.f32 1.442695, %v1745_v22  ;;  %v1743_v62 = vsub.f32 %v8322_v30, %v1594_v6 }
 0x1cb   : > { %v6531_v16 = vpop.eup %4278  ;;  %4304 = vpow2.f32 %v1899_v29  ;;  %v8320_v29 = vld [vmem:[#allocation20_spill] sm:$0xff]  ;;  %v1915_v28 = vmul.f32 1.442695, %v1746_v53  ;;  %v1917_v45 = vmul.f32 1.442695, %v1747_v13 }
 0x1cc   : > { %8313 = vst [vmem:[#allocation18_spill] sm:$0xff] %v6531_v16  ;;  %v6535_v38 = vpop.eup %4280  ;;  %4306 = vpow2.f32 %v1901_v58  ;;  %v1742_v12 = vsub.f32 %v8320_v29, %v1594_v6  ;;  %v8323_v58 = vld [vmem:[#allocation36_spill] sm:$0xff]  ;;  %v1919_v22 = vmul.f32 1.442695, %v1748_v3  ;;  %v1905_v29 = vmul.f32 1.442695, %v1741_v49 }
 0x1cd   : > { %8315 = vst [vmem:[#allocation22_spill] sm:$0xff] %v6535_v38  ;;  %v6538_v26 = vpop.eup %4282  ;;  %4308 = vpow2.f32 %v1903_v48  ;;  %v1744_v20 = vsub.f32 %v8323_v58, %v1594_v6  ;;  %v2096_v48 = vadd.f32 %v6490_v52, %v2095_v19  ;;  %v1604_v6 = vpop.xlane.xlu0 %1603  ;;  %v1909_v30 = vmul.f32 1.442695, %v1743_v62  ;;  %v8326_v58 = vld [vmem:[#allocation39_spill] sm:$0xff] }
 0x1ce   : > { %8317 = vst [vmem:[#allocation101_spill] sm:$0xff] %v6538_v26  ;;  %v6543_v42 = vpop.eup %4284  ;;  %4310 = vpow2.f32 %v1889_v15  ;;  %v1609_v23 = vpop.xlane.xlu1 %1608  ;;  %v1907_v19 = vmul.f32 1.442695, %v1742_v12 }
 0x1cf   : > { %8321 = vst [vmem:[#allocation102_spill] sm:$0xff] %v6543_v42  ;;  %v6547_v51 = vpop.eup %4286  ;;  %4312 = vpow2.f32 %v1891_v31  ;;  %2097 = vadd.xlane.f32.xlu0 %v2096_v48  ;;  %v2090_v31 = vadd.f32 %v6499_v43, %v2089_v44  ;;  %v1753_v40 = vsub.f32 %v8326_v58, %v1609_v23  ;;  %v1911_v13 = vmul.f32 1.442695, %v1744_v20  ;;  %v8330_v48 = vld [vmem:[#allocation21_spill] sm:$0xff] }
 0x1d0   : > { %v6552_v36 = vpop.eup %4288  ;;  %4314 = vpow2.f32 %v1893_v18  ;;  %v8328_v18 = vld [vmem:[#allocation30_spill] sm:$0xff]  ;;  %v1755_v3 = vsub.f32 %v5944_v54, %v1609_v23  ;;  %v1749_v44 = vsub.f32 %v8330_v48, %v1604_v6  ;;  %v8333_v58 = vld [vmem:[#allocation109_spill] sm:$0xff] }
 0x1d1   : > { %8324 = vst [vmem:[#allocation105_spill] sm:$0xff] %v6552_v36  ;;  %v6554_v15 = vpop.eup %4290  ;;  %4316 = vpow2.f32 %v1895_v33  ;;  %v1754_v52 = vsub.f32 %v8328_v18, %v1609_v23  ;;  %v2091_v33 = vadd.f32 %v6502_v59, %v2090_v31  ;;  %v1756_v43 = vsub.f32 %v8333_v58, %v1609_v23  ;;  %v8335_v54 = vld [vmem:[#allocation33_spill] sm:$0xff] }
 0x1d2   : > { %8325 = vst [vmem:[#allocation106_spill] sm:$0xff] %v6554_v15  ;;  %v6557_v53 = vpop.eup %4292  ;;  %4318 = vpow2.f32 %v1913_v39  ;;  %v8331_v39 = vld [vmem:[#allocation27_spill] sm:$0xff]  ;;  %v2099_v31 = vadd.f32 %v6508_v21, %v6505_v50  ;;  %v1752_v59 = vsub.f32 %v8335_v54, %v1604_v6  ;;  %v8340_v54 = vld [vmem:[#allocation34_spill] sm:$0xff] }
 0x1d3   : > { %v6560_v1 = vpop.eup %4294  ;;  %4320 = vpow2.f32 %v1915_v28  ;;  %v1750_v12 = vsub.f32 %v8331_v39, %v1604_v6  ;;  %v8334_v28 = vld [vmem:[#allocation43_spill] sm:$0xff]  ;;  %2092 = vadd.xlane.f32.xlu1 %v2091_v33  ;;  %v1931_v39 = vmul.f32 1.442695, %v1754_v52  ;;  %v1619_v24 = vpop.xlane.xlu1 %1618  ;;  %v1933_v33 = vmul.f32 1.442695, %v1755_v3  ;;  %v8343_v3 = vld [vmem:[#allocation38_spill] sm:$0xff] }
 0x1d4   : > { %8327 = vst [vmem:[#allocation107_spill] sm:$0xff] %v6560_v1  ;;  %v6564_v49 = vpop.eup %4296  ;;  %4322 = vpow2.f32 %v1917_v45  ;;  %v1751_v20 = vsub.f32 %v8334_v28, %v1604_v6  ;;  %v1929_v45 = vmul.f32 1.442695, %v1753_v40  ;;  %v2100_v23 = vadd.f32 %v6511_v37, %v2099_v31  ;;  %v8341_v31 = vld [vmem:[#allocation45_spill] sm:$0xff] }
 0x1d5   : > { %8329 = vst [vmem:[#allocation19_spill] sm:$0xff] %v6564_v49  ;;  %v6569_v62 = vpop.eup %4298  ;;  %4324 = vpow2.f32 %v1919_v22  ;;  %v6580_v22 = vpop.xlane.xlu0 %1613  ;;  %v1921_v28 = vmul.f32 1.442695, %v1749_v44  ;;  %v1923_v21 = vmul.f32 1.442695, %v1750_v12  ;;  %v1761_v10 = vsub.f32 %v8340_v54, %v1619_v24 }
 0x1d6   : > { %8332 = vst [vmem:[#allocation108_spill] sm:$0xff] %v6569_v62  ;;  %v6575_v18 = vpop.eup %4300  ;;  %4326 = vpow2.f32 %v1905_v29  ;;  %v1935_v40 = vmul.f32 1.442695, %v1756_v43  ;;  %v1925_v29 = vmul.f32 1.442695, %v1751_v20  ;;  %v2101_v6 = vadd.f32 %v6514_v57, %v2100_v23  ;;  %v8346_v23 = vld [vmem:[#allocation46_spill] sm:$0xff] }
 0x1d7   : > { %v6578_v48 = vpop.eup %4302  ;;  %4328 = vpow2.f32 %v1907_v19  ;;  %v1927_v52 = vmul.f32 1.442695, %v1752_v59  ;;  %v1757_v37 = vsub.f32 %v8341_v31, %v6580_v22  ;;  %v1762_v44 = vsub.f32 %v8343_v3, %v1619_v24  ;;  %v8345_v59 = vld [vmem:[#allocation40_spill] sm:$0xff] }
 0x1d8   : > { %8336 = vst [vmem:[#allocation24_spill] sm:$0xff] %v6578_v48  ;;  %v6583_v58 = vpop.eup %4304  ;;  %4330 = vpow2.f32 %v1909_v30  ;;  %2102 = vadd.xlane.f32.xlu1 %v2101_v6  ;;  %v2109_v43 = vadd.f32 %v6522_v0, %v6517_v47  ;;  %v1763_v20 = vsub.f32 %v8345_v59, %v1619_v24  ;;  %v1758_v54 = vsub.f32 %v8346_v23, %v6580_v22  ;;  %v8348_v6 = vld [vmem:[#allocation28_spill] sm:$0xff] }
 0x1d9   : > { %8337 = vst [vmem:[#allocation15_spill] sm:$0xff] %v6583_v58  ;;  %v6585_v50 = vpop.eup %4306  ;;  %4332 = vpow2.f32 %v1911_v13  ;;  %v2104_v13 = vadd.f32 %v6535_v38, %v6531_v16  ;;  %v1759_v31 = vsub.f32 %v8348_v6, %v6580_v22 }
 0x1da   : > { %8338 = vst [vmem:[#allocation23_spill] sm:$0xff] %v6585_v50  ;;  %v6588_v19 = vpop.eup %4308  ;;  %4334 = vpow2.f32 %v1929_v45  ;;  %v1764_v45 = vsub.f32 %v6006_v4, %v1619_v24  ;;  %v2110_v3 = vadd.f32 %v6526_v55, %v2109_v43  ;;  %v1947_v4 = vmul.f32 1.442695, %v1762_v44  ;;  %v1629_v24 = vpop.xlane.xlu1 %1628 }
 0x1db   : > { %8339 = vst [vmem:[#allocation17_spill] sm:$0xff] %v6588_v19  ;;  %v6593_v30 = vpop.eup %4310  ;;  %4336 = vpow2.f32 %v1931_v39  ;;  %v2105_v38 = vadd.f32 %v6538_v26, %v2104_v13  ;;  %v1949_v6 = vmul.f32 1.442695, %v1763_v20  ;;  %v8352_v13 = vld [vmem:[#allocation50_spill] sm:$0xff]  ;;  %v1624_v44 = vpop.xlane.xlu0 %1623 }
 0x1dc   : > { %8342 = vst [vmem:[#allocation25_spill] sm:$0xff] %v6593_v30  ;;  %v6600_v12 = vpop.eup %4312  ;;  %4338 = vpow2.f32 %v1933_v33  ;;  %v1945_v33 = vmul.f32 1.442695, %v1761_v10  ;;  %v2111_v23 = vadd.f32 %v6528_v46, %v2110_v3  ;;  %v1951_v43 = vmul.f32 1.442695, %v1764_v45 }
 0x1dd   : > { %8344 = vst [vmem:[#allocation31_spill] sm:$0xff] %v6600_v12  ;;  %v6606_v39 = vpop.eup %4314  ;;  %4340 = vpow2.f32 %v1935_v40  ;;  %v2106_v40 = vadd.f32 %v6543_v42, %v2105_v38  ;;  %v1760_v26 = vsub.f32 %v8352_v13, %v6580_v22  ;;  %v1937_v10 = vmul.f32 1.442695, %v1757_v37  ;;  %v8354_v38 = vld [vmem:[#allocation54_spill] sm:$0xff]  ;;  %v8356_v37 = vld [vmem:[#allocation41_spill] sm:$0xff] }
 0x1de   : > { %8347 = vst [vmem:[#allocation32_spill] sm:$0xff] %v6606_v39  ;;  %v6612_v16 = vpop.eup %4316  ;;  %4342 = vpow2.f32 %v1921_v28  ;;  %v1939_v28 = vmul.f32 1.442695, %v1758_v54  ;;  %2112 = vadd.xlane.f32.xlu1 %v2111_v23  ;;  %v1769_v42 = vsub.f32 %v8354_v38, %v1629_v24  ;;  %v2114_v22 = vadd.f32 %v6564_v49, %v6560_v1 }
 0x1df   : > { %8349 = vst [vmem:[#allocation26_spill] sm:$0xff] %v6612_v16  ;;  %v6614_v59 = vpop.eup %4318  ;;  %4344 = vpow2.f32 %v1923_v21  ;;  %v1941_v21 = vmul.f32 1.442695, %v1759_v31  ;;  %2107 = vadd.xlane.f32.xlu0 %v2106_v40  ;;  %v1771_v45 = vsub.f32 %v6060_v41, %v1629_v24  ;;  %v1772_v54 = vsub.f32 %v6063_v63, %v1629_v24 }
 0x1e0   : > { %8350 = vst [vmem:[#allocation37_spill] sm:$0xff] %v6614_v59  ;;  %v6618_v0 = vpop.eup %4320  ;;  %4346 = vpow2.f32 %v1925_v29  ;;  %v2119_v29 = vadd.f32 %v6552_v36, %v6547_v51  ;;  %v2115_v13 = vadd.f32 %v6569_v62, %v2114_v22  ;;  %v1943_v49 = vmul.f32 1.442695, %v1760_v26  ;;  %v1639_v62 = vpop.xlane.xlu1 %1638  ;;  %v8364_v26 = vld [vmem:[#allocation35_spill] sm:$0xff] }
 0x1e1   : > { %8351 = vst [vmem:[#allocation16_spill] sm:$0xff] %v6618_v0  ;;  %v6622_v55 = vpop.eup %4322  ;;  %4348 = vpow2.f32 %v1927_v52  ;;  %v1770_v52 = vsub.f32 %v8356_v37, %v1629_v24  ;;  %v1961_v41 = vmul.f32 1.442695, %v1769_v42  ;;  %v1967_v22 = vmul.f32 1.442695, %v1772_v54 }
 0x1e2   : > { %v6624_v3 = vpop.eup %4324  ;;  %4350 = vpow2.f32 %v1945_v33  ;;  %v8358_v33 = vld [vmem:[#allocation51_spill] sm:$0xff]  ;;  %v2120_v40 = vadd.f32 %v6554_v15, %v2119_v29  ;;  %v2116_v24 = vadd.f32 %v6575_v18, %v2115_v13  ;;  %v1634_v13 = vpop.xlane.xlu0 %1633 }
 0x1e3   : > { %8353 = vst [vmem:[#allocation20_spill] sm:$0xff] %v6624_v3  ;;  %v6631_v20 = vpop.eup %4326  ;;  %4352 = vpow2.f32 %v1947_v4  ;;  %v1765_v23 = vsub.f32 %v8358_v33, %v1624_v44  ;;  %v8360_v4 = vld [vmem:[#allocation53_spill] sm:$0xff]  ;;  %v1963_v29 = vmul.f32 1.442695, %v1770_v52  ;;  %v1965_v33 = vmul.f32 1.442695, %v1771_v45 }
 0x1e4   : > { %8355 = vst [vmem:[#allocation29_spill] sm:$0xff] %v6631_v20  ;;  %v6636_v31 = vpop.eup %4328  ;;  %4354 = vpow2.f32 %v1949_v6  ;;  %v1766_v1 = vsub.f32 %v8360_v4, %v1624_v44  ;;  %v2121_v63 = vadd.f32 %v6557_v53, %v2120_v40  ;;  %v8365_v4 = vld [vmem:[#allocation44_spill] sm:$0xff]  ;;  %2117 = vadd.xlane.f32.xlu0 %v2116_v24  ;;  %v2124_v52 = vadd.f32 %v6600_v12, %v6593_v30 }
 0x1e5   : > { %8357 = vst [vmem:[#allocation36_spill] sm:$0xff] %v6636_v31  ;;  %v6641_v38 = vpop.eup %4330  ;;  %4356 = vpow2.f32 %v1951_v43  ;;  %v1767_v43 = vsub.f32 %v8364_v26, %v1624_v44  ;;  %v1768_v36 = vsub.f32 %v8365_v4, %v1624_v44  ;;  %v8368_v44 = vld [vmem:[#allocation12_spill] sm:$0xff] }
 0x1e6   : > { %8359 = vst [vmem:[#allocation39_spill] sm:$0xff] %v6641_v38  ;;  %v6644_v37 = vpop.eup %4332  ;;  %4358 = vpow2.f32 %v1937_v10  ;;  %v1953_v10 = vmul.f32 1.442695, %v1765_v23  ;;  %2122 = vadd.xlane.f32.xlu1 %v2121_v63  ;;  %v1955_v40 = vmul.f32 1.442695, %v1766_v1  ;;  %v1778_v23 = vsub.f32 %v8368_v44, %v1639_v62  ;;  %v8369_v63 = vld [vmem:[#allocation14_spill] sm:$0xff] }
 0x1e7   : > { %8361 = vst [vmem:[#allocation30_spill] sm:$0xff] %v6644_v37  ;;  %v6648_v6 = vpop.eup %4334  ;;  %4360 = vpow2.f32 %v1939_v28  ;;  %v2129_v28 = vadd.f32 %v6583_v58, %v6578_v48  ;;  %v1779_v24 = vsub.f32 %v8369_v63, %v1639_v62  ;;  %v1780_v1 = vsub.f32 %v6122_v25, %v1639_v62 }
 0x1e8   : > { %8362 = vst [vmem:[#allocation21_spill] sm:$0xff] %v6648_v6  ;;  %v6650_v15 = vpop.eup %4336  ;;  %4362 = vpow2.f32 %v1941_v21  ;;  %v8367_v21 = vld [vmem:[#allocation11_spill] sm:$0xff]  ;;  %v2125_v4 = vadd.f32 %v6606_v39, %v2124_v52  ;;  %v1957_v12 = vmul.f32 1.442695, %v1767_v43  ;;  %v1959_v44 = vmul.f32 1.442695, %v1768_v36  ;;  %v1649_v52 = vpop.xlane.xlu1 %1648 }
 0x1e9   : > { %8363 = vst [vmem:[#allocation27_spill] sm:$0xff] %v6650_v15  ;;  %v6654_v42 = vpop.eup %4338  ;;  %4364 = vpow2.f32 %v1943_v49  ;;  %v1777_v54 = vsub.f32 %v8367_v21, %v1639_v62  ;;  %v2130_v49 = vadd.f32 %v6585_v50, %v2129_v28  ;;  %v1979_v62 = vmul.f32 1.442695, %v1778_v23  ;;  %v8375_v43 = vld [vmem:[#allocation59_spill] sm:$0xff] }
 0x1ea   : > { %8366 = vst [vmem:[#allocation109_spill] sm:$0xff] %v6654_v42  ;;  %v6660_v45 = vpop.eup %4340  ;;  %4366 = vpow2.f32 %v1961_v41  ;;  %v8372_v41 = vld [vmem:[#allocation58_spill] sm:$0xff]  ;;  %v1981_v28 = vmul.f32 1.442695, %v1779_v24  ;;  %v8376_v50 = vld [vmem:[#allocation47_spill] sm:$0xff] }
 0x1eb   : > { %v6665_v26 = vpop.eup %4342  ;;  %4368 = vpow2.f32 %v1963_v29  ;;  %v1773_v30 = vsub.f32 %v8372_v41, %v1634_v13  ;;  %v2131_v63 = vadd.f32 %v6588_v19, %v2130_v49  ;;  %v2126_v29 = vadd.f32 %v6612_v16, %v2125_v4  ;;  %v8378_v49 = vld [vmem:[#allocation13_spill] sm:$0xff]  ;;  %v1644_v16 = vpop.xlane.xlu0 %1643 }
 0x1ec   : > { %8370 = vst [vmem:[#allocation43_spill] sm:$0xff] %v6665_v26  ;;  %v6670_v58 = vpop.eup %4344  ;;  %4370 = vpow2.f32 %v1965_v33  ;;  %v1977_v25 = vmul.f32 1.442695, %v1777_v54  ;;  %v1983_v33 = vmul.f32 1.442695, %v1780_v1  ;;  %v1774_v41 = vsub.f32 %v8375_v43, %v1634_v13  ;;  %v8381_v1 = vld [vmem:[#allocation52_spill] sm:$0xff] }
 0x1ed   : > { %8371 = vst [vmem:[#allocation33_spill] sm:$0xff] %v6670_v58  ;;  %v6673_v21 = vpop.eup %4346  ;;  %4372 = vpow2.f32 %v1967_v22  ;;  %v1775_v22 = vsub.f32 %v8376_v50, %v1634_v13  ;;  %2132 = vadd.xlane.f32.xlu1 %v2131_v63  ;;  %2127 = vadd.xlane.f32.xlu0 %v2126_v29  ;;  %v1776_v4 = vsub.f32 %v8378_v49, %v1634_v13 }
 0x1ee   : > { %8373 = vst [vmem:[#allocation34_spill] sm:$0xff] %v6673_v21  ;;  %v6677_v48 = vpop.eup %4348  ;;  %4374 = vpow2.f32 %v1953_v10  ;;  %v1969_v10 = vmul.f32 1.442695, %v1773_v30  ;;  %v2139_v54 = vadd.f32 %v6618_v0, %v6614_v59  ;;  %v1786_v43 = vsub.f32 %v8381_v1, %v1649_v52  ;;  %v8383_v30 = vld [vmem:[#allocation68_spill] sm:$0xff] }
 0x1ef   : > { %v6679_v39 = vpop.eup %4350  ;;  %4376 = vpow2.f32 %v1955_v40  ;;  %v8380_v40 = vld [vmem:[#allocation42_spill] sm:$0xff]  ;;  %v2134_v50 = vadd.f32 %v6636_v31, %v6631_v20  ;;  %v1788_v29 = vsub.f32 %v8383_v30, %v1649_v52  ;;  %v1973_v59 = vmul.f32 1.442695, %v1775_v22  ;;  %v8386_v31 = vld [vmem:[#allocation61_spill] sm:$0xff] }
 0x1f0   : > { %8374 = vst [vmem:[#allocation45_spill] sm:$0xff] %v6679_v39  ;;  %v6683_v36 = vpop.eup %4352  ;;  %4378 = vpow2.f32 %v1957_v12  ;;  %v1785_v24 = vsub.f32 %v8380_v40, %v1649_v52  ;;  %v8382_v12 = vld [vmem:[#allocation66_spill] sm:$0xff]  ;;  %v2140_v49 = vadd.f32 %v6622_v55, %v2139_v54  ;;  %v1781_v20 = vsub.f32 %v8386_v31, %v1644_v16 }
 0x1f1   : > { %8377 = vst [vmem:[#allocation38_spill] sm:$0xff] %v6683_v36  ;;  %v6688_v23 = vpop.eup %4354  ;;  %4380 = vpow2.f32 %v1959_v44  ;;  %v1787_v13 = vsub.f32 %v8382_v12, %v1649_v52  ;;  %v1971_v44 = vmul.f32 1.442695, %v1774_v41  ;;  %v2135_v40 = vadd.f32 %v6641_v38, %v2134_v50  ;;  %v1659_v38 = vpop.xlane.xlu1 %1658  ;;  %v8388_v31 = vld [vmem:[#allocation62_spill] sm:$0xff] }
 0x1f2   : > { %8379 = vst [vmem:[#allocation40_spill] sm:$0xff] %v6688_v23  ;;  %v6694_v63 = vpop.eup %4356  ;;  %4382 = vpow2.f32 %v1977_v25  ;;  %v2141_v25 = vadd.f32 %v6624_v3, %v2140_v49  ;;  %v1975_v52 = vmul.f32 1.442695, %v1776_v4  ;;  %v1993_v12 = vmul.f32 1.442695, %v1785_v24  ;;  %v8389_v49 = vld [vmem:[#allocation48_spill] sm:$0xff] }
 0x1f3   : > { %v6699_v0 = vpop.eup %4358  ;;  %4384 = vpow2.f32 %v1979_v62  ;;  %v2136_v54 = vadd.f32 %v6644_v37, %v2135_v40  ;;  %v1995_v62 = vmul.f32 1.442695, %v1786_v43  ;;  %v1997_v41 = vmul.f32 1.442695, %v1787_v13 }
 0x1f4   : > { %8384 = vst [vmem:[#allocation46_spill] sm:$0xff] %v6699_v0  ;;  %v6702_v1 = vpop.eup %4360  ;;  %4386 = vpow2.f32 %v1981_v28  ;;  %v1999_v50 = vmul.f32 1.442695, %v1788_v29  ;;  %2142 = vadd.xlane.f32.xlu1 %v2141_v25  ;;  %v1782_v22 = vsub.f32 %v8388_v31, %v1644_v16  ;;  %v1783_v3 = vsub.f32 %v8389_v49, %v1644_v16  ;;  %v8391_v29 = vld [vmem:[#allocation60_spill] sm:$0xff]  ;;  %v8392_v25 = vld [vmem:[#allocation73_spill] sm:$0xff]  ;;  %v8393_v49 = vld [vmem:[#allocation75_spill] sm:$0xff] }
 0x1f5   : > { %8385 = vst [vmem:[#allocation28_spill] sm:$0xff] %v6702_v1  ;;  %v6706_v19 = vpop.eup %4362  ;;  %4388 = vpow2.f32 %v1983_v33  ;;  %v8390_v33 = vld [vmem:[#allocation55_spill] sm:$0xff]  ;;  %2137 = vadd.xlane.f32.xlu0 %v2136_v54  ;;  %v1985_v40 = vmul.f32 1.442695, %v1781_v20  ;;  %v2144_v43 = vadd.f32 %v6670_v58, %v6665_v26  ;;  %v1794_v31 = vsub.f32 %v8392_v25, %v1659_v38  ;;  %v1654_v26 = vpop.xlane.xlu0 %1653 }
 0x1f6   : > { %8387 = vst [vmem:[#allocation50_spill] sm:$0xff] %v6706_v19  ;;  %v6709_v30 = vpop.eup %4364  ;;  %4390 = vpow2.f32 %v1969_v10  ;;  %v1784_v4 = vsub.f32 %v8390_v33, %v1644_v16  ;;  %v2149_v10 = vadd.f32 %v6650_v15, %v6648_v6  ;;  %v1795_v16 = vsub.f32 %v8393_v49, %v1659_v38 }
 0x1f7   : > { %v6711_v28 = vpop.eup %4366  ;;  %4392 = vpow2.f32 %v1971_v44  ;;  %v1793_v44 = vsub.f32 %v8391_v29, %v1659_v38  ;;  %v2145_v15 = vadd.f32 %v6673_v21, %v2144_v43  ;;  %v1987_v58 = vmul.f32 1.442695, %v1782_v22 }
 0x1f8   : > { %v6716_v24 = vpop.eup %4368  ;;  %4394 = vpow2.f32 %v1973_v59  ;;  %v8395_v59 = vld [vmem:[#allocation76_spill] sm:$0xff]  ;;  %v2150_v33 = vadd.f32 %v6654_v42, %v2149_v10  ;;  %v1991_v25 = vmul.f32 1.442695, %v1784_v4  ;;  %v2011_v10 = vmul.f32 1.442695, %v1794_v31  ;;  %v8400_v42 = vld [vmem:[#allocation49_spill] sm:$0xff] }
 0x1f9   : > { %v6722_v13 = vpop.eup %4370  ;;  %4396 = vpow2.f32 %v1975_v52  ;;  %v1796_v20 = vsub.f32 %v8395_v59, %v1659_v38  ;;  %v1989_v52 = vmul.f32 1.442695, %v1783_v3  ;;  %v2009_v38 = vmul.f32 1.442695, %v1793_v44  ;;  %v1669_v59 = vpop.xlane.xlu1 %1668 }
 0x1fa   : > { %v6727_v54 = vpop.eup %4372  ;;  %4398 = vpow2.f32 %v1993_v12  ;;  %v2151_v49 = vadd.f32 %v6660_v45, %v2150_v33  ;;  %v2146_v12 = vadd.f32 %v6677_v48, %v2145_v15  ;;  %v2013_v43 = vmul.f32 1.442695, %v1795_v16  ;;  %v8401_v15 = vld [vmem:[#allocation56_spill] sm:$0xff] }
 0x1fb   : > { %8394 = vst [vmem:[#allocation54_spill] sm:$0xff] %v6727_v54  ;;  %v6732_v6 = vpop.eup %4374  ;;  %4400 = vpow2.f32 %v1995_v62  ;;  %v2015_v3 = vmul.f32 1.442695, %v1796_v20  ;;  %v8399_v62 = vld [vmem:[#allocation69_spill] sm:$0xff]  ;;  %v1791_v33 = vsub.f32 %v8401_v15, %v1654_v26  ;;  %v2154_v44 = vadd.f32 %v6702_v1, %v6699_v0  ;;  %v8403_v20 = vld [vmem:[#allocation70_spill] sm:$0xff]  ;;  %v1664_v0 = vpop.xlane.xlu0 %1663 }
 0x1fc   : > { %8396 = vst [vmem:[#allocation41_spill] sm:$0xff] %v6732_v6  ;;  %v6734_v29 = vpop.eup %4376  ;;  %4402 = vpow2.f32 %v1997_v41  ;;  %v1789_v22 = vsub.f32 %v8399_v62, %v1654_v26  ;;  %v1790_v41 = vsub.f32 %v8400_v42, %v1654_v26  ;;  %2152 = vadd.xlane.f32.xlu1 %v2151_v49  ;;  %2147 = vadd.xlane.f32.xlu0 %v2146_v12  ;;  %v8404_v49 = vld [vmem:[#allocation80_spill] sm:$0xff] }
 0x1fd   : > { %8397 = vst [vmem:[#allocation51_spill] sm:$0xff] %v6734_v29  ;;  %v6738_v37 = vpop.eup %4378  ;;  %4404 = vpow2.f32 %v1999_v50  ;;  %v2159_v50 = vadd.f32 %v6683_v36, %v6679_v39  ;;  %v1801_v42 = vsub.f32 %v8403_v20, %v1669_v59  ;;  %v1802_v12 = vsub.f32 %v8404_v49, %v1669_v59 }
 0x1fe   : > { %8398 = vst [vmem:[#allocation53_spill] sm:$0xff] %v6738_v37  ;;  %v6740_v21 = vpop.eup %4380  ;;  %4406 = vpow2.f32 %v1985_v40  ;;  %v8402_v40 = vld [vmem:[#allocation63_spill] sm:$0xff]  ;;  %v2155_v36 = vadd.f32 %v6706_v19, %v2154_v44  ;;  %v2001_v1 = vmul.f32 1.442695, %v1789_v22 }
 0x1ff   : > { %v6744_v4 = vpop.eup %4382  ;;  %4408 = vpow2.f32 %v1987_v58  ;;  %v1792_v16 = vsub.f32 %v8402_v40, %v1654_v26  ;;  %v1803_v58 = vsub.f32 %v6296_v56, %v1669_v59  ;;  %v2160_v15 = vadd.f32 %v6688_v23, %v2159_v50 }
 0x200   : > { %v6751_v31 = vpop.eup %4384  ;;  %4410 = vpow2.f32 %v1989_v52  ;;  %v2003_v52 = vmul.f32 1.442695, %v1790_v41  ;;  %v1804_v40 = vsub.f32 %v6299_v32, %v1669_v59  ;;  %v2005_v50 = vmul.f32 1.442695, %v1791_v33  ;;  %v8405_v41 = vld [vmem:[#allocation57_spill] sm:$0xff] }
 0x201   : > { %v6756_v62 = vpop.eup %4386  ;;  %4412 = vpow2.f32 %v1991_v25  ;;  %v2161_v20 = vadd.f32 %v6694_v63, %v2160_v15  ;;  %v2156_v25 = vadd.f32 %v6709_v30, %v2155_v36  ;;  %v2007_v44 = vmul.f32 1.442695, %v1792_v16  ;;  %v8406_v36 = vld [vmem:[#allocation64_spill] sm:$0xff]  ;;  %v8407_v15 = vld [vmem:[#allocation67_spill] sm:$0xff] }
 0x202   : > { %v6761_v39 = vpop.eup %4388  ;;  %4414 = vpow2.f32 %v2009_v38  ;;  %v2025_v49 = vmul.f32 1.442695, %v1801_v42  ;;  %v2027_v38 = vmul.f32 1.442695, %v1802_v12  ;;  %v2029_v22 = vmul.f32 1.442695, %v1803_v58 }
 0x203   : > { %v6763_v26 = vpop.eup %4390  ;;  %4416 = vpow2.f32 %v2011_v10  ;;  %v1797_v23 = vsub.f32 %v8405_v41, %v1664_v0  ;;  %v1679_v10 = vpop.xlane.xlu1 %1678  ;;  %2162 = vadd.xlane.f32.xlu1 %v2161_v20  ;;  %2157 = vadd.xlane.f32.xlu0 %v2156_v25  ;;  %v1798_v59 = vsub.f32 %v8406_v36, %v1664_v0  ;;  %v2169_v33 = vadd.f32 %v6716_v24, %v6711_v28  ;;  %v8408_v42 = vld [vmem:[#allocation87_spill] sm:$0xff] }
 0x204   : > { %v6768_v56 = vpop.eup %4392  ;;  %4418 = vpow2.f32 %v2013_v43  ;;  %v1799_v43 = vsub.f32 %v8407_v15, %v1664_v0  ;;  %v1800_v12 = vsub.f32 %v8408_v42, %v1664_v0  ;;  %v2164_v58 = vadd.f32 %v6734_v29, %v6732_v6 }
 0x205   : > { %v6770_v19 = vpop.eup %4394  ;;  %4420 = vpow2.f32 %v2015_v3  ;;  %v2031_v3 = vmul.f32 1.442695, %v1804_v40  ;;  %v1810_v25 = vsub.f32 %v6343_v34, %v1679_v10  ;;  %v2170_v41 = vadd.f32 %v6722_v13, %v2169_v33  ;;  %v1674_v40 = vpop.xlane.xlu0 %1673 }
 0x206   : > { %v6773_v32 = vpop.eup %4396  ;;  %4422 = vpow2.f32 %v2001_v1  ;;  %v1809_v1 = vsub.f32 %v6334_v14, %v1679_v10  ;;  %v2017_v15 = vmul.f32 1.442695, %v1797_v23  ;;  %v2165_v0 = vadd.f32 %v6738_v37, %v2164_v58 }
 0x207   : > { %v6779_v16 = vpop.eup %4398  ;;  %4424 = vpow2.f32 %v2003_v52  ;;  %v1811_v52 = vsub.f32 %v6346_v8, %v1679_v10  ;;  %v2019_v29 = vmul.f32 1.442695, %v1798_v59  ;;  %v2171_v14 = vadd.f32 %v6727_v54, %v2170_v41  ;;  %v8409_v41 = vld [vmem:[#allocation88_spill] sm:$0xff] }
 0x208   : > { %v6784_v20 = vpop.eup %4400  ;;  %4426 = vpow2.f32 %v2005_v50  ;;  %v2021_v50 = vmul.f32 1.442695, %v1799_v43  ;;  %v2023_v34 = vmul.f32 1.442695, %v1800_v12  ;;  %v1812_v33 = vsub.f32 %v6366_v27, %v1679_v10  ;;  %v8410_v12 = vld [vmem:[#allocation89_spill] sm:$0xff] }
 0x209   : > { %v6789_v36 = vpop.eup %4402  ;;  %4428 = vpow2.f32 %v2007_v44  ;;  %v2166_v23 = vadd.f32 %v6740_v21, %v2165_v0  ;;  %v2041_v8 = vmul.f32 1.442695, %v1809_v1  ;;  %v2043_v58 = vmul.f32 1.442695, %v1810_v25  ;;  %2172 = vadd.xlane.f32.xlu1 %v2171_v14 }
 0x20a   : > { %v6793_v42 = vpop.eup %4404  ;;  %4430 = vpow2.f32 %v2025_v49  ;;  %v1805_v37 = vsub.f32 %v6316_v35, %v1674_v40  ;;  %v1689_v49 = vpop.xlane.xlu1 %1688  ;;  %v2045_v43 = vmul.f32 1.442695, %v1811_v52  ;;  %v1807_v54 = vsub.f32 %v8410_v12, %v1674_v40 }
 0x20b   : > { %v6796_v6 = vpop.eup %4406  ;;  %4432 = vpow2.f32 %v2027_v38  ;;  %v1806_v38 = vsub.f32 %v8409_v41, %v1674_v40  ;;  %2167 = vadd.xlane.f32.xlu0 %v2166_v23  ;;  %v2179_v10 = vadd.f32 %v6751_v31, %v6744_v4  ;;  %v2174_v35 = vadd.f32 %v6768_v56, %v6763_v26 }
 0x20c   : > { %v6800_v44 = vpop.eup %4408  ;;  %4434 = vpow2.f32 %v2029_v22  ;;  %v1808_v22 = vsub.f32 %v6338_v61, %v1674_v40  ;;  %v1817_v25 = vsub.f32 %v6374_v9, %v1689_v49  ;;  %v1818_v52 = vsub.f32 %v6381_v17, %v1689_v49  ;;  %v1684_v17 = vpop.xlane.xlu0 %1683 }
 0x20d   : > { %v6803_v59 = vpop.eup %4410  ;;  %4436 = vpow2.f32 %v2031_v3  ;;  %v2047_v3 = vmul.f32 1.442695, %v1812_v33  ;;  %v2180_v61 = vadd.f32 %v6756_v62, %v2179_v10  ;;  %v2175_v40 = vadd.f32 %v6770_v19, %v2174_v35 }
 0x20e   : > { %v6807_v27 = vpop.eup %4412  ;;  %4438 = vpow2.f32 %v2017_v15  ;;  %v2033_v15 = vmul.f32 1.442695, %v1805_v37  ;;  %v2035_v23 = vmul.f32 1.442695, %v1806_v38  ;;  %v2037_v41 = vmul.f32 1.442695, %v1807_v54 }
 0x20f   : > { %v6814_v1 = vpop.eup %4414  ;;  %4440 = vpow2.f32 %v2019_v29  ;;  %v1819_v29 = vsub.f32 %v6387_v2, %v1689_v49  ;;  %v2039_v9 = vmul.f32 1.442695, %v1808_v22  ;;  %v2181_v12 = vadd.f32 %v6761_v39, %v2180_v61 }
 0x210   : > { %v6818_v0 = vpop.eup %4416  ;;  %4442 = vpow2.f32 %v2021_v50  ;;  %v2176_v37 = vadd.f32 %v6773_v32, %v2175_v40  ;;  %v1820_v10 = vsub.f32 %v6406_v11, %v1689_v49  ;;  %v2057_v35 = vmul.f32 1.442695, %v1817_v25 }
 0x211   : > { %v6822_v14 = vpop.eup %4418  ;;  %4444 = vpow2.f32 %v2023_v34  ;;  %v2059_v34 = vmul.f32 1.442695, %v1818_v52  ;;  %2182 = vadd.xlane.f32.xlu1 %v2181_v12  ;;  %v2189_v2 = vadd.f32 %v6784_v20, %v6779_v16  ;;  %v2184_v54 = vadd.f32 %v6800_v44, %v6796_v6 }
 0x212   : > { %v6825_v33 = vpop.eup %4420  ;;  %4446 = vpow2.f32 %v2041_v8  ;;  %2177 = vadd.xlane.f32.xlu0 %v2176_v37  ;;  %v2199_v8 = vadd.f32 %v6818_v0, %v6814_v1  ;;  %v2061_v11 = vmul.f32 1.442695, %v1819_v29  ;;  %v2063_v12 = vmul.f32 1.442695, %v1820_v10  ;;  %v1699_v29 = vpop.xlane.xlu1 %1698 }
 0x213   : > { %8411 = vst [vmem:[#allocation35_spill] sm:$0xff] %v6825_v33  ;;  %v6829_v50 = vpop.eup %4422  ;;  %4448 = vpow2.f32 %v2043_v58  ;;  %v1813_v58 = vsub.f32 %v6354_v5, %v1684_v17  ;;  %v2190_v25 = vadd.f32 %v6789_v36, %v2189_v2  ;;  %v2185_v52 = vadd.f32 %v6803_v59, %v2184_v54 }
 0x214   : > { %8412 = vst [vmem:[#allocation44_spill] sm:$0xff] %v6829_v50  ;;  %v6832_v38 = vpop.eup %4424  ;;  %4450 = vpow2.f32 %v2045_v43  ;;  %v2200_v61 = vadd.f32 %v6822_v14, %v2199_v8  ;;  %v1694_v8 = vpop.xlane.xlu0 %1693 }
 0x215   : > { %8413 = vst [vmem:[#allocation11_spill] sm:$0xff] %v6832_v38  ;;  %v6840_v22 = vpop.eup %4426  ;;  %4452 = vpow2.f32 %v2047_v3  ;;  %v2194_v49 = vadd.f32 %v6832_v38, %v6829_v50  ;;  %v1814_v3 = vsub.f32 %v6361_v7, %v1684_v17  ;;  %v8418_v38 = vld [vmem:[#allocation65_spill] sm:$0xff]  ;;  %v2191_v2 = vadd.f32 %v6793_v42, %v2190_v25 }
 0x216   : > { %8414 = vst [vmem:[#allocation12_spill] sm:$0xff] %v6840_v22  ;;  %v6845_v43 = vpop.eup %4428  ;;  %4454 = vpow2.f32 %v2033_v15  ;;  %v1815_v15 = vsub.f32 %v8418_v38, %v1684_v17  ;;  %v2186_v54 = vadd.f32 %v6807_v27, %v2185_v52  ;;  %v2049_v10 = vmul.f32 1.442695, %v1813_v58 }
 0x217   : > { %8415 = vst [vmem:[#allocation14_spill] sm:$0xff] %v6845_v43  ;;  %v6850_v40 = vpop.eup %4430  ;;  %4456 = vpow2.f32 %v2035_v23  ;;  %v2195_v5 = vadd.f32 %v6840_v22, %v2194_v49  ;;  %v1816_v23 = vsub.f32 %v6384_v60, %v1684_v17  ;;  %2192 = vadd.xlane.f32.xlu1 %v2191_v2  ;;  %v2201_v38 = vadd.f32 %v6825_v33, %v2200_v61 }
 0x218   : > { %8416 = vst [vmem:[#allocation58_spill] sm:$0xff] %v6850_v40  ;;  %v6854_v37 = vpop.eup %4432  ;;  %4458 = vpow2.f32 %v2037_v41  ;;  %v8421_v41 = vld [vmem:[#allocation77_spill] sm:$0xff]  ;;  %2187 = vadd.xlane.f32.xlu0 %v2186_v54  ;;  %v2051_v60 = vmul.f32 1.442695, %v1814_v3  ;;  %v8427_v54 = vld [vmem:[#allocation91_spill] sm:$0xff] }
 0x219   : > { %8417 = vst [vmem:[#allocation59_spill] sm:$0xff] %v6854_v37  ;;  %v6859_v50 = vpop.eup %4434  ;;  %4460 = vpow2.f32 %v2039_v9  ;;  %v2209_v7 = vadd.f32 %v6854_v37, %v6850_v40  ;;  %v1825_v22 = vsub.f32 %v8421_v41, %v1699_v29  ;;  %v2196_v25 = vadd.f32 %v6845_v43, %v2195_v5  ;;  %v8423_v9 = vld [vmem:[#allocation95_spill] sm:$0xff]  ;;  %v8425_v40 = vld [vmem:[#allocation78_spill] sm:$0xff] }
 0x21a   : > { %8419 = vst [vmem:[#allocation47_spill] sm:$0xff] %v6859_v50  ;;  %v6864_v49 = vpop.eup %4436  ;;  %4462 = vpow2.f32 %v2057_v35  ;;  %v1826_v17 = vsub.f32 %v8423_v9, %v1699_v29  ;;  %v2053_v35 = vmul.f32 1.442695, %v1815_v15  ;;  %v1827_v41 = vsub.f32 %v8425_v40, %v1699_v29  ;;  %v8431_v15 = vld [vmem:[#allocation82_spill] sm:$0xff] }
 0x21b   : > { %8420 = vst [vmem:[#allocation13_spill] sm:$0xff] %v6864_v49  ;;  %v6869_v52 = vpop.eup %4438  ;;  %4464 = vpow2.f32 %v2059_v34  ;;  %v2210_v58 = vadd.f32 %v6859_v50, %v2209_v7  ;;  %v2055_v61 = vmul.f32 1.442695, %v1816_v23  ;;  %v1828_v5 = vsub.f32 %v8427_v54, %v1699_v29  ;;  %v8429_v7 = vld [vmem:[#allocation71_spill] sm:$0xff]  ;;  %2202 = vadd.xlane.f32.xlu1 %v2201_v38  ;;  %v1704_v29 = vpop.xlane.xlu0 %1703 }
 0x21c   : > { %8422 = vst [vmem:[#allocation42_spill] sm:$0xff] %v6869_v52  ;;  %v6873_v37 = vpop.eup %4440  ;;  %4466 = vpow2.f32 %v2061_v11  ;;  %v2073_v9 = vmul.f32 1.442695, %v1825_v22  ;;  %v1821_v50 = vsub.f32 %v8429_v7, %v1694_v8  ;;  %2197 = vadd.xlane.f32.xlu0 %v2196_v25  ;;  %v1822_v23 = vsub.f32 %v8431_v15, %v1694_v8  ;;  %v8433_v22 = vld [vmem:[#allocation74_spill] sm:$0xff]  ;;  %v8434_v7 = vld [vmem:[#allocation83_spill] sm:$0xff] }
 0x21d   : > { %8424 = vst [vmem:[#allocation52_spill] sm:$0xff] %v6873_v37  ;;  %v6876_v2 = vpop.eup %4442  ;;  %4468 = vpow2.f32 %v2063_v12  ;;  %v2204_v34 = vadd.f32 %v6873_v37, %v6869_v52  ;;  %v2211_v11 = vadd.f32 %v6864_v49, %v2210_v58  ;;  %v2075_v12 = vmul.f32 1.442695, %v1826_v17  ;;  %v8478_v49 = vld [vmem:[#allocation97_spill] sm:$0xff] }
 0x21e   : > { %8426 = vst [vmem:[#allocation66_spill] sm:$0xff] %v6876_v2  ;;  %v6881_v3 = vpop.eup %4444  ;;  %4470 = vpow2.f32 %v2049_v10  ;;  %v2077_v10 = vmul.f32 1.442695, %v1827_v41  ;;  %v1823_v52 = vsub.f32 %v8433_v22, %v1694_v8  ;;  %v1824_v38 = vsub.f32 %v8434_v7, %v1694_v8  ;;  %v8439_v22 = vld [vmem:[#allocation72_spill] sm:$0xff] }
 0x21f   : > { %8428 = vst [vmem:[#allocation68_spill] sm:$0xff] %v6881_v3  ;;  %v6885_v40 = vpop.eup %4446  ;;  %4472 = vpow2.f32 %v2051_v60  ;;  %v2205_v54 = vadd.f32 %v6876_v2, %v2204_v34  ;;  %v2079_v58 = vmul.f32 1.442695, %v1828_v5  ;;  %v2065_v34 = vmul.f32 1.442695, %v1821_v50  ;;  %v8437_v2 = vld [vmem:[#allocation90_spill] sm:$0xff]  ;;  %2212 = vadd.xlane.f32.xlu1 %v2211_v11 }
 0x220   : > { %8430 = vst [vmem:[#allocation61_spill] sm:$0xff] %v6885_v40  ;;  %v6889_v37 = vpop.eup %4448  ;;  %4474 = vpow2.f32 %v2053_v35  ;;  %v1829_v35 = vsub.f32 %v8437_v2, %v1704_v29  ;;  %v2067_v8 = vmul.f32 1.442695, %v1822_v23  ;;  %v1830_v7 = vsub.f32 %v8439_v22, %v1704_v29  ;;  %v8442_v50 = vld [vmem:[#allocation81_spill] sm:$0xff] }
 0x221   : > { %8432 = vst [vmem:[#allocation62_spill] sm:$0xff] %v6889_v37  ;;  %v6893_v25 = vpop.eup %4450  ;;  %4476 = vpow2.f32 %v2055_v61  ;;  %v2206_v60 = vadd.f32 %v6881_v3, %v2205_v54  ;;  %v2219_v17 = vadd.f32 %v6889_v37, %v6885_v40  ;;  %v2069_v54 = vmul.f32 1.442695, %v1823_v52 }
 0x222   : > { %8435 = vst [vmem:[#allocation48_spill] sm:$0xff] %v6893_v25  ;;  %v6898_v15 = vpop.eup %4452  ;;  %4478 = vpow2.f32 %v2073_v9  ;;  %v2071_v37 = vmul.f32 1.442695, %v1824_v38  ;;  %v1831_v2 = vsub.f32 %v8442_v50, %v1704_v29  ;;  %v2081_v23 = vmul.f32 1.442695, %v1829_v35 }
 0x223   : > { %8436 = vst [vmem:[#allocation55_spill] sm:$0xff] %v6898_v15  ;;  %v6901_v41 = vpop.eup %4454  ;;  %4480 = vpow2.f32 %v2075_v12  ;;  %2207 = vadd.xlane.f32.xlu0 %v2206_v60  ;;  %v2220_v61 = vadd.f32 %v6893_v25, %v2219_v17  ;;  %v2083_v38 = vmul.f32 1.442695, %v1830_v7  ;;  %v8477_v25 = vld [vmem:[#allocation96_spill] sm:$0xff] }
 0x224   : > { %8438 = vst [vmem:[#allocation60_spill] sm:$0xff] %v6901_v41  ;;  %v6905_v5 = vpop.eup %4456  ;;  %4482 = vpow2.f32 %v2077_v10  ;;  %v8445_v10 = vld [vmem:[#allocation84_spill] sm:$0xff] }
 0x225   : > { %8440 = vst [vmem:[#allocation73_spill] sm:$0xff] %v6905_v5  ;;  %v6907_v40 = vpop.eup %4458  ;;  %4484 = vpow2.f32 %v2079_v58  ;;  %v2221_v9 = vadd.f32 %v6898_v15, %v2220_v61  ;;  %v2214_v11 = vadd.f32 %v6905_v5, %v6901_v41  ;;  %v1832_v52 = vsub.f32 %v8445_v10, %v1704_v29  ;;  %v8476_v41 = vld [vmem:[#allocation94_spill] sm:$0xff] }
 0x226   : > { %8441 = vst [vmem:[#allocation75_spill] sm:$0xff] %v6907_v40  ;;  %v6913_v12 = vpop.eup %4460  ;;  %4486 = vpow2.f32 %v2065_v34  ;;  %v2085_v61 = vmul.f32 1.442695, %v1831_v2 }
 0x227   : > { %8443 = vst [vmem:[#allocation76_spill] sm:$0xff] %v6913_v12  ;;  %v6915_v60 = vpop.eup %4462  ;;  %4488 = vpow2.f32 %v2067_v8  ;;  %2222 = vadd.xlane.f32.xlu1 %v2221_v9  ;;  %v2215_v58 = vadd.f32 %v6907_v40, %v2214_v11  ;;  %v2087_v8 = vmul.f32 1.442695, %v1832_v52 }
 0x228   : > { %8444 = vst [vmem:[#allocation69_spill] sm:$0xff] %v6915_v60  ;;  %v6919_v17 = vpop.eup %4464  ;;  %4490 = vpow2.f32 %v2069_v54 }
 0x229   : > { %8446 = vst [vmem:[#allocation49_spill] sm:$0xff] %v6919_v17  ;;  %v6921_v22 = vpop.eup %4466  ;;  %4492 = vpow2.f32 %v2071_v37  ;;  %v2216_v50 = vadd.f32 %v6913_v12, %v2215_v58  ;;  %v2229_v34 = vadd.f32 %v6919_v17, %v6915_v60 }
 0x22a   : > { %8447 = vst [vmem:[#allocation56_spill] sm:$0xff] %v6921_v22  ;;  %v6926_v35 = vpop.eup %4468  ;;  %4494 = vpow2.f32 %v2081_v23 }
 0x22b   : > { %8448 = vst [vmem:[#allocation63_spill] sm:$0xff] %v6926_v35  ;;  %v6928_v29 = vpop.eup %4470  ;;  %4496 = vpow2.f32 %v2083_v38  ;;  %2217 = vadd.xlane.f32.xlu0 %v2216_v50  ;;  %v2230_v7 = vadd.f32 %v6921_v22, %v2229_v34  ;;  %v8473_v22 = vld [vmem:[#allocation9_spill] sm:$0xff] }
 0x22c   : > { %8449 = vst [vmem:[#allocation70_spill] sm:$0xff] %v6928_v29  ;;  %v6931_v54 = vpop.eup %4472  ;;  %4498 = vpow2.f32 %v2085_v61 }
 0x22d   : > { %8450 = vst [vmem:[#allocation80_spill] sm:$0xff] %v6931_v54  ;;  %v6933_v9 = vpop.eup %4474  ;;  %v2231_v37 = vadd.f32 %v6926_v35, %v2230_v7  ;;  %v2224_v2 = vadd.f32 %v6931_v54, %v6928_v29  ;;  %4500 = vpow2.f32 %v2087_v8 }
 0x22e   : > { %8451 = vst [vmem:[#allocation57_spill] sm:$0xff] %v6933_v9  ;;  %v6938_v11 = vpop.eup %4476 }
 0x22f   : > { %8452 = vst [vmem:[#allocation64_spill] sm:$0xff] %v6938_v11  ;;  %v6940_v23 = vpop.eup %4478  ;;  %2232 = vadd.xlane.f32.xlu1 %v2231_v37  ;;  %v2225_v10 = vadd.f32 %v6933_v9, %v2224_v2 }
 0x230   : > { %8453 = vst [vmem:[#allocation67_spill] sm:$0xff] %v6940_v23  ;;  %v6943_v52 = vpop.eup %4480 }
 0x231   : > { %8454 = vst [vmem:[#allocation87_spill] sm:$0xff] %v6943_v52  ;;  %v6945_v38 = vpop.eup %4482  ;;  %v2226_v58 = vadd.f32 %v6938_v11, %v2225_v10  ;;  %v2239_v61 = vadd.f32 %v6943_v52, %v6940_v23  ;;  %v8470_v23 = vld [vmem:[#allocation92_spill] sm:$0xff] }
 0x232   : > { %8455 = vst [vmem:[#allocation88_spill] sm:$0xff] %v6945_v38  ;;  %v6950_v50 = vpop.eup %4484 }
 0x233   : > { %8456 = vst [vmem:[#allocation89_spill] sm:$0xff] %v6950_v50  ;;  %v6952_v34 = vpop.eup %4486  ;;  %2227 = vadd.xlane.f32.xlu0 %v2226_v58  ;;  %v2240_v7 = vadd.f32 %v6945_v38, %v2239_v61 }
 0x234   : > { %8457 = vst [vmem:[#allocation65_spill] sm:$0xff] %v6952_v34  ;;  %v6955_v8 = vpop.eup %4488 }
 0x235   : > { %8458 = vst [vmem:[#allocation77_spill] sm:$0xff] %v6955_v8  ;;  %v6957_v37 = vpop.eup %4490  ;;  %v2241_v2 = vadd.f32 %v6950_v50, %v2240_v7  ;;  %v2234_v9 = vadd.f32 %v6955_v8, %v6952_v34 }
 0x236   : > { %8459 = vst [vmem:[#allocation95_spill] sm:$0xff] %v6957_v37  ;;  %v6962_v10 = vpop.eup %4492 }
 0x237   : > { %8460 = vst [vmem:[#allocation78_spill] sm:$0xff] %v6962_v10  ;;  %v6964_v11 = vpop.eup %4494  ;;  %2242 = vadd.xlane.f32.xlu1 %v2241_v2  ;;  %v2235_v52 = vadd.f32 %v6957_v37, %v2234_v9 }
 0x238   : > { %8461 = vst [vmem:[#allocation91_spill] sm:$0xff] %v6964_v11  ;;  %v6967_v58 = vpop.eup %4496 }
 0x239   : > { %8462 = vst [vmem:[#allocation71_spill] sm:$0xff] %v6967_v58  ;;  %v2236_v61 = vadd.f32 %v6962_v10, %v2235_v52  ;;  %v2244_v38 = vadd.f32 %v6967_v58, %v6964_v11  ;;  %v6972_v7 = vpop.eup %4498  ;;  %v8468_v58 = vld [vmem:[#allocation85_spill] sm:$0xff]  ;;  %v8469_v10 = vld [vmem:[#allocation86_spill] sm:$0xff] }
 0x23a   : > { %8463 = vst [vmem:[#allocation82_spill] sm:$0xff] %v6972_v7  ;;  %v6975_v34 = vpop.eup %4500 }
 0x23b   : > { %2237 = vadd.xlane.f32.xlu0 %v2236_v61  ;;  %v2245_v8 = vadd.f32 %v6972_v7, %v2244_v38  ;;  %8464 = vst [vmem:[#allocation74_spill] sm:$0xff] %v6975_v34  ;;  %v776_v61 = vld [vmem:[%s6983_s15] sm:$0xf] }
 0x23c   : > { %v8465_v38 = vld [vmem:[#allocation7_spill] sm:$0xff]  ;;  %v7002_v17 = vrot.slane %v776_v61, %v8473_v22 }
 0x23d   : > { %v2246_v50 = vadd.f32 %v6975_v34, %v2245_v8  ;;  %v6988_v8 = vrot.slane %v776_v61, %v8465_v38  ;;  %v8467_v34 = vld [vmem:[#allocation79_spill] sm:$0xff] }
 0x23f   : > { %2247 = vadd.xlane.f32.xlu0 %v2246_v50  ;;  %v8466_v50 = vld [vmem:[#allocation8_spill] sm:$0xff] }
 0x258   : > { %v2098_v2 = vpop.xlane.xlu0 %2097 }
 0x259   : > { %4502 = vrcp.f32 %v2098_v2  ;;  %v6991_v2 = vrot.slane %v776_v61, %v8466_v50 }
 0x25c   : > { %v2093_v9 = vpop.xlane.xlu1 %2092 }
 0x25d   : > { %4504 = vrcp.f32 %v2093_v9 }
 0x261   : > { %v2103_v52 = vpop.xlane.xlu1 %2102 }
 0x262   : > { %4506 = vrcp.f32 %v2103_v52 }
 0x266   : > { %v4503_v9 = vpop.eup %4502 }
 0x267   : > { %v2285_v7 = vmul.f32 %v4503_v9, %v8467_v34  ;;  %v2286_v11 = vmul.f32 %v4503_v9, %v8468_v58  ;;  %v2287_v37 = vmul.f32 %v4503_v9, %v8469_v10  ;;  %v2288_v54 = vmul.f32 %v4503_v9, %v8470_v23  ;;  %v2113_v29 = vpop.xlane.xlu1 %2112  ;;  %v8474_v10 = vld [vmem:[#allocation10_spill] sm:$0xff]  ;;  %v8475_v9 = vld [vmem:[#allocation93_spill] sm:$0xff] }
 0x268   : > { %v2108_v52 = vpop.xlane.xlu0 %2107  ;;  %4508 = vrcp.f32 %v2113_v29  ;;  %v7007_v40 = vrot.slane %v776_v61, %v8474_v10 }
 0x269   : > { %v3990_v60 = vpack.c.bf16 %v2288_v54, %v2287_v37  ;;  %v2906_v12 = vmul.f32 %v6988_v8, %v2285_v7  ;;  %v2907_v34 = vmul.f32 %v6991_v2, %v2286_v11  ;;  %4510 = vrcp.f32 %v2108_v52 }
 0x26a   : > { %v4505_v58 = vpop.eup %4504  ;;  %v3989_v23 = vpack.c.bf16 %v2286_v11, %v2285_v7  ;;  %v2908_v29 = vmul.f32 %v7002_v17, %v2287_v37 }
 0x26b   : > { %v2281_v5 = vmul.f32 %v4505_v58, %v8475_v9  ;;  %v2282_v15 = vmul.f32 %v4505_v58, %v8476_v41  ;;  %v2283_v3 = vmul.f32 %v4505_v58, %v8477_v25  ;;  %v2284_v43 = vmul.f32 %v4505_v58, %v8478_v49  ;;  %2799 = vst.msk [vmem:[%s7013_s16 + $0x18] sm:$0xff] %vm6997_vm2, %v3990_v60 }
 0x26c   : > { %v3035_v11 = vadd.f32 %v2907_v34, %v2906_v12  ;;  %2798 = vst [vmem:[%s7013_s16 + $0x10] sm:$0xff] %v3989_v23  ;;  %v2909_v49 = vmul.f32 %v7007_v40, %v2288_v54 }
 0x26d   : > { %v3987_v7 = vpack.c.bf16 %v2282_v15, %v2281_v5  ;;  %v3988_v61 = vpack.c.bf16 %v2284_v43, %v2283_v3  ;;  %v2902_v41 = vmul.f32 %v6988_v8, %v2281_v5  ;;  %v2903_v25 = vmul.f32 %v6991_v2, %v2282_v15  ;;  %v2118_v9 = vpop.xlane.xlu0 %2117  ;;  %v8479_v5 = vld [vmem:[#allocation98_spill] sm:$0xff] }
 0x26e   : > { %v3036_v52 = vadd.f32 %v3035_v11, %v2908_v29  ;;  %v2904_v60 = vmul.f32 %v7002_v17, %v2283_v3  ;;  %v2905_v34 = vmul.f32 %v7007_v40, %v2284_v43  ;;  %v8480_v29 = vld [vmem:[#allocation99_spill] sm:$0xff] }
 0x26f   : > { %v2123_v58 = vpop.xlane.xlu1 %2122  ;;  %2793 = vst [vmem:[%s7013_s16] sm:$0xff] %v3987_v7  ;;  %2797 = vst.msk [vmem:[%s7013_s16 + $0x8] sm:$0xff] %vm6997_vm2, %v3988_v61  ;;  %v3030_v37 = vadd.f32 %v2903_v25, %v2902_v41  ;;  %v4507_v12 = vpop.eup %4506  ;;  %v8481_v7 = vld [vmem:[#allocation100_spill] sm:$0xff] }
 0x270   : > { %4512 = vrcp.f32 %v2123_v58  ;;  %v3037_v23 = vadd.f32 %v3036_v52, %v2909_v49  ;;  %v2289_v54 = vmul.f32 %v4507_v12, %v8479_v5  ;;  %v2290_v11 = vmul.f32 %v4507_v12, %v8480_v29 }
 0x271   : > { %4514 = vrcp.f32 %v2118_v9  ;;  %v3031_v15 = vadd.f32 %v3030_v37, %v2904_v60  ;;  %v2291_v33 = vmul.f32 %v4507_v12, %v8481_v7  ;;  %v2292_v61 = vmul.f32 %v4507_v12, %v6514_v57 }
 0x272   : > { %3038 = vadd.xlane.f32.xlu0 %v3037_v23  ;;  %v2910_v41 = vmul.f32 %v6988_v8, %v2289_v54  ;;  %v2911_v25 = vmul.f32 %v6991_v2, %v2290_v11  ;;  %v3991_v43 = vpack.c.bf16 %v2290_v11, %v2289_v54  ;;  %v8484_v11 = vld [vmem:[#allocation18_spill] sm:$0xff] }
 0x273   : > { %v3032_v3 = vadd.f32 %v3031_v15, %v2905_v34  ;;  %v3992_v49 = vpack.c.bf16 %v2292_v61, %v2291_v33  ;;  %v2912_v52 = vmul.f32 %v7002_v17, %v2291_v33  ;;  %v2913_v57 = vmul.f32 %v7007_v40, %v2292_v61  ;;  %v8482_v15 = vld [vmem:[#allocation103_spill] sm:$0xff]  ;;  %v8483_v33 = vld [vmem:[#allocation104_spill] sm:$0xff] }
 0x274   : > { %v3040_v58 = vadd.f32 %v2911_v25, %v2910_v41  ;;  %2800 = vst [vmem:[%s7013_s16 + $0x20] sm:$0xff] %v3991_v43 }
 0x275   : > { %3033 = vadd.xlane.f32.xlu1 %v3032_v3  ;;  %v4509_v9 = vpop.eup %4508  ;;  %2801 = vst.msk [vmem:[%s7013_s16 + $0x28] sm:$0xff] %vm6997_vm2, %v3992_v49 }
 0x276   : > { %v2133_v60 = vpop.xlane.xlu1 %2132  ;;  %v2128_v37 = vpop.xlane.xlu0 %2127  ;;  %v3041_v34 = vadd.f32 %v3040_v58, %v2912_v52  ;;  %v2297_v23 = vmul.f32 %v4509_v9, %v6517_v47  ;;  %v2298_v5 = vmul.f32 %v4509_v9, %v8482_v15  ;;  %v2299_v54 = vmul.f32 %v4509_v9, %v8483_v33  ;;  %v8485_v47 = vld [vmem:[#allocation22_spill] sm:$0xff] }
 0x277   : > { %v4511_v12 = vpop.eup %4510  ;;  %4516 = vrcp.f32 %v2133_v60  ;;  %v2300_v29 = vmul.f32 %v4509_v9, %v6528_v46  ;;  %v8486_v60 = vld [vmem:[#allocation101_spill] sm:$0xff]  ;;  %v8487_v15 = vld [vmem:[#allocation102_spill] sm:$0xff] }
 0x278   : > { %4518 = vrcp.f32 %v2128_v37  ;;  %v2293_v7 = vmul.f32 %v4511_v12, %v8484_v11  ;;  %v3042_v3 = vadd.f32 %v3041_v34, %v2913_v57  ;;  %v2918_v41 = vmul.f32 %v6988_v8, %v2297_v23 }
 0x279   : > { %v2919_v61 = vmul.f32 %v6991_v2, %v2298_v5  ;;  %v3995_v25 = vpack.c.bf16 %v2298_v5, %v2297_v23  ;;  %v3996_v43 = vpack.c.bf16 %v2300_v29, %v2299_v54  ;;  %v2920_v49 = vmul.f32 %v7002_v17, %v2299_v54 }
 0x27a   : > { %v2294_v52 = vmul.f32 %v4511_v12, %v8485_v47  ;;  %3043 = vadd.xlane.f32.xlu1 %v3042_v3  ;;  %v2295_v37 = vmul.f32 %v4511_v12, %v8486_v60  ;;  %v2296_v46 = vmul.f32 %v4511_v12, %v8487_v15  ;;  %v2914_v9 = vmul.f32 %v6988_v8, %v2293_v7 }
 0x27b   : > { %v3050_v58 = vadd.f32 %v2919_v61, %v2918_v41  ;;  %2804 = vst [vmem:[%s7013_s16 + $0x40] sm:$0xff] %v3995_v25  ;;  %2805 = vst.msk [vmem:[%s7013_s16 + $0x48] sm:$0xff] %vm6997_vm2, %v3996_v43  ;;  %v2921_v57 = vmul.f32 %v7007_v40, %v2300_v29  ;;  %v8488_v29 = vld [vmem:[#allocation105_spill] sm:$0xff] }
 0x27c   : > { %v2915_v34 = vmul.f32 %v6991_v2, %v2294_v52  ;;  %v3993_v23 = vpack.c.bf16 %v2294_v52, %v2293_v7  ;;  %v3994_v11 = vpack.c.bf16 %v2296_v46, %v2295_v37  ;;  %v2916_v3 = vmul.f32 %v7002_v17, %v2295_v37 }
 0x27d   : > { %v4513_v5 = vpop.eup %4512  ;;  %v2143_v33 = vpop.xlane.xlu1 %2142  ;;  %v3051_v54 = vadd.f32 %v3050_v58, %v2920_v49  ;;  %v2917_v12 = vmul.f32 %v7007_v40, %v2296_v46  ;;  %v8489_v49 = vld [vmem:[#allocation106_spill] sm:$0xff] }
 0x27e   : > { %v4515_v41 = vpop.eup %4514  ;;  %4520 = vrcp.f32 %v2143_v33  ;;  %v2138_v61 = vpop.xlane.xlu0 %2137  ;;  %v3045_v25 = vadd.f32 %v2915_v34, %v2914_v9  ;;  %2802 = vst [vmem:[%s7013_s16 + $0x30] sm:$0xff] %v3993_v23  ;;  %v2305_v43 = vmul.f32 %v4513_v5, %v6547_v51  ;;  %v2306_v47 = vmul.f32 %v4513_v5, %v8488_v29  ;;  %2803 = vst.msk [vmem:[%s7013_s16 + $0x38] sm:$0xff] %vm6997_vm2, %v3994_v11  ;;  %v8490_v34 = vld [vmem:[#allocation107_spill] sm:$0xff] }
 0x27f   : > { %4522 = vrcp.f32 %v2138_v61  ;;  %v3052_v7 = vadd.f32 %v3051_v54, %v2921_v57  ;;  %v2307_v52 = vmul.f32 %v4513_v5, %v8489_v49  ;;  %v2308_v58 = vmul.f32 %v4513_v5, %v6557_v53  ;;  %v8491_v54 = vld [vmem:[#allocation19_spill] sm:$0xff]  ;;  %v8492_v61 = vld [vmem:[#allocation108_spill] sm:$0xff] }
 0x280   : > { %v3046_v60 = vadd.f32 %v3045_v25, %v2916_v3  ;;  %v2926_v37 = vmul.f32 %v6988_v8, %v2305_v43  ;;  %v2927_v15 = vmul.f32 %v6991_v2, %v2306_v47  ;;  %v3999_v46 = vpack.c.bf16 %v2306_v47, %v2305_v43 }
 0x281   : > { %3053 = vadd.xlane.f32.xlu1 %v3052_v7  ;;  %v4000_v51 = vpack.c.bf16 %v2308_v58, %v2307_v52  ;;  %v2928_v9 = vmul.f32 %v7002_v17, %v2307_v52  ;;  %v2301_v57 = vmul.f32 %v4515_v41, %v8490_v34  ;;  %v2302_v11 = vmul.f32 %v4515_v41, %v8491_v54 }
 0x282   : > { %v3047_v23 = vadd.f32 %v3046_v60, %v2917_v12  ;;  %v3060_v33 = vadd.f32 %v2927_v15, %v2926_v37  ;;  %2808 = vst [vmem:[%s7013_s16 + $0x60] sm:$0xff] %v3999_v46  ;;  %v2303_v29 = vmul.f32 %v4515_v41, %v8492_v61  ;;  %v2304_v53 = vmul.f32 %v4515_v41, %v6575_v18  ;;  %v8493_v15 = vld [vmem:[#allocation24_spill] sm:$0xff]  ;;  %v8494_v41 = vld [vmem:[#allocation15_spill] sm:$0xff] }
 0x283   : > { %2809 = vst.msk [vmem:[%s7013_s16 + $0x68] sm:$0xff] %vm6997_vm2, %v4000_v51  ;;  %v2922_v5 = vmul.f32 %v6988_v8, %v2301_v57  ;;  %v2929_v25 = vmul.f32 %v7007_v40, %v2308_v58  ;;  %v2923_v12 = vmul.f32 %v6991_v2, %v2302_v11  ;;  %v3997_v47 = vpack.c.bf16 %v2302_v11, %v2301_v57  ;;  %v8495_v58 = vld [vmem:[#allocation23_spill] sm:$0xff]  ;;  %v8496_v57 = vld [vmem:[#allocation17_spill] sm:$0xff] }
 0x284   : > { %v4517_v3 = vpop.eup %4516  ;;  %3048 = vadd.xlane.f32.xlu0 %v3047_v23  ;;  %v3061_v43 = vadd.f32 %v3060_v33, %v2928_v9  ;;  %v3998_v60 = vpack.c.bf16 %v2304_v53, %v2303_v29  ;;  %v2924_v37 = vmul.f32 %v7002_v17, %v2303_v29  ;;  %v2925_v11 = vmul.f32 %v7007_v40, %v2304_v53 }
 0x285   : > { %v4519_v7 = vpop.eup %4518  ;;  %v2153_v49 = vpop.xlane.xlu1 %2152  ;;  %v2313_v18 = vmul.f32 %v4517_v3, %v8493_v15  ;;  %v2314_v46 = vmul.f32 %v4517_v3, %v8494_v41  ;;  %v3055_v34 = vadd.f32 %v2923_v12, %v2922_v5  ;;  %2806 = vst [vmem:[%s7013_s16 + $0x50] sm:$0xff] %v3997_v47  ;;  %v2315_v9 = vmul.f32 %v4517_v3, %v8495_v58  ;;  %v8497_v5 = vld [vmem:[#allocation25_spill] sm:$0xff]  ;;  %v8500_v41 = vld [vmem:[#allocation26_spill] sm:$0xff] }
 0x286   : > { %v2148_v52 = vpop.xlane.xlu0 %2147  ;;  %4524 = vrcp.f32 %v2153_v49  ;;  %v3062_v51 = vadd.f32 %v3061_v43, %v2929_v25  ;;  %2807 = vst.msk [vmem:[%s7013_s16 + $0x58] sm:$0xff] %vm6997_vm2, %v3998_v60  ;;  %v2316_v23 = vmul.f32 %v4517_v3, %v8496_v57  ;;  %v2309_v25 = vmul.f32 %v4519_v7, %v8497_v5  ;;  %v8498_v49 = vld [vmem:[#allocation31_spill] sm:$0xff]  ;;  %v8499_v3 = vld [vmem:[#allocation32_spill] sm:$0xff] }
 0x287   : > { %4526 = vrcp.f32 %v2148_v52  ;;  %v2934_v33 = vmul.f32 %v6988_v8, %v2313_v18  ;;  %v2935_v54 = vmul.f32 %v6991_v2, %v2314_v46  ;;  %v3056_v61 = vadd.f32 %v3055_v34, %v2924_v37 }
 0x288   : > { %3063 = vadd.xlane.f32.xlu1 %v3062_v51  ;;  %v4003_v29 = vpack.c.bf16 %v2314_v46, %v2313_v18  ;;  %v4004_v43 = vpack.c.bf16 %v2316_v23, %v2315_v9  ;;  %v2936_v12 = vmul.f32 %v7002_v17, %v2315_v9  ;;  %v2310_v52 = vmul.f32 %v4519_v7, %v8498_v49  ;;  %v8503_v49 = vld [vmem:[#allocation20_spill] sm:$0xff] }
 0x289   : > { %v3070_v47 = vadd.f32 %v2935_v54, %v2934_v33  ;;  %v3057_v60 = vadd.f32 %v3056_v61, %v2925_v11  ;;  %v2311_v15 = vmul.f32 %v4519_v7, %v8499_v3  ;;  %v2312_v58 = vmul.f32 %v4519_v7, %v8500_v41  ;;  %v8501_v61 = vld [vmem:[#allocation37_spill] sm:$0xff] }
 0x28a   : > { %2812 = vst [vmem:[%s7013_s16 + $0x80] sm:$0xff] %v4003_v29  ;;  %v2930_v51 = vmul.f32 %v6988_v8, %v2309_v25  ;;  %2813 = vst.msk [vmem:[%s7013_s16 + $0x88] sm:$0xff] %vm6997_vm2, %v4004_v43  ;;  %v2937_v53 = vmul.f32 %v7007_v40, %v2316_v23  ;;  %v2931_v18 = vmul.f32 %v6991_v2, %v2310_v52  ;;  %v8502_v43 = vld [vmem:[#allocation16_spill] sm:$0xff] }
 0x28b   : > { %v4521_v57 = vpop.eup %4520  ;;  %v3071_v37 = vadd.f32 %v3070_v47, %v2936_v12  ;;  %v4001_v46 = vpack.c.bf16 %v2310_v52, %v2309_v25  ;;  %3058 = vadd.xlane.f32.xlu0 %v3057_v60  ;;  %v4002_v7 = vpack.c.bf16 %v2312_v58, %v2311_v15  ;;  %v2932_v54 = vmul.f32 %v7002_v17, %v2311_v15  ;;  %v777_v47 = vld [vmem:[%s6983_s15 + $0x4] sm:$0xf] }
 0x28c   : > { %v4523_v34 = vpop.eup %4522  ;;  %v2163_v9 = vpop.xlane.xlu1 %2162  ;;  %v2933_v11 = vmul.f32 %v7007_v40, %v2312_v58  ;;  %v2321_v29 = vmul.f32 %v4521_v57, %v8501_v61  ;;  %v3065_v23 = vadd.f32 %v2931_v18, %v2930_v51  ;;  %v2322_v12 = vmul.f32 %v4521_v57, %v8502_v43  ;;  %v8504_v58 = vld [vmem:[#allocation29_spill] sm:$0xff]  ;;  %v8505_v18 = vld [vmem:[#allocation36_spill] sm:$0xff]  ;;  %v8507_v61 = vld [vmem:[#allocation30_spill] sm:$0xff] }
 0x28d   : > { %v2158_v33 = vpop.xlane.xlu0 %2157  ;;  %4528 = vrcp.f32 %v2163_v9  ;;  %v3072_v5 = vadd.f32 %v3071_v37, %v2937_v53  ;;  %2810 = vst [vmem:[%s7013_s16 + $0x70] sm:$0xff] %v4001_v46  ;;  %2811 = vst.msk [vmem:[%s7013_s16 + $0x78] sm:$0xff] %vm6997_vm2, %v4002_v7  ;;  %v2323_v25 = vmul.f32 %v4521_v57, %v6622_v55  ;;  %v2324_v52 = vmul.f32 %v4521_v57, %v8503_v49 }
 0x28e   : > { %4530 = vrcp.f32 %v2158_v33  ;;  %v2942_v60 = vmul.f32 %v6988_v8, %v2321_v29  ;;  %v3066_v3 = vadd.f32 %v3065_v23, %v2932_v54  ;;  %v2943_v15 = vmul.f32 %v6991_v2, %v2322_v12  ;;  %v8506_v33 = vld [vmem:[#allocation39_spill] sm:$0xff] }
 0x28f   : > { %3073 = vadd.xlane.f32.xlu1 %v3072_v5  ;;  %v4007_v41 = vpack.c.bf16 %v2322_v12, %v2321_v29  ;;  %v2317_v51 = vmul.f32 %v4523_v34, %v8504_v58  ;;  %v4008_v53 = vpack.c.bf16 %v2324_v52, %v2323_v25  ;;  %v2944_v37 = vmul.f32 %v7002_v17, %v2323_v25  ;;  %v8509_v58 = vld [vmem:[#allocation27_spill] sm:$0xff] }
 0x290   : > { %v2318_v46 = vmul.f32 %v4523_v34, %v8505_v18  ;;  %v7124_v9 = vrot.slane %v777_v47, %v8465_v38  ;;  %v3067_v55 = vadd.f32 %v3066_v3, %v2933_v11  ;;  %v3080_v57 = vadd.f32 %v2943_v15, %v2942_v60 }
 0x291   : > { %2816 = vst [vmem:[%s7013_s16 + $0xa0] sm:$0xff] %v4007_v41  ;;  %v2319_v7 = vmul.f32 %v4523_v34, %v8506_v33  ;;  %v2320_v54 = vmul.f32 %v4523_v34, %v8507_v61  ;;  %2817 = vst.msk [vmem:[%s7013_s16 + $0xa8] sm:$0xff] %vm6997_vm2, %v4008_v53  ;;  %v2945_v29 = vmul.f32 %v7007_v40, %v2324_v52  ;;  %v8508_v52 = vld [vmem:[#allocation21_spill] sm:$0xff] }
 0x292   : > { %v2938_v5 = vmul.f32 %v6988_v8, %v2317_v51  ;;  %v2939_v23 = vmul.f32 %v6991_v2, %v2318_v46  ;;  %v4005_v43 = vpack.c.bf16 %v2318_v46, %v2317_v51  ;;  %v2173_v11 = vpop.xlane.xlu1 %2172  ;;  %3068 = vadd.xlane.f32.xlu0 %v3067_v55  ;;  %v3081_v12 = vadd.f32 %v3080_v57, %v2944_v37  ;;  %v8510_v37 = vld [vmem:[#allocation109_spill] sm:$0xff] }
 0x293   : > { %v4525_v38 = vpop.eup %4524  ;;  %v4006_v25 = vpack.c.bf16 %v2320_v54, %v2319_v7  ;;  %v2940_v49 = vmul.f32 %v7002_v17, %v2319_v7  ;;  %v2941_v34 = vmul.f32 %v7007_v40, %v2320_v54  ;;  %4532 = vrcp.f32 %v2173_v11 }
 0x294   : > { %v4527_v60 = vpop.eup %4526  ;;  %v2168_v3 = vpop.xlane.xlu0 %2167  ;;  %v3075_v15 = vadd.f32 %v2939_v23, %v2938_v5  ;;  %2814 = vst [vmem:[%s7013_s16 + $0x90] sm:$0xff] %v4005_v43  ;;  %v2329_v41 = vmul.f32 %v4525_v38, %v8508_v52  ;;  %v2330_v53 = vmul.f32 %v4525_v38, %v8509_v58  ;;  %v3082_v51 = vadd.f32 %v3081_v12, %v2945_v29  ;;  %v8511_v5 = vld [vmem:[#allocation43_spill] sm:$0xff]  ;;  %v8512_v12 = vld [vmem:[#allocation33_spill] sm:$0xff] }
 0x295   : > { %4534 = vrcp.f32 %v2168_v3  ;;  %2815 = vst.msk [vmem:[%s7013_s16 + $0x98] sm:$0xff] %vm6997_vm2, %v4006_v25  ;;  %v2331_v18 = vmul.f32 %v4525_v38, %v8510_v37  ;;  %v2332_v46 = vmul.f32 %v4525_v38, %v6660_v45  ;;  %v2325_v29 = vmul.f32 %v4527_v60, %v8511_v5  ;;  %v8513_v38 = vld [vmem:[#allocation34_spill] sm:$0xff] }
 0x296   : > { %v3076_v55 = vadd.f32 %v3075_v15, %v2940_v49  ;;  %v2950_v57 = vmul.f32 %v6988_v8, %v2329_v41  ;;  %v2951_v33 = vmul.f32 %v6991_v2, %v2330_v53  ;;  %v4011_v7 = vpack.c.bf16 %v2330_v53, %v2329_v41  ;;  %3083 = vadd.xlane.f32.xlu1 %v3082_v51 }
 0x297   : > { %v4012_v61 = vpack.c.bf16 %v2332_v46, %v2331_v18  ;;  %v2952_v54 = vmul.f32 %v7002_v17, %v2331_v18  ;;  %v7150_v23 = vrot.slane %v777_v47, %v8466_v50  ;;  %v2326_v45 = vmul.f32 %v4527_v60, %v8512_v12  ;;  %v8514_v18 = vld [vmem:[#allocation45_spill] sm:$0xff]  ;;  %v8517_v12 = vld [vmem:[#allocation46_spill] sm:$0xff] }
 0x298   : > { %v3077_v43 = vadd.f32 %v3076_v55, %v2941_v34  ;;  %v3090_v11 = vadd.f32 %v2951_v33, %v2950_v57  ;;  %2820 = vst [vmem:[%s7013_s16 + $0xc0] sm:$0xff] %v4011_v7  ;;  %v2327_v25 = vmul.f32 %v4527_v60, %v8513_v38  ;;  %v2328_v49 = vmul.f32 %v4527_v60, %v6677_v48 }
 0x299   : > { %2821 = vst.msk [vmem:[%s7013_s16 + $0xc8] sm:$0xff] %vm6997_vm2, %v4012_v61  ;;  %v2946_v3 = vmul.f32 %v6988_v8, %v2325_v29  ;;  %v7161_v15 = vrot.slane %v777_v47, %v8473_v22  ;;  %v7164_v50 = vrot.slane %v777_v47, %v8474_v10  ;;  %v2953_v52 = vmul.f32 %v7007_v40, %v2332_v46  ;;  %v8515_v10 = vld [vmem:[#allocation38_spill] sm:$0xff]  ;;  %v8516_v46 = vld [vmem:[#allocation40_spill] sm:$0xff] }
 0x29a   : > { %v4529_v34 = vpop.eup %4528  ;;  %3078 = vadd.xlane.f32.xlu0 %v3077_v43  ;;  %v3091_v41 = vadd.f32 %v3090_v11, %v2952_v54  ;;  %v2947_v58 = vmul.f32 %v6991_v2, %v2326_v45  ;;  %v4009_v53 = vpack.c.bf16 %v2326_v45, %v2325_v29  ;;  %v2183_v48 = vpop.xlane.xlu1 %2182  ;;  %v4010_v37 = vpack.c.bf16 %v2328_v49, %v2327_v25 }
 0x29b   : > { %v4531_v51 = vpop.eup %4530  ;;  %v2178_v60 = vpop.xlane.xlu0 %2177  ;;  %v2948_v22 = vmul.f32 %v7002_v17, %v2327_v25  ;;  %v2337_v55 = vmul.f32 %v4529_v34, %v8514_v18  ;;  %v2338_v47 = vmul.f32 %v4529_v34, %v8515_v10  ;;  %4536 = vrcp.f32 %v2183_v48 }
 0x29c   : > { %v3092_v57 = vadd.f32 %v3091_v41, %v2953_v52  ;;  %v3085_v33 = vadd.f32 %v2947_v58, %v2946_v3  ;;  %2818 = vst [vmem:[%s7013_s16 + $0xb0] sm:$0xff] %v4009_v53  ;;  %v2339_v7 = vmul.f32 %v4529_v34, %v8516_v46  ;;  %4538 = vrcp.f32 %v2178_v60  ;;  %2819 = vst.msk [vmem:[%s7013_s16 + $0xb8] sm:$0xff] %vm6997_vm2, %v4010_v37  ;;  %v8518_v52 = vld [vmem:[#allocation28_spill] sm:$0xff] }
 0x29d   : > { %v2340_v61 = vmul.f32 %v4529_v34, %v6694_v63  ;;  %v2958_v54 = vmul.f32 %v6988_v8, %v2337_v55  ;;  %v2959_v5 = vmul.f32 %v6991_v2, %v2338_v47  ;;  %v2949_v29 = vmul.f32 %v7007_v40, %v2328_v49  ;;  %v8519_v63 = vld [vmem:[#allocation50_spill] sm:$0xff] }
 0x29e   : > { %3093 = vadd.xlane.f32.xlu1 %v3092_v57  ;;  %v3086_v43 = vadd.f32 %v3085_v33, %v2948_v22  ;;  %v4015_v11 = vpack.c.bf16 %v2338_v47, %v2337_v55  ;;  %v2333_v45 = vmul.f32 %v4531_v51, %v8517_v12  ;;  %v2960_v25 = vmul.f32 %v7002_v17, %v2339_v7 }
 0x29f   : > { %v4016_v38 = vpack.c.bf16 %v2340_v61, %v2339_v7  ;;  %v3100_v3 = vadd.f32 %v2959_v5, %v2958_v54  ;;  %v2334_v41 = vmul.f32 %v4531_v51, %v8518_v52  ;;  %v2335_v34 = vmul.f32 %v4531_v51, %v8519_v63  ;;  %v8520_v5 = vld [vmem:[#allocation54_spill] sm:$0xff]  ;;  %v8523_v52 = vld [vmem:[#allocation53_spill] sm:$0xff] }
 0x2a0   : > { %v3087_v58 = vadd.f32 %v3086_v43, %v2949_v29  ;;  %2824 = vst [vmem:[%s7013_s16 + $0xe0] sm:$0xff] %v4015_v11  ;;  %v2336_v53 = vmul.f32 %v4531_v51, %v6709_v30  ;;  %v2954_v48 = vmul.f32 %v6988_v8, %v2333_v45  ;;  %v4533_v49 = vpop.eup %4532  ;;  %v2193_v60 = vpop.xlane.xlu1 %2192  ;;  %v2961_v22 = vmul.f32 %v7007_v40, %v2340_v61  ;;  %v8521_v43 = vld [vmem:[#allocation41_spill] sm:$0xff] }
 0x2a1   : > { %v2188_v37 = vpop.xlane.xlu0 %2187  ;;  %2825 = vst.msk [vmem:[%s7013_s16 + $0xe8] sm:$0xff] %vm6997_vm2, %v4016_v38  ;;  %v3101_v18 = vadd.f32 %v3100_v3, %v2960_v25  ;;  %v2955_v55 = vmul.f32 %v6991_v2, %v2334_v41  ;;  %v4013_v10 = vpack.c.bf16 %v2334_v41, %v2333_v45  ;;  %4540 = vrcp.f32 %v2193_v60  ;;  %v8522_v3 = vld [vmem:[#allocation51_spill] sm:$0xff] }
 0x2a2   : > { %v4535_v47 = vpop.eup %4534  ;;  %3088 = vadd.xlane.f32.xlu0 %v3087_v58  ;;  %v4014_v30 = vpack.c.bf16 %v2336_v53, %v2335_v34  ;;  %v2956_v51 = vmul.f32 %v7002_v17, %v2335_v34  ;;  %v2957_v57 = vmul.f32 %v7007_v40, %v2336_v53  ;;  %4542 = vrcp.f32 %v2188_v37 }
 0x2a3   : > { %v3102_v33 = vadd.f32 %v3101_v18, %v2961_v22  ;;  %v3095_v46 = vadd.f32 %v2955_v55, %v2954_v48  ;;  %2822 = vst [vmem:[%s7013_s16 + $0xd0] sm:$0xff] %v4013_v10  ;;  %v2345_v7 = vmul.f32 %v4533_v49, %v6711_v28  ;;  %v2346_v61 = vmul.f32 %v4533_v49, %v6716_v24 }
 0x2a4   : > { %2823 = vst.msk [vmem:[%s7013_s16 + $0xd8] sm:$0xff] %vm6997_vm2, %v4014_v30  ;;  %v2347_v54 = vmul.f32 %v4533_v49, %v6722_v13  ;;  %v2348_v29 = vmul.f32 %v4533_v49, %v8520_v5  ;;  %v2341_v11 = vmul.f32 %v4535_v47, %v8521_v43  ;;  %v2203_v12 = vpop.xlane.xlu1 %2202  ;;  %v2342_v28 = vmul.f32 %v4535_v47, %v8522_v3 }
 0x2a5   : > { %v2198_v45 = vpop.xlane.xlu0 %2197  ;;  %3103 = vadd.xlane.f32.xlu1 %v3102_v33  ;;  %v3096_v38 = vadd.f32 %v3095_v46, %v2956_v51  ;;  %v2966_v25 = vmul.f32 %v7124_v9, %v2345_v7  ;;  %v2343_v41 = vmul.f32 %v4535_v47, %v8523_v52  ;;  %v2967_v24 = vmul.f32 %v7150_v23, %v2346_v61 }
 0x2a6   : > { %v4020_v58 = vpack.c.bf16 %v2348_v29, %v2347_v54  ;;  %4544 = vrcp.f32 %v2203_v12  ;;  %v2968_v63 = vmul.f32 %v7161_v15, %v2347_v54  ;;  %v4019_v34 = vpack.c.bf16 %v2346_v61, %v2345_v7 }
 0x2a7   : > { %v3097_v13 = vadd.f32 %v3096_v38, %v2957_v57  ;;  %v3110_v53 = vadd.f32 %v2967_v24, %v2966_v25  ;;  %v2344_v48 = vmul.f32 %v4535_v47, %v6740_v21  ;;  %v2962_v49 = vmul.f32 %v6988_v8, %v2341_v11 }
 0x2a8   : > { %2829 = vst.msk [vmem:[%s7013_s16 + $0x108] sm:$0xff] %vm6997_vm2, %v4020_v58  ;;  %v2963_v60 = vmul.f32 %v6991_v2, %v2342_v28  ;;  %v4537_v37 = vpop.eup %4536  ;;  %4546 = vrcp.f32 %v2198_v45  ;;  %v2213_v22 = vpop.xlane.xlu1 %2212  ;;  %v2969_v18 = vmul.f32 %v7164_v50, %v2348_v29  ;;  %2828 = vst [vmem:[%s7013_s16 + $0x100] sm:$0xff] %v4019_v34  ;;  %v2964_v55 = vmul.f32 %v7002_v17, %v2343_v41 }
 0x2a9   : > { %3098 = vadd.xlane.f32.xlu0 %v3097_v13  ;;  %v4017_v10 = vpack.c.bf16 %v2342_v28, %v2341_v11  ;;  %v4539_v30 = vpop.eup %4538  ;;  %4548 = vrcp.f32 %v2213_v22  ;;  %v3111_v21 = vadd.f32 %v3110_v53, %v2968_v63  ;;  %v4018_v47 = vpack.c.bf16 %v2344_v48, %v2343_v41 }
 0x2aa   : > { %v2965_v8 = vmul.f32 %v7007_v40, %v2344_v48  ;;  %v3105_v2 = vadd.f32 %v2963_v60, %v2962_v49  ;;  %v2353_v57 = vmul.f32 %v4537_v37, %v6744_v4  ;;  %v2354_v33 = vmul.f32 %v4537_v37, %v6751_v31 }
 0x2ab   : > { %2826 = vst [vmem:[%s7013_s16 + $0xf0] sm:$0xff] %v4017_v10  ;;  %v3112_v46 = vadd.f32 %v3111_v21, %v2969_v18  ;;  %2827 = vst.msk [vmem:[%s7013_s16 + $0xf8] sm:$0xff] %vm6997_vm2, %v4018_v47  ;;  %v2355_v17 = vmul.f32 %v4537_v37, %v6756_v62  ;;  %v2356_v7 = vmul.f32 %v4537_v37, %v6761_v39 }
 0x2ac   : > { %v2208_v51 = vpop.xlane.xlu0 %2207  ;;  %v2349_v61 = vmul.f32 %v4539_v30, %v6763_v26  ;;  %v3106_v54 = vadd.f32 %v3105_v2, %v2964_v55  ;;  %v2974_v40 = vmul.f32 %v7124_v9, %v2353_v57  ;;  %v2975_v5 = vmul.f32 %v7150_v23, %v2354_v33 }
 0x2ad   : > { %4550 = vrcp.f32 %v2208_v51  ;;  %v4023_v4 = vpack.c.bf16 %v2354_v33, %v2353_v57  ;;  %3113 = vadd.xlane.f32.xlu1 %v3112_v46  ;;  %v4024_v31 = vpack.c.bf16 %v2356_v7, %v2355_v17  ;;  %v2976_v43 = vmul.f32 %v7161_v15, %v2355_v17 }
 0x2ae   : > { %v2977_v11 = vmul.f32 %v7164_v50, %v2356_v7  ;;  %v2350_v62 = vmul.f32 %v4539_v30, %v6768_v56  ;;  %v4541_v39 = vpop.eup %4540  ;;  %v3107_v12 = vadd.f32 %v3106_v54, %v2965_v8  ;;  %v3120_v26 = vadd.f32 %v2975_v5, %v2974_v40 }
 0x2af   : > { %2832 = vst [vmem:[%s7013_s16 + $0x120] sm:$0xff] %v4023_v4  ;;  %v2351_v45 = vmul.f32 %v4539_v30, %v6770_v19  ;;  %v4543_v38 = vpop.eup %4542  ;;  %2833 = vst.msk [vmem:[%s7013_s16 + $0x128] sm:$0xff] %vm6997_vm2, %v4024_v31  ;;  %v2352_v25 = vmul.f32 %v4539_v30, %v6773_v32  ;;  %v2970_v3 = vmul.f32 %v7124_v9, %v2349_v61 }
 0x2b0   : > { %v2223_v29 = vpop.xlane.xlu1 %2222  ;;  %v2971_v28 = vmul.f32 %v7150_v23, %v2350_v62  ;;  %v4021_v52 = vpack.c.bf16 %v2350_v62, %v2349_v61  ;;  %3108 = vadd.xlane.f32.xlu0 %v3107_v12  ;;  %v3121_v56 = vadd.f32 %v3120_v26, %v2976_v43  ;;  %v2361_v58 = vmul.f32 %v4541_v39, %v6779_v16  ;;  %v8525_v43 = vld [vmem:[#allocation44_spill] sm:$0xff]  ;;  %v8526_v62 = vld [vmem:[#allocation11_spill] sm:$0xff] }
 0x2b1   : > { %4552 = vrcp.f32 %v2223_v29  ;;  %v2972_v41 = vmul.f32 %v7161_v15, %v2351_v45  ;;  %v2362_v19 = vmul.f32 %v4541_v39, %v6784_v20  ;;  %v4022_v13 = vpack.c.bf16 %v2352_v25, %v2351_v45  ;;  %v8524_v29 = vld [vmem:[#allocation35_spill] sm:$0xff] }
 0x2b2   : > { %v2973_v63 = vmul.f32 %v7164_v50, %v2352_v25  ;;  %v3115_v34 = vadd.f32 %v2971_v28, %v2970_v3  ;;  %2830 = vst [vmem:[%s7013_s16 + $0x110] sm:$0xff] %v4021_v52  ;;  %v2363_v32 = vmul.f32 %v4541_v39, %v6789_v36  ;;  %v3122_v53 = vadd.f32 %v3121_v56, %v2977_v11  ;;  %v8527_v52 = vld [vmem:[#allocation12_spill] sm:$0xff] }
 0x2b3   : > { %v2364_v48 = vmul.f32 %v4541_v39, %v6793_v42  ;;  %v2982_v49 = vmul.f32 %v7124_v9, %v2361_v58  ;;  %v4545_v60 = vpop.eup %4544  ;;  %2831 = vst.msk [vmem:[%s7013_s16 + $0x118] sm:$0xff] %vm6997_vm2, %v4022_v13  ;;  %v2983_v20 = vmul.f32 %v7150_v23, %v2362_v19  ;;  %v4027_v22 = vpack.c.bf16 %v2362_v19, %v2361_v58 }
 0x2b4   : > { %v2218_v24 = vpop.xlane.xlu0 %2217  ;;  %v3116_v16 = vadd.f32 %v3115_v34, %v2972_v41  ;;  %v2984_v37 = vmul.f32 %v7161_v15, %v2363_v32  ;;  %3123 = vadd.xlane.f32.xlu1 %v3122_v53  ;;  %v2357_v42 = vmul.f32 %v4543_v38, %v6796_v6  ;;  %v2358_v55 = vmul.f32 %v4543_v38, %v6800_v44  ;;  %v8528_v41 = vld [vmem:[#allocation14_spill] sm:$0xff] }
 0x2b5   : > { %4554 = vrcp.f32 %v2218_v24  ;;  %v4028_v36 = vpack.c.bf16 %v2364_v48, %v2363_v32  ;;  %v2985_v18 = vmul.f32 %v7164_v50, %v2364_v48  ;;  %v4547_v10 = vpop.eup %4546  ;;  %v3130_v21 = vadd.f32 %v2983_v20, %v2982_v49  ;;  %2836 = vst [vmem:[%s7013_s16 + $0x140] sm:$0xff] %v4027_v22  ;;  %v8529_v34 = vld [vmem:[#allocation58_spill] sm:$0xff] }
 0x2b6   : > { %v3117_v51 = vadd.f32 %v3116_v16, %v2973_v63  ;;  %v2359_v47 = vmul.f32 %v4543_v38, %v6803_v59  ;;  %v2360_v8 = vmul.f32 %v4543_v38, %v6807_v27  ;;  %v4549_v2 = vpop.eup %4548  ;;  %v2978_v57 = vmul.f32 %v7124_v9, %v2357_v42 }
 0x2b7   : > { %2837 = vst.msk [vmem:[%s7013_s16 + $0x148] sm:$0xff] %vm6997_vm2, %v4028_v36  ;;  %v2979_v6 = vmul.f32 %v7150_v23, %v2358_v55  ;;  %v4025_v44 = vpack.c.bf16 %v2358_v55, %v2357_v42  ;;  %v3131_v46 = vadd.f32 %v3130_v21, %v2984_v37  ;;  %v2369_v61 = vmul.f32 %v4545_v60, %v6814_v1  ;;  %v8530_v37 = vld [vmem:[#allocation59_spill] sm:$0xff]  ;;  %v8532_v55 = vld [vmem:[#allocation13_spill] sm:$0xff] }
 0x2b8   : > { %v2233_v30 = vpop.xlane.xlu1 %2232  ;;  %3118 = vadd.xlane.f32.xlu0 %v3117_v51  ;;  %v4026_v17 = vpack.c.bf16 %v2360_v8, %v2359_v47  ;;  %v2980_v59 = vmul.f32 %v7161_v15, %v2359_v47  ;;  %v2981_v27 = vmul.f32 %v7164_v50, %v2360_v8  ;;  %v2370_v54 = vmul.f32 %v4545_v60, %v6818_v0  ;;  %v8531_v36 = vld [vmem:[#allocation47_spill] sm:$0xff]  ;;  %v8533_v51 = vld [vmem:[#allocation42_spill] sm:$0xff] }
 0x2b9   : > { %4556 = vrcp.f32 %v2233_v30  ;;  %v3125_v7 = vadd.f32 %v2979_v6, %v2978_v57  ;;  %2834 = vst [vmem:[%s7013_s16 + $0x130] sm:$0xff] %v4025_v44  ;;  %v2371_v40 = vmul.f32 %v4545_v60, %v6822_v14  ;;  %v3132_v4 = vadd.f32 %v3131_v46, %v2985_v18 }
 0x2ba   : > { %v7264_v33 = vpop.eup %4550  ;;  %2835 = vst.msk [vmem:[%s7013_s16 + $0x138] sm:$0xff] %vm6997_vm2, %v4026_v17  ;;  %v2372_v31 = vmul.f32 %v4545_v60, %v8524_v29  ;;  %v2365_v11 = vmul.f32 %v4547_v10, %v8525_v43  ;;  %v2366_v39 = vmul.f32 %v4547_v10, %v8526_v62  ;;  %v2990_v1 = vmul.f32 %v7124_v9, %v2369_v61 }
 0x2bb   : > { %v3126_v12 = vadd.f32 %v3125_v7, %v2980_v59  ;;  %v2991_v0 = vmul.f32 %v7150_v23, %v2370_v54  ;;  %3133 = vadd.xlane.f32.xlu1 %v3132_v4  ;;  %v2992_v45 = vmul.f32 %v7161_v15, %v2371_v40  ;;  %v4031_v25 = vpack.c.bf16 %v2370_v54, %v2369_v61  ;;  %v8535_v54 = vld [vmem:[#allocation66_spill] sm:$0xff] }
 0x2bc   : > { %v2228_v5 = vpop.xlane.xlu0 %2227  ;;  %v4032_v26 = vpack.c.bf16 %v2372_v31, %v2371_v40  ;;  %v2993_v38 = vmul.f32 %v7164_v50, %v2372_v31  ;;  %v2367_v56 = vmul.f32 %v4547_v10, %v8527_v52  ;;  %v2368_v58 = vmul.f32 %v4547_v10, %v8528_v41 }
 0x2bd   : > { %4558 = vrcp.f32 %v2228_v5  ;;  %v3127_v3 = vadd.f32 %v3126_v12, %v2981_v27  ;;  %v3140_v28 = vadd.f32 %v2991_v0, %v2990_v1  ;;  %2840 = vst [vmem:[%s7013_s16 + $0x160] sm:$0xff] %v4031_v25  ;;  %v2986_v24 = vmul.f32 %v7124_v9, %v2365_v11  ;;  %v8536_v5 = vld [vmem:[#allocation68_spill] sm:$0xff] }
 0x2be   : > { %v7280_v14 = vpop.eup %4552  ;;  %2841 = vst.msk [vmem:[%s7013_s16 + $0x168] sm:$0xff] %vm6997_vm2, %v4032_v26  ;;  %v2987_v13 = vmul.f32 %v7150_v23, %v2366_v39  ;;  %v4029_v63 = vpack.c.bf16 %v2366_v39, %v2365_v11  ;;  %v2377_v32 = vmul.f32 %v4549_v2, %v8529_v34  ;;  %v4030_v48 = vpack.c.bf16 %v2368_v58, %v2367_v56  ;;  %v8537_v11 = vld [vmem:[#allocation61_spill] sm:$0xff]  ;;  %v8539_v25 = vld [vmem:[#allocation48_spill] sm:$0xff] }
 0x2bf   : > { %3128 = vadd.xlane.f32.xlu0 %v3127_v3  ;;  %v3141_v53 = vadd.f32 %v3140_v28, %v2992_v45  ;;  %v2988_v49 = vmul.f32 %v7161_v15, %v2367_v56  ;;  %v2989_v16 = vmul.f32 %v7164_v50, %v2368_v58  ;;  %v2378_v22 = vmul.f32 %v4549_v2, %v8530_v37  ;;  %v8538_v45 = vld [vmem:[#allocation62_spill] sm:$0xff]  ;;  %v8540_v56 = vld [vmem:[#allocation55_spill] sm:$0xff] }
 0x2c0   : > { %v2243_v19 = vpop.xlane.xlu1 %2242  ;;  %v3135_v20 = vadd.f32 %v2987_v13, %v2986_v24  ;;  %2838 = vst [vmem:[%s7013_s16 + $0x150] sm:$0xff] %v4029_v63  ;;  %v2379_v18 = vmul.f32 %v4549_v2, %v8531_v36  ;;  %2839 = vst.msk [vmem:[%s7013_s16 + $0x158] sm:$0xff] %vm6997_vm2, %v4030_v48  ;;  %v2380_v10 = vmul.f32 %v4549_v2, %v8532_v55  ;;  %v8534_v2 = vld [vmem:[#allocation52_spill] sm:$0xff] }
 0x2c1   : > { %4560 = vrcp.f32 %v2243_v19  ;;  %v3142_v42 = vadd.f32 %v3141_v53, %v2993_v38  ;;  %v2998_v30 = vmul.f32 %v7124_v9, %v2377_v32  ;;  %v2373_v21 = vmul.f32 %v7264_v33, %v8533_v51  ;;  %v8541_v19 = vld [vmem:[#allocation60_spill] sm:$0xff] }
 0x2c2   : > { %v4555_v60 = vpop.eup %4554  ;;  %v3136_v8 = vadd.f32 %v3135_v20, %v2988_v49  ;;  %v2999_v57 = vmul.f32 %v7150_v23, %v2378_v22  ;;  %v3000_v6 = vmul.f32 %v7161_v15, %v2379_v18  ;;  %v4035_v44 = vpack.c.bf16 %v2378_v22, %v2377_v32  ;;  %v8542_v49 = vld [vmem:[#allocation73_spill] sm:$0xff]  ;;  %v8543_v20 = vld [vmem:[#allocation75_spill] sm:$0xff]  ;;  %v8544_v36 = vld [vmem:[#allocation76_spill] sm:$0xff] }
 0x2c3   : > { %3143 = vadd.xlane.f32.xlu1 %v3142_v42  ;;  %v4036_v46 = vpack.c.bf16 %v2380_v10, %v2379_v18  ;;  %v3001_v17 = vmul.f32 %v7164_v50, %v2380_v10  ;;  %v2374_v59 = vmul.f32 %v7264_v33, %v8534_v2  ;;  %v2375_v40 = vmul.f32 %v7264_v33, %v8535_v54 }
 0x2c4   : > { %v2238_v47 = vpop.xlane.xlu0 %2237  ;;  %v3137_v7 = vadd.f32 %v3136_v8, %v2989_v16  ;;  %v3150_v61 = vadd.f32 %v2999_v57, %v2998_v30  ;;  %2844 = vst [vmem:[%s7013_s16 + $0x180] sm:$0xff] %v4035_v44  ;;  %v2376_v4 = vmul.f32 %v7264_v33, %v8536_v5  ;;  %v2994_v29 = vmul.f32 %v7124_v9, %v2373_v21 }
 0x2c5   : > { %4562 = vrcp.f32 %v2238_v47  ;;  %2845 = vst.msk [vmem:[%s7013_s16 + $0x188] sm:$0xff] %vm6997_vm2, %v4036_v46  ;;  %v2995_v31 = vmul.f32 %v7150_v23, %v2374_v59  ;;  %v4033_v43 = vpack.c.bf16 %v2374_v59, %v2373_v21  ;;  %v2385_v62 = vmul.f32 %v7280_v14, %v8537_v11  ;;  %v8545_v21 = vld [vmem:[#allocation69_spill] sm:$0xff]  ;;  %v8548_v59 = vld [vmem:[#allocation63_spill] sm:$0xff] }
 0x2c6   : > { %v4557_v27 = vpop.eup %4556  ;;  %3138 = vadd.xlane.f32.xlu0 %v3137_v7  ;;  %v3151_v12 = vadd.f32 %v3150_v61, %v3000_v6  ;;  %v4034_v1 = vpack.c.bf16 %v2376_v4, %v2375_v40  ;;  %v2996_v0 = vmul.f32 %v7161_v15, %v2375_v40  ;;  %v2997_v33 = vmul.f32 %v7164_v50, %v2376_v4  ;;  %v8549_v4 = vld [vmem:[#allocation70_spill] sm:$0xff] }
 0x2c7   : > { %v3145_v26 = vadd.f32 %v2995_v31, %v2994_v29  ;;  %2842 = vst [vmem:[%s7013_s16 + $0x170] sm:$0xff] %v4033_v43  ;;  %v2386_v38 = vmul.f32 %v7280_v14, %v8538_v45  ;;  %v2387_v3 = vmul.f32 %v7280_v14, %v8539_v25  ;;  %v2388_v41 = vmul.f32 %v7280_v14, %v8540_v56  ;;  %v8554_v56 = vld [vmem:[#allocation87_spill] sm:$0xff] }
 0x2c8   : > { %v2248_v39 = vpop.xlane.xlu0 %2247  ;;  %v3152_v52 = vadd.f32 %v3151_v12, %v3001_v17  ;;  %2843 = vst.msk [vmem:[%s7013_s16 + $0x178] sm:$0xff] %vm6997_vm2, %v4034_v1  ;;  %v3006_v58 = vmul.f32 %v7124_v9, %v2385_v62  ;;  %v2381_v24 = vmul.f32 %v4555_v60, %v8541_v19  ;;  %v2382_v16 = vmul.f32 %v4555_v60, %v8542_v49  ;;  %v8547_v17 = vld [vmem:[#allocation56_spill] sm:$0xff] }
 0x2c9   : > { %4564 = vrcp.f32 %v2248_v39  ;;  %v3146_v13 = vadd.f32 %v3145_v26, %v2996_v0  ;;  %v3007_v63 = vmul.f32 %v7150_v23, %v2386_v38  ;;  %v3008_v34 = vmul.f32 %v7161_v15, %v2387_v3  ;;  %v8550_v12 = vld [vmem:[#allocation80_spill] sm:$0xff]  ;;  %v8551_v0 = vld [vmem:[#allocation57_spill] sm:$0xff] }
 0x2ca   : > { %v4559_v28 = vpop.eup %4558  ;;  %v4039_v32 = vpack.c.bf16 %v2386_v38, %v2385_v62  ;;  %3153 = vadd.xlane.f32.xlu1 %v3152_v52  ;;  %v4040_v53 = vpack.c.bf16 %v2388_v41, %v2387_v3  ;;  %v3009_v48 = vmul.f32 %v7164_v50, %v2388_v41  ;;  %v2383_v37 = vmul.f32 %v4555_v60, %v8543_v20  ;;  %v8552_v26 = vld [vmem:[#allocation64_spill] sm:$0xff]  ;;  %v8553_v3 = vld [vmem:[#allocation67_spill] sm:$0xff] }
 0x2cb   : > { %v3147_v14 = vadd.f32 %v3146_v13, %v2997_v33  ;;  %v3160_v22 = vadd.f32 %v3007_v63, %v3006_v58  ;;  %v2384_v18 = vmul.f32 %v4555_v60, %v8544_v36  ;;  %v3002_v42 = vmul.f32 %v7124_v9, %v2381_v24  ;;  %v8546_v60 = vld [vmem:[#allocation49_spill] sm:$0xff] }
 0x2cc   : > { %2848 = vst [vmem:[%s7013_s16 + $0x1a0] sm:$0xff] %v4039_v32  ;;  %2849 = vst.msk [vmem:[%s7013_s16 + $0x1a8] sm:$0xff] %vm6997_vm2, %v4040_v53  ;;  %v3003_v10 = vmul.f32 %v7150_v23, %v2382_v16  ;;  %v3004_v30 = vmul.f32 %v7161_v15, %v2383_v37  ;;  %v4037_v51 = vpack.c.bf16 %v2382_v16, %v2381_v24  ;;  %v8555_v32 = vld [vmem:[#allocation88_spill] sm:$0xff] }
 0x2cd   : > { %v2393_v47 = vmul.f32 %v4557_v27, %v8545_v21  ;;  %3148 = vadd.xlane.f32.xlu0 %v3147_v14  ;;  %v3161_v8 = vadd.f32 %v3160_v22, %v3008_v34  ;;  %v4038_v57 = vpack.c.bf16 %v2384_v18, %v2383_v37  ;;  %v3005_v6 = vmul.f32 %v7164_v50, %v2384_v18  ;;  %v8558_v21 = vld [vmem:[#allocation77_spill] sm:$0xff] }
 0x2ce   : > { %v4561_v55 = vpop.eup %4560  ;;  %v2394_v44 = vmul.f32 %v4557_v27, %v8546_v60  ;;  %v3155_v46 = vadd.f32 %v3003_v10, %v3002_v42  ;;  %2846 = vst [vmem:[%s7013_s16 + $0x190] sm:$0xff] %v4037_v51  ;;  %v2395_v2 = vmul.f32 %v4557_v27, %v8547_v17  ;;  %v2396_v7 = vmul.f32 %v4557_v27, %v8548_v59  ;;  %v8562_v17 = vld [vmem:[#allocation71_spill] sm:$0xff] }
 0x2cf   : > { %v3014_v61 = vmul.f32 %v7124_v9, %v2393_v47  ;;  %v3162_v54 = vadd.f32 %v3161_v8, %v3009_v48  ;;  %2847 = vst.msk [vmem:[%s7013_s16 + $0x198] sm:$0xff] %vm6997_vm2, %v4038_v57  ;;  %v2389_v29 = vmul.f32 %v4559_v28, %v8549_v4  ;;  %v2390_v1 = vmul.f32 %v4559_v28, %v8550_v12  ;;  %v8556_v48 = vld [vmem:[#allocation89_spill] sm:$0xff]  ;;  %v8559_v8 = vld [vmem:[#allocation95_spill] sm:$0xff] }
 0x2d0   : > { %v3015_v40 = vmul.f32 %v7150_v23, %v2394_v44  ;;  %v4043_v5 = vpack.c.bf16 %v2394_v44, %v2393_v47  ;;  %v3156_v43 = vadd.f32 %v3155_v46, %v3004_v30  ;;  %v4044_v11 = vpack.c.bf16 %v2396_v7, %v2395_v2  ;;  %v8557_v30 = vld [vmem:[#allocation65_spill] sm:$0xff]  ;;  %v8561_v44 = vld [vmem:[#allocation91_spill] sm:$0xff] }
 0x2d1   : > { %v3016_v62 = vmul.f32 %v7161_v15, %v2395_v2  ;;  %v3017_v39 = vmul.f32 %v7164_v50, %v2396_v7  ;;  %3163 = vadd.xlane.f32.xlu1 %v3162_v54  ;;  %v2391_v33 = vmul.f32 %v4559_v28, %v8551_v0  ;;  %v2392_v45 = vmul.f32 %v4559_v28, %v8552_v26 }
 0x2d2   : > { %v4563_v31 = vpop.eup %4562  ;;  %v3170_v27 = vadd.f32 %v3015_v40, %v3014_v61  ;;  %2852 = vst [vmem:[%s7013_s16 + $0x1c0] sm:$0xff] %v4043_v5  ;;  %v3157_v38 = vadd.f32 %v3156_v43, %v3005_v6  ;;  %2853 = vst.msk [vmem:[%s7013_s16 + $0x1c8] sm:$0xff] %vm6997_vm2, %v4044_v11  ;;  %v3010_v25 = vmul.f32 %v7124_v9, %v2389_v29  ;;  %v8560_v6 = vld [vmem:[#allocation78_spill] sm:$0xff] }
 0x2d3   : > { %v2401_v52 = vmul.f32 %v4561_v55, %v8553_v3  ;;  %v2402_v41 = vmul.f32 %v4561_v55, %v8554_v56  ;;  %v4042_v19 = vpack.c.bf16 %v2392_v45, %v2391_v33  ;;  %v3011_v24 = vmul.f32 %v7150_v23, %v2390_v1 }
 0x2d4   : > { %v3171_v58 = vadd.f32 %v3170_v27, %v3016_v62  ;;  %v3012_v13 = vmul.f32 %v7161_v15, %v2391_v33  ;;  %3158 = vadd.xlane.f32.xlu0 %v3157_v38  ;;  %v3013_v28 = vmul.f32 %v7164_v50, %v2392_v45  ;;  %v4041_v34 = vpack.c.bf16 %v2390_v1, %v2389_v29  ;;  %v8564_v62 = vld [vmem:[#allocation74_spill] sm:$0xff] }
 0x2d5   : > { %v2403_v53 = vmul.f32 %v4561_v55, %v8555_v32  ;;  %v2404_v49 = vmul.f32 %v4561_v55, %v8556_v48  ;;  %2851 = vst.msk [vmem:[%s7013_s16 + $0x1b8] sm:$0xff] %vm6997_vm2, %v4042_v19  ;;  %v3165_v20 = vadd.f32 %v3011_v24, %v3010_v25  ;;  %v3022_v37 = vmul.f32 %v7124_v9, %v2401_v52 }
 0x2d6   : > { %v4565_v63 = vpop.eup %4564  ;;  %v3172_v16 = vadd.f32 %v3171_v58, %v3017_v39  ;;  %v3023_v14 = vmul.f32 %v7150_v23, %v2402_v41  ;;  %2850 = vst [vmem:[%s7013_s16 + $0x1b0] sm:$0xff] %v4041_v34  ;;  %v4047_v42 = vpack.c.bf16 %v2402_v41, %v2401_v52  ;;  %v2397_v51 = vmul.f32 %v4563_v31, %v8557_v30 }
 0x2d7   : > { %v4048_v22 = vpack.c.bf16 %v2404_v49, %v2403_v53  ;;  %v3024_v36 = vmul.f32 %v7161_v15, %v2403_v53  ;;  %v3025_v18 = vmul.f32 %v7164_v50, %v2404_v49  ;;  %v3166_v55 = vadd.f32 %v3165_v20, %v3012_v13 }
 0x2d8   : > { %3173 = vadd.xlane.f32.xlu1 %v3172_v16  ;;  %v3180_v10 = vadd.f32 %v3023_v14, %v3022_v37  ;;  %v2398_v47 = vmul.f32 %v4563_v31, %v8558_v21  ;;  %2856 = vst [vmem:[%s7013_s16 + $0x1e0] sm:$0xff] %v4047_v42  ;;  %v2399_v57 = vmul.f32 %v4563_v31, %v8559_v8  ;;  %v7417_v48 = vstv %s3206_s17 }
 0x2d9   : > { %2857 = vst.msk [vmem:[%s7013_s16 + $0x1e8] sm:$0xff] %vm6997_vm2, %v4048_v22  ;;  %v2400_v60 = vmul.f32 %v4563_v31, %v8560_v6  ;;  %v2405_v46 = vmul.f32 %v4565_v63, %v8561_v44  ;;  %v2406_v2 = vmul.f32 %v4565_v63, %v8562_v17  ;;  %v3167_v59 = vadd.f32 %v3166_v55, %v3013_v28  ;;  %v8563_v31 = vld [vmem:[#allocation82_spill] sm:$0xff] }
 0x2da   : > { %v3181_v7 = vadd.f32 %v3180_v10, %v3024_v36  ;;  %v3018_v61 = vmul.f32 %v7124_v9, %v2397_v51  ;;  %v3019_v54 = vmul.f32 %v7150_v23, %v2398_v47  ;;  %v3020_v5 = vmul.f32 %v7161_v15, %v2399_v57 }
 0x2db   : > { %v4046_v40 = vpack.c.bf16 %v2400_v60, %v2399_v57  ;;  %v4045_v4 = vpack.c.bf16 %v2398_v47, %v2397_v51  ;;  %3168 = vadd.xlane.f32.xlu0 %v3167_v59  ;;  %v2407_v11 = vmul.f32 %v4565_v63, %v8563_v31  ;;  %v2408_v39 = vmul.f32 %v4565_v63, %v8564_v62 }
 0x2dc   : > { %v3182_v29 = vadd.f32 %v3181_v7, %v3025_v18  ;;  %v3175_v43 = vadd.f32 %v3019_v54, %v3018_v61  ;;  %v3026_v27 = vmul.f32 %v7124_v9, %v2405_v46  ;;  %v3027_v12 = vmul.f32 %v7150_v23, %v2406_v2 }
 0x2dd   : > { %2855 = vst.msk [vmem:[%s7013_s16 + $0x1d8] sm:$0xff] %vm6997_vm2, %v4046_v40  ;;  %2854 = vst [vmem:[%s7013_s16 + $0x1d0] sm:$0xff] %v4045_v4  ;;  %v4049_v1 = vpack.c.bf16 %v2406_v2, %v2405_v46  ;;  %v3021_v0 = vmul.f32 %v7164_v50, %v2400_v60  ;;  %v4050_v26 = vpack.c.bf16 %v2408_v39, %v2407_v11 }
 0x2de   : > { %3183 = vadd.xlane.f32.xlu1 %v3182_v29  ;;  %v3176_v33 = vadd.f32 %v3175_v43, %v3020_v5  ;;  %v3028_v45 = vmul.f32 %v7161_v15, %v2407_v11  ;;  %v3185_v38 = vadd.f32 %v3027_v12, %v3026_v27  ;;  %v3029_v3 = vmul.f32 %v7164_v50, %v2408_v39 }
 0x2df   : > { %2858 = vst [vmem:[%s7013_s16 + $0x1f0] sm:$0xff] %v4049_v1  ;;  %2859 = vst.msk [vmem:[%s7013_s16 + $0x1f8] sm:$0xff] %vm6997_vm2, %v4050_v26 }
 0x2e0   : > { %v3177_v25 = vadd.f32 %v3176_v33, %v3021_v0  ;;  %v3186_v52 = vadd.f32 %v3185_v38, %v3028_v45 }
 0x2e2   : > { %3178 = vadd.xlane.f32.xlu0 %v3177_v25  ;;  %v3187_v9 = vadd.f32 %v3186_v52, %v3029_v3 }
 0x2e6   : > { %3188 = vadd.xlane.f32.xlu0 %v3187_v9 }
 0x2fb   : > { %v3039_v41 = vpop.xlane.xlu0 %3038 }
 0x2fe   : > { %v3034_v23 = vpop.xlane.xlu1 %3033 }
 0x303   : > { %v3044_v56 = vpop.xlane.xlu1 %3043 }
 0x30a   : > { %v3054_v58 = vpop.xlane.xlu1 %3053 }
 0x30d   : > { %v3049_v19 = vpop.xlane.xlu0 %3048 }
 0x311   : > { %v3064_v24 = vpop.xlane.xlu1 %3063 }
 0x314   : > { %v3059_v15 = vpop.xlane.xlu0 %3058 }
 0x318   : > { %v3074_v13 = vpop.xlane.xlu1 %3073 }
 0x31b   : > { %v3069_v63 = vpop.xlane.xlu0 %3068 }
 0x31f   : > { %v3084_v28 = vpop.xlane.xlu1 %3083 }
 0x323   : > { %v3079_v34 = vpop.xlane.xlu0 %3078 }
 0x327   : > { %v3094_v35 = vpop.xlane.xlu1 %3093 }
 0x32b   : > { %v3089_v32 = vpop.xlane.xlu0 %3088 }
 0x32e   : > { %v3104_v50 = vpop.xlane.xlu1 %3103 }
 0x332   : > { %v7414_v53 = vpop.xlane.xlu0 %3098 }
 0x336   : > { %v3114_v49 = vpop.xlane.xlu1 %3113 }
 0x337   : > { %v3190_v16 = vadd.f32 %v3114_v49, %v3034_v23 }
 0x339   : > { %v3208_v20 = vadd.f32 %v7417_v48, %v3190_v16  ;;  %v3109_v37 = vpop.xlane.xlu0 %3108 }
 0x33b   : > { %3225 = vst.msk [vmem:[%s7420_s20] sm:$0xff] %vm3224_vm3, %v3208_v20 }
 0x33d   : > { %v3124_v14 = vpop.xlane.xlu1 %3123 }
 0x33e   : > { %v3192_v22 = vadd.f32 %v3124_v14, %v3044_v56 }
 0x340   : > { %v3210_v36 = vadd.f32 %v7417_v48, %v3192_v22 }
 0x341   : > { %v3119_v18 = vpop.xlane.xlu0 %3118 }
 0x342   : > { %v3191_v42 = vadd.f32 %v3119_v18, %v3039_v41  ;;  %3227 = vst.msk [vmem:[%s7420_s20 + $0x10] sm:$0xff] %vm3224_vm3, %v3210_v36 }
 0x344   : > { %v3209_v55 = vadd.f32 %v7417_v48, %v3191_v42  ;;  %v3134_v10 = vpop.xlane.xlu1 %3133 }
 0x345   : > { %v3194_v30 = vadd.f32 %v3134_v10, %v3054_v58 }
 0x346   : > { %3226 = vst.msk [vmem:[%s7420_s20 + $0x8] sm:$0xff] %vm3224_vm3, %v3209_v55 }
 0x347   : > { %v3212_v51 = vadd.f32 %v7417_v48, %v3194_v30 }
 0x348   : > { %v3129_v21 = vpop.xlane.xlu0 %3128 }
 0x349   : > { %v3193_v47 = vadd.f32 %v3129_v21, %v3049_v19  ;;  %3229 = vst.msk [vmem:[%s7420_s20 + $0x20] sm:$0xff] %vm3224_vm3, %v3212_v51 }
 0x34b   : > { %v3211_v8 = vadd.f32 %v7417_v48, %v3193_v47 }
 0x34c   : > { %v3144_v57 = vpop.xlane.xlu1 %3143 }
 0x34d   : > { %3228 = vst.msk [vmem:[%s7420_s20 + $0x18] sm:$0xff] %vm3224_vm3, %v3211_v8  ;;  %v3196_v6 = vadd.f32 %v3144_v57, %v3064_v24 }
 0x34f   : > { %v3214_v60 = vadd.f32 %v7417_v48, %v3196_v6  ;;  %v3139_v44 = vpop.xlane.xlu0 %3138 }
 0x350   : > { %v3195_v46 = vadd.f32 %v3139_v44, %v3059_v15 }
 0x351   : > { %3231 = vst.msk [vmem:[%s7420_s20 + $0x30] sm:$0xff] %vm3224_vm3, %v3214_v60 }
 0x352   : > { %v3213_v17 = vadd.f32 %v7417_v48, %v3195_v46 }
 0x353   : > { %v3154_v2 = vpop.xlane.xlu1 %3153 }
 0x354   : > { %3230 = vst.msk [vmem:[%s7420_s20 + $0x28] sm:$0xff] %vm3224_vm3, %v3213_v17  ;;  %v3198_v59 = vadd.f32 %v3154_v2, %v3074_v13 }
 0x356   : > { %v3216_v7 = vadd.f32 %v7417_v48, %v3198_v59  ;;  %v3149_v61 = vpop.xlane.xlu0 %3148 }
 0x357   : > { %v3197_v54 = vadd.f32 %v3149_v61, %v3069_v63 }
 0x358   : > { %3233 = vst.msk [vmem:[%s7420_s20 + $0x40] sm:$0xff] %vm3224_vm3, %v3216_v7 }
 0x359   : > { %v3215_v40 = vadd.f32 %v7417_v48, %v3197_v54 }
 0x35a   : > { %v3164_v5 = vpop.xlane.xlu1 %3163 }
 0x35b   : > { %3232 = vst.msk [vmem:[%s7420_s20 + $0x38] sm:$0xff] %vm3224_vm3, %v3215_v40  ;;  %v3200_v4 = vadd.f32 %v3164_v5, %v3084_v28 }
 0x35d   : > { %v3218_v29 = vadd.f32 %v7417_v48, %v3200_v4  ;;  %v3159_v43 = vpop.xlane.xlu0 %3158 }
 0x35e   : > { %v3199_v31 = vadd.f32 %v3159_v43, %v3079_v34 }
 0x35f   : > { %3235 = vst.msk [vmem:[%s7420_s20 + $0x50] sm:$0xff] %vm3224_vm3, %v3218_v29 }
 0x360   : > { %v3217_v11 = vadd.f32 %v7417_v48, %v3199_v31 }
 0x361   : > { %v3174_v62 = vpop.xlane.xlu1 %3173 }
 0x362   : > { %v3202_v39 = vadd.f32 %v3174_v62, %v3094_v35  ;;  %3234 = vst.msk [vmem:[%s7420_s20 + $0x48] sm:$0xff] %vm3224_vm3, %v3217_v11 }
 0x364   : > { %v3220_v27 = vadd.f32 %v7417_v48, %v3202_v39  ;;  %v3169_v12 = vpop.xlane.xlu0 %3168 }
 0x365   : > { %v3201_v1 = vadd.f32 %v3169_v12, %v3089_v32 }
 0x366   : > { %3237 = vst.msk [vmem:[%s7420_s20 + $0x60] sm:$0xff] %vm3224_vm3, %v3220_v27 }
 0x367   : > { %v3184_v0 = vpop.xlane.xlu1 %3183  ;;  %v3219_v33 = vadd.f32 %v7417_v48, %v3201_v1 }
 0x368   : > { %v3204_v26 = vadd.f32 %v3184_v0, %v3104_v50 }
 0x369   : > { %3236 = vst.msk [vmem:[%s7420_s20 + $0x58] sm:$0xff] %vm3224_vm3, %v3219_v33 }
 0x36a   : > { %v3222_v45 = vadd.f32 %v7417_v48, %v3204_v26 }
 0x36b   : > { %v3179_v38 = vpop.xlane.xlu0 %3178 }
 0x36c   : > { %3239 = vst.msk [vmem:[%s7420_s20 + $0x70] sm:$0xff] %vm3224_vm3, %v3222_v45  ;;  %v3203_v25 = vadd.f32 %v3179_v38, %v7414_v53 }
 0x36e   : > { %v3221_v3 = vadd.f32 %v7417_v48, %v3203_v25 }
 0x36f   : > { %v3189_v52 = vpop.xlane.xlu0 %3188 }
 0x370   : > { %3238 = vst.msk [vmem:[%s7420_s20 + $0x68] sm:$0xff] %vm3224_vm3, %v3221_v3  ;;  %v3205_v9 = vadd.f32 %v3189_v52, %v3109_v37  ;;  %3251 = sbr.rel (!%p4846_p6) target bundleno = 926 (0x39e), region = 124 }
 0x372   : > { %v3223_v23 = vadd.f32 %v7417_v48, %v3205_v9 }
 0x374   : > { %3240 = vst.msk [vmem:[%s7420_s20 + $0x78] sm:$0xff] %vm3224_vm3, %v3223_v23 }
 0x375   : > { %s8588_s22 = smov (!%p3254_p13, %s3253_s22), 16 }
 0x376   : > { %s3956_s15 = sshll.u32 %s8588_s22, 7 }
 0x377   : > { %p3959_p0 = scmp.eq.s32.totalorder %s3956_s15, 0 }
 0x378   : > { %s7483_s26 = sshrl.u32 (!%p3959_p0), %s8588_s22, 4 }
 0x379   : > { %3264 = sbr.rel (%p3959_p0) target bundleno = 926 (0x39e), region = 128  ;;  %p3960_p1 = scmp.le.s32.totalorder (!%p3959_p0), %s7483_s26, 0 }
 0x37e   : > { %3753 = sbr.rel (%p3960_p1) target bundleno = 909 (0x38d), region = 270  ;;  %s8565_s17 = smov (!%p3960_p1), %s7479_s12 }
 0x37f   : > { %s8566_s19 = smov (!%p3960_p1), %s7420_s20  ;;  %s7492_s11 = smov (!%p3960_p1), 0  }
 0x380   : > { %s7494_s21 = smov (!%p3960_p1), 0  }
 0x383 LB: >> { %v3357_v56 = vld [vmem:[%s4692_s19] sm:$0xff]  ;;  %v3359_v41 = vld [vmem:[%s4692_s19 + $0x8] sm:$0xff]  ;;  %v3361_v58 = vld [vmem:[%s4692_s19 + $0x10] sm:$0xff]  ;;  %s3389_s23 = sadd.s32 1, %s4696_s11  ;;  %s3351_s21 = sadd.s32 1, %s4700_s21   ;;  %s4700_s21 = sphi %s7494_s21, %s3351_s21   ;;  %s4696_s11 = sphi %s7492_s11, %s8567_s11   ;;  %s4692_s19 = sphi %s8566_s19, %s3394_s19   ;;  %s4688_s17 = sphi %s8565_s17, %s3395_s17  }
 0x384   : >> { %3358 = vst [vmem:[%s4688_s17] sm:$0xff] %v3357_v56  ;;  %3360 = vst [vmem:[%s4688_s17 + $0x8] sm:$0xff] %v3359_v41  ;;  %v3363_v19 = vld [vmem:[%s4692_s19 + $0x18] sm:$0xff]  ;;  %v3365_v24 = vld [vmem:[%s4692_s19 + $0x20] sm:$0xff]  ;;  %p3390_p2 = scmp.ge.s32.totalorder %s3389_s23, %s7483_s26  ;;  %p3350_p3 = scmp.ge.s32.totalorder %s3351_s21, %s7483_s26 }
 0x385   : >> { %3362 = vst [vmem:[%s4688_s17 + $0x10] sm:$0xff] %v3361_v58  ;;  %v3367_v15 = vld [vmem:[%s4692_s19 + $0x28] sm:$0xff]  ;;  %3364 = vst [vmem:[%s4688_s17 + $0x18] sm:$0xff] %v3363_v19  ;;  %v3369_v13 = vld [vmem:[%s4692_s19 + $0x30] sm:$0xff] }
 0x386   : >> { %3366 = vst [vmem:[%s4688_s17 + $0x20] sm:$0xff] %v3365_v24  ;;  %3368 = vst [vmem:[%s4688_s17 + $0x28] sm:$0xff] %v3367_v15  ;;  %v3371_v63 = vld [vmem:[%s4692_s19 + $0x38] sm:$0xff]  ;;  %v3373_v28 = vld [vmem:[%s4692_s19 + $0x40] sm:$0xff]  ;;  %s8590_s23 = smov (%p3390_p2, %s3389_s23), 0 }
 0x387   : >> { %3370 = vst [vmem:[%s4688_s17 + $0x30] sm:$0xff] %v3369_v13  ;;  %3372 = vst [vmem:[%s4688_s17 + $0x38] sm:$0xff] %v3371_v63  ;;  %v3375_v34 = vld [vmem:[%s4692_s19 + $0x48] sm:$0xff]  ;;  %v3377_v35 = vld [vmem:[%s4692_s19 + $0x50] sm:$0xff]  ;;  %s3961_s24 = sshll.u32 %s8590_s23, 7  ;;  %s8567_s11 = smov %s8590_s23 }
 0x388   : >> { %3374 = vst [vmem:[%s4688_s17 + $0x40] sm:$0xff] %v3373_v28  ;;  %v3379_v32 = vld [vmem:[%s4692_s19 + $0x58] sm:$0xff]  ;;  %3376 = vst [vmem:[%s4688_s17 + $0x48] sm:$0xff] %v3375_v34  ;;  %v3381_v50 = vld [vmem:[%s4692_s19 + $0x60] sm:$0xff]  ;;  %3353 = sbr.rel (!%p3350_p3) target bundleno = 899 (0x383), region = 276 }
 0x389   : >> { %3378 = vst [vmem:[%s4688_s17 + $0x50] sm:$0xff] %v3377_v35  ;;  %3380 = vst [vmem:[%s4688_s17 + $0x58] sm:$0xff] %v3379_v32  ;;  %v3383_v53 = vld [vmem:[%s4692_s19 + $0x68] sm:$0xff]  ;;  %v3385_v48 = vld [vmem:[%s4692_s19 + $0x70] sm:$0xff] }
 0x38a   : >> { %3382 = vst [vmem:[%s4688_s17 + $0x60] sm:$0xff] %v3381_v50  ;;  %3384 = vst [vmem:[%s4688_s17 + $0x68] sm:$0xff] %v3383_v53  ;;  %v3387_v49 = vld [vmem:[%s4692_s19 + $0x78] sm:$0xff]  ;;  %s3394_s19 = scalar_lea.vmem %s7420_s20, %s3961_s24 [#allocation5]  }
 0x38b   : >> { %3386 = vst [vmem:[%s4688_s17 + $0x70] sm:$0xff] %v3385_v48  ;;  %3388 = vst [vmem:[%s4688_s17 + $0x78] sm:$0xff] %v3387_v49  ;;  %s3395_s17 = scalar_lea.vmem %s7479_s12, %s3961_s24  }
 0x38d PF: > { %s7552_s25 = sand.u32 15, %s8588_s22   ;;  %s4051_s13 = sshll.u32 %s7483_s26, 7 }
 0x38e   : > { %s3400_s15 = scalar_lea.vmem %s7420_s20, %s4051_s13 [#allocation5]   ;;  %s3402_s24 = scalar_lea.vmem %s7479_s12, %s4051_s13  }
 0x38f   : > { %p3966_p4 = scmp.le.s32.totalorder %s7552_s25, 0 }
 0x390   : > { %s4702_s0 = smov (!%p3966_p4), %s3402_s24   ;;  %s4706_s1 = smov (!%p3966_p4), %s3400_s15  }
 0x391   : > { %3767 = sbr.rel (%p3966_p4) target bundleno = 926 (0x39e), region = 281  ;;  %s4710_s2 = smov (!%p3966_p4), 0  }
 0x392   : > { %s4714_s23 = smov (!%p3966_p4), 0  }
 0x396 LB: >> { %v3412_v16 = vld [vmem:[%s4708_s1] sm:$0xff]  ;;  %s3414_s22 = sadd.s32 1, %s4712_s2  ;;  %s3406_s23 = sadd.s32 1, %s4716_s23   ;;  %s4716_s23 = sphi %s4714_s23, %s3406_s23   ;;  %s4712_s2 = sphi %s4710_s2, %s4711_s2   ;;  %s4708_s1 = sphi %s4706_s1, %s3419_s1   ;;  %s4704_s0 = sphi %s4702_s0, %s3420_s0  }
 0x397   : >> { %3413 = vst [vmem:[%s4704_s0] sm:$0xff] %v3412_v16  ;;  %p3415_p5 = scmp.ge.s32.totalorder %s3414_s22, %s7552_s25  ;;  %p3405_p7 = scmp.ge.s32.totalorder %s3406_s23, %s7552_s25 }
 0x399   : >> { %s8592_s22 = smov (%p3415_p5, %s3414_s22), 0  ;;  %3408 = sbr.rel (!%p3405_p7) target bundleno = 918 (0x396), region = 287 }
 0x39a   : >> { %s3967_s20 = sshll.u32 %s8592_s22, 3  ;;  %s4711_s2 = smov %s8592_s22  }
 0x39b   : >> { %s3419_s1 = scalar_lea.vmem %s3400_s15, %s3967_s20 [#allocation5]   ;;  %s3420_s0 = scalar_lea.vmem %s3402_s24, %s3967_s20  }
 0x39e PF: > { %3426 = sbr.rel (!%p4846_p6) target bundleno = 995 (0x3e3), region = 176  ;;  %s3969_s2 = sshll.u32 (%p4846_p6), %s4668_s28, 4 }
 0x39f   : > { %s4054_s12 = sshll.u32 (%p4846_p6), %s4668_s28, 6  ;;  %s3428_s26 = ssub.s32 (%p4846_p6), 62, %s3969_s2 }
 0x3a0   : > { %s4058_s17 = smul.u32 (%p4846_p6), 248, %s4672_s29  ;;  %p3429_p8 = scmp.lt.s32.totalorder (%p4846_p6), %s3428_s26, 16 }
 0x3a2   : > { %s3436_s19 = sadd.s32 (%p4846_p6), %s4058_s17, %s4054_s12 }
 0x3a3   : > { %s8594_s26 = smov (!%p3429_p8, %s3428_s26), 16  ;;  %s3974_s0 = sshll.u32 %s3436_s19, 2 }
 0x3a4   : > { %s4053_s1 = sshll.u32 %s8594_s26, 9  ;;  %s7571_s25 = scalar_lea.vmem %s7803_s7, %s3974_s0  }
 0x3a5   : > { %p3975_p6 = scmp.eq.s32.totalorder %s4053_s1, 0 }
 0x3a6   : > { %s7574_s14 = sshrl.u32 (!%p3975_p6), %s8594_s26, 4 }
 0x3a7   : > { %3441 = sbr.rel (%p3975_p6) target bundleno = 995 (0x3e3), region = 180  ;;  %p3976_p9 = scmp.le.s32.totalorder (!%p3975_p6), %s7574_s14, 0 }
 0x3ac   : > { %3781 = sbr.rel (%p3976_p9) target bundleno = 978 (0x3d2), region = 292  ;;  %s8568_s28 = smov (!%p3976_p9), %s7571_s25 }
 0x3ad   : > { %s8569_s29 = smov (!%p3976_p9), %s7013_s16  ;;  %s7583_s13 = smov (!%p3976_p9), 0  }
 0x3ae   : > { %s7585_s15 = smov (!%p3976_p9), 0  }
 0x3b1 LB: >> { %v3454_v20 = vld [vmem:[%s4724_s29] sm:$0xff]  ;;  %v3456_v37 = vld [vmem:[%s4724_s29 + $0x10] sm:$0xff]  ;;  %s3582_s24 = sadd.s32 1, %s4728_s13  ;;  %v3486_v60 = vld [vmem:[%s4724_s29 + $0x8] sm:$0xff]  ;;  %s3448_s15 = sadd.s32 1, %s4732_s15   ;;  %s4732_s15 = sphi %s7585_s15, %s3448_s15   ;;  %s4728_s13 = sphi %s7583_s13, %s8572_s13   ;;  %s4724_s29 = sphi %s8569_s29, %s8571_s29   ;;  %s4720_s28 = sphi %s8568_s28, %s8570_s28  }
 0x3b2   : >> { %v3458_v14 = vld [vmem:[%s4724_s29 + $0x20] sm:$0xff]  ;;  %3455 = vst [vmem:[%s4720_s28] sm:$0xff] %v3454_v20  ;;  %3457 = vst [vmem:[%s4720_s28 + $0x10] sm:$0xff] %v3456_v37  ;;  %v3460_v22 = vld [vmem:[%s4724_s29 + $0x30] sm:$0xff]  ;;  %p3583_p10 = scmp.ge.s32.totalorder %s3582_s24, %s7574_s14  ;;  %p3447_p11 = scmp.ge.s32.totalorder %s3448_s15, %s7574_s14 }
 0x3b3   : >> { %3459 = vst [vmem:[%s4720_s28 + $0x20] sm:$0xff] %v3458_v14  ;;  %v3462_v36 = vld [vmem:[%s4724_s29 + $0x40] sm:$0xff]  ;;  %v3464_v18 = vld [vmem:[%s4724_s29 + $0x50] sm:$0xff]  ;;  %3461 = vst [vmem:[%s4720_s28 + $0x30] sm:$0xff] %v3460_v22 }
 0x3b4   : >> { %3463 = vst [vmem:[%s4720_s28 + $0x40] sm:$0xff] %v3462_v36  ;;  %3465 = vst [vmem:[%s4720_s28 + $0x50] sm:$0xff] %v3464_v18  ;;  %v3466_v42 = vld [vmem:[%s4724_s29 + $0x60] sm:$0xff]  ;;  %v3468_v55 = vld [vmem:[%s4724_s29 + $0x70] sm:$0xff]  ;;  %s8596_s24 = smov (%p3583_p10, %s3582_s24), 0 }
 0x3b5   : >> { %v3470_v10 = vld [vmem:[%s4724_s29 + $0x80] sm:$0xff]  ;;  %3467 = vst [vmem:[%s4720_s28 + $0x60] sm:$0xff] %v3466_v42  ;;  %3469 = vst [vmem:[%s4720_s28 + $0x70] sm:$0xff] %v3468_v55  ;;  %v3472_v30 = vld [vmem:[%s4724_s29 + $0x90] sm:$0xff]  ;;  %s3977_s23 = sshll.u32 %s8596_s24, 8  ;;  %s8572_s13 = smov %s8596_s24 }
 0x3b6   : >> { %3471 = vst [vmem:[%s4720_s28 + $0x80] sm:$0xff] %v3470_v10  ;;  %v3474_v51 = vld [vmem:[%s4724_s29 + $0xa0] sm:$0xff]  ;;  %v3476_v21 = vld [vmem:[%s4724_s29 + $0xb0] sm:$0xff]  ;;  %3473 = vst [vmem:[%s4720_s28 + $0x90] sm:$0xff] %v3472_v30  ;;  %s7641_s22 = scalar_lea.vmem %s7013_s16, %s3977_s23 [#allocation6]   ;;  %s7644_s20 = scalar_lea.vmem %s7571_s25, %s3977_s23  }
 0x3b7   : >> { %3475 = vst [vmem:[%s4720_s28 + $0xa0] sm:$0xff] %v3474_v51  ;;  %3477 = vst [vmem:[%s4720_s28 + $0xb0] sm:$0xff] %v3476_v21  ;;  %v3478_v47 = vld [vmem:[%s4724_s29 + $0xc0] sm:$0xff]  ;;  %v3480_v8 = vld [vmem:[%s4724_s29 + $0xd0] sm:$0xff] }
 0x3b8   : >> { %v3482_v57 = vld [vmem:[%s4724_s29 + $0xe0] sm:$0xff]  ;;  %3479 = vst [vmem:[%s4720_s28 + $0xc0] sm:$0xff] %v3478_v47  ;;  %3481 = vst [vmem:[%s4720_s28 + $0xd0] sm:$0xff] %v3480_v8  ;;  %v3484_v6 = vld [vmem:[%s4724_s29 + $0xf0] sm:$0xff] }
 0x3b9   : >> { %3483 = vst [vmem:[%s4720_s28 + $0xe0] sm:$0xff] %v3482_v57  ;;  %v3488_v44 = vld [vmem:[%s4724_s29 + $0x18] sm:$0xff]  ;;  %3485 = vst [vmem:[%s4720_s28 + $0xf0] sm:$0xff] %v3484_v6  ;;  %v3490_v46 = vld [vmem:[%s4724_s29 + $0x28] sm:$0xff] }
 0x3ba   : >> { %3487 = vst [vmem:[%s4720_s28 + $0x8] sm:$0xff] %v3486_v60  ;;  %3489 = vst [vmem:[%s4720_s28 + $0x18] sm:$0xff] %v3488_v44  ;;  %v3492_v17 = vld [vmem:[%s4724_s29 + $0x38] sm:$0xff]  ;;  %v3494_v2 = vld [vmem:[%s4724_s29 + $0x48] sm:$0xff] }
 0x3bb   : >> { %3491 = vst [vmem:[%s4720_s28 + $0x28] sm:$0xff] %v3490_v46  ;;  %3493 = vst [vmem:[%s4720_s28 + $0x38] sm:$0xff] %v3492_v17  ;;  %v3496_v59 = vld [vmem:[%s4724_s29 + $0x58] sm:$0xff]  ;;  %v3498_v7 = vld [vmem:[%s4724_s29 + $0x68] sm:$0xff] }
 0x3bc   : >> { %3495 = vst [vmem:[%s4720_s28 + $0x48] sm:$0xff] %v3494_v2  ;;  %v3500_v61 = vld [vmem:[%s4724_s29 + $0x78] sm:$0xff]  ;;  %3497 = vst [vmem:[%s4720_s28 + $0x58] sm:$0xff] %v3496_v59  ;;  %v3502_v54 = vld [vmem:[%s4724_s29 + $0x88] sm:$0xff] }
 0x3bd   : >> { %3499 = vst [vmem:[%s4720_s28 + $0x68] sm:$0xff] %v3498_v7  ;;  %3501 = vst [vmem:[%s4720_s28 + $0x78] sm:$0xff] %v3500_v61  ;;  %v3504_v40 = vld [vmem:[%s4724_s29 + $0x98] sm:$0xff]  ;;  %v3506_v5 = vld [vmem:[%s4724_s29 + $0xa8] sm:$0xff] }
 0x3be   : >> { %3503 = vst [vmem:[%s4720_s28 + $0x88] sm:$0xff] %v3502_v54  ;;  %3505 = vst [vmem:[%s4720_s28 + $0x98] sm:$0xff] %v3504_v40  ;;  %v3508_v4 = vld [vmem:[%s4724_s29 + $0xb8] sm:$0xff]  ;;  %v3510_v29 = vld [vmem:[%s4724_s29 + $0xc8] sm:$0xff] }
 0x3bf   : >> { %3507 = vst [vmem:[%s4720_s28 + $0xa8] sm:$0xff] %v3506_v5  ;;  %v3512_v43 = vld [vmem:[%s4724_s29 + $0xd8] sm:$0xff]  ;;  %3509 = vst [vmem:[%s4720_s28 + $0xb8] sm:$0xff] %v3508_v4  ;;  %v3514_v31 = vld [vmem:[%s4724_s29 + $0xe8] sm:$0xff] }
 0x3c0   : >> { %3511 = vst [vmem:[%s4720_s28 + $0xc8] sm:$0xff] %v3510_v29  ;;  %3513 = vst [vmem:[%s4720_s28 + $0xd8] sm:$0xff] %v3512_v43  ;;  %v3516_v11 = vld [vmem:[%s4724_s29 + $0xf8] sm:$0xff]  ;;  %v3518_v62 = vld [vmem:[%s4724_s29 + $0x100] sm:$0xff] }
 0x3c1   : >> { %3515 = vst [vmem:[%s4720_s28 + $0xe8] sm:$0xff] %v3514_v31  ;;  %3517 = vst [vmem:[%s4720_s28 + $0xf8] sm:$0xff] %v3516_v11  ;;  %v3520_v39 = vld [vmem:[%s4724_s29 + $0x110] sm:$0xff]  ;;  %v3522_v27 = vld [vmem:[%s4724_s29 + $0x120] sm:$0xff] }
 0x3c2   : >> { %3519 = vst [vmem:[%s4720_s28 + $0x7c0] sm:$0xff] %v3518_v62  ;;  %v3524_v12 = vld [vmem:[%s4724_s29 + $0x130] sm:$0xff]  ;;  %3521 = vst [vmem:[%s4720_s28 + $0x7d0] sm:$0xff] %v3520_v39  ;;  %v3526_v1 = vld [vmem:[%s4724_s29 + $0x140] sm:$0xff] }
 0x3c3   : >> { %3523 = vst [vmem:[%s4720_s28 + $0x7e0] sm:$0xff] %v3522_v27  ;;  %3525 = vst [vmem:[%s4720_s28 + $0x7f0] sm:$0xff] %v3524_v12  ;;  %v3528_v0 = vld [vmem:[%s4724_s29 + $0x150] sm:$0xff]  ;;  %v3530_v33 = vld [vmem:[%s4724_s29 + $0x160] sm:$0xff] }
 0x3c4   : >> { %3527 = vst [vmem:[%s4720_s28 + $0x800] sm:$0xff] %v3526_v1  ;;  %3529 = vst [vmem:[%s4720_s28 + $0x810] sm:$0xff] %v3528_v0  ;;  %v3532_v26 = vld [vmem:[%s4724_s29 + $0x170] sm:$0xff]  ;;  %v3534_v45 = vld [vmem:[%s4724_s29 + $0x180] sm:$0xff] }
 0x3c5   : >> { %3531 = vst [vmem:[%s4720_s28 + $0x820] sm:$0xff] %v3530_v33  ;;  %v3536_v38 = vld [vmem:[%s4724_s29 + $0x190] sm:$0xff]  ;;  %3533 = vst [vmem:[%s4720_s28 + $0x830] sm:$0xff] %v3532_v26  ;;  %v3538_v25 = vld [vmem:[%s4724_s29 + $0x1a0] sm:$0xff] }
 0x3c6   : >> { %3535 = vst [vmem:[%s4720_s28 + $0x840] sm:$0xff] %v3534_v45  ;;  %3537 = vst [vmem:[%s4720_s28 + $0x850] sm:$0xff] %v3536_v38  ;;  %v3540_v3 = vld [vmem:[%s4724_s29 + $0x1b0] sm:$0xff]  ;;  %v3542_v52 = vld [vmem:[%s4724_s29 + $0x1c0] sm:$0xff] }
 0x3c7   : >> { %3539 = vst [vmem:[%s4720_s28 + $0x860] sm:$0xff] %v3538_v25  ;;  %3541 = vst [vmem:[%s4720_s28 + $0x870] sm:$0xff] %v3540_v3  ;;  %v3544_v9 = vld [vmem:[%s4724_s29 + $0x1d0] sm:$0xff]  ;;  %v3546_v23 = vld [vmem:[%s4724_s29 + $0x1e0] sm:$0xff] }
 0x3c8   : >> { %3543 = vst [vmem:[%s4720_s28 + $0x880] sm:$0xff] %v3542_v52  ;;  %v3548_v56 = vld [vmem:[%s4724_s29 + $0x1f0] sm:$0xff]  ;;  %3545 = vst [vmem:[%s4720_s28 + $0x890] sm:$0xff] %v3544_v9  ;;  %v3550_v41 = vld [vmem:[%s4724_s29 + $0x108] sm:$0xff] }
 0x3c9   : >> { %3547 = vst [vmem:[%s4720_s28 + $0x8a0] sm:$0xff] %v3546_v23  ;;  %3549 = vst [vmem:[%s4720_s28 + $0x8b0] sm:$0xff] %v3548_v56  ;;  %v3552_v58 = vld [vmem:[%s4724_s29 + $0x118] sm:$0xff]  ;;  %v3554_v19 = vld [vmem:[%s4724_s29 + $0x128] sm:$0xff] }
 0x3ca   : >> { %3551 = vst [vmem:[%s4720_s28 + $0x7c8] sm:$0xff] %v3550_v41  ;;  %3553 = vst [vmem:[%s4720_s28 + $0x7d8] sm:$0xff] %v3552_v58  ;;  %v3556_v24 = vld [vmem:[%s4724_s29 + $0x138] sm:$0xff]  ;;  %v3558_v15 = vld [vmem:[%s4724_s29 + $0x148] sm:$0xff] }
 0x3cb   : >> { %3555 = vst [vmem:[%s4720_s28 + $0x7e8] sm:$0xff] %v3554_v19  ;;  %v3560_v13 = vld [vmem:[%s4724_s29 + $0x158] sm:$0xff]  ;;  %3557 = vst [vmem:[%s4720_s28 + $0x7f8] sm:$0xff] %v3556_v24  ;;  %v3562_v63 = vld [vmem:[%s4724_s29 + $0x168] sm:$0xff] }
 0x3cc   : >> { %3559 = vst [vmem:[%s4720_s28 + $0x808] sm:$0xff] %v3558_v15  ;;  %3561 = vst [vmem:[%s4720_s28 + $0x818] sm:$0xff] %v3560_v13  ;;  %v3564_v28 = vld [vmem:[%s4724_s29 + $0x178] sm:$0xff]  ;;  %v3566_v34 = vld [vmem:[%s4724_s29 + $0x188] sm:$0xff] }
 0x3cd   : >> { %3563 = vst [vmem:[%s4720_s28 + $0x828] sm:$0xff] %v3562_v63  ;;  %3565 = vst [vmem:[%s4720_s28 + $0x838] sm:$0xff] %v3564_v28  ;;  %v3568_v35 = vld [vmem:[%s4724_s29 + $0x198] sm:$0xff]  ;;  %v3570_v32 = vld [vmem:[%s4724_s29 + $0x1a8] sm:$0xff]  ;;  %3450 = sbr.rel (!%p3447_p11) target bundleno = 945 (0x3b1), region = 298 }
 0x3ce   : >> { %3567 = vst [vmem:[%s4720_s28 + $0x848] sm:$0xff] %v3566_v34  ;;  %v3572_v50 = vld [vmem:[%s4724_s29 + $0x1b8] sm:$0xff]  ;;  %3569 = vst [vmem:[%s4720_s28 + $0x858] sm:$0xff] %v3568_v35  ;;  %v3574_v53 = vld [vmem:[%s4724_s29 + $0x1c8] sm:$0xff] }
 0x3cf   : >> { %3571 = vst [vmem:[%s4720_s28 + $0x868] sm:$0xff] %v3570_v32  ;;  %3573 = vst [vmem:[%s4720_s28 + $0x878] sm:$0xff] %v3572_v50  ;;  %v3576_v48 = vld [vmem:[%s4724_s29 + $0x1d8] sm:$0xff]  ;;  %v3578_v49 = vld [vmem:[%s4724_s29 + $0x1e8] sm:$0xff] }
 0x3d0   : >> { %3575 = vst [vmem:[%s4720_s28 + $0x888] sm:$0xff] %v3574_v53  ;;  %3577 = vst [vmem:[%s4720_s28 + $0x898] sm:$0xff] %v3576_v48  ;;  %v3580_v16 = vld [vmem:[%s4724_s29 + $0x1f8] sm:$0xff]  ;;  %s8571_s29 = smov %s7641_s22 }
 0x3d1   : >> { %3579 = vst [vmem:[%s4720_s28 + $0x8a8] sm:$0xff] %v3578_v49  ;;  %3581 = vst [vmem:[%s4720_s28 + $0x8b8] sm:$0xff] %v3580_v16  ;;  %s8570_s28 = smov %s7644_s20 }
 0x3d2 PF: > { %s7749_s2 = sand.u32 15, %s8594_s26   ;;  %s4055_s12 = sshll.u32 %s7574_s14, 8 }
 0x3d3   : > { %s7753_s17 = scalar_lea.vmem %s7013_s16, %s4055_s12 [#allocation6]   ;;  %s7756_s19 = scalar_lea.vmem %s7571_s25, %s4055_s12  }
 0x3d4   : > { %p3982_p12 = scmp.le.s32.totalorder %s7749_s2, 0 }
 0x3d5   : > { %s8573_s0 = smov (!%p3982_p12), %s7756_s19  ;;  %s8574_s1 = smov (!%p3982_p12), %s7753_s17 }
 0x3d6   : > { %3795 = sbr.rel (%p3982_p12) target bundleno = 995 (0x3e3), region = 303  ;;  %s4742_s11 = smov (!%p3982_p12), 0  }
 0x3d7   : > { %s4746_s21 = smov (!%p3982_p12), 0  }
 0x3db LB: >> { %v3605_v20 = vld [vmem:[%s4740_s1] sm:$0xff]  ;;  %v3607_v37 = vld [vmem:[%s4740_s1 + $0x8] sm:$0xff]  ;;  %s3613_s16 = sadd.s32 1, %s4744_s11  ;;  %s3599_s21 = sadd.s32 1, %s4748_s21   ;;  %s4748_s21 = sphi %s4746_s21, %s3599_s21   ;;  %s4744_s11 = sphi %s4742_s11, %s4743_s11   ;;  %s4740_s1 = sphi %s8574_s1, %s3618_s1   ;;  %s4736_s0 = sphi %s8573_s0, %s3619_s0  }
 0x3dc   : >> { %v3609_v14 = vld [vmem:[%s4740_s1 + $0x100] sm:$0xff]  ;;  %3606 = vst [vmem:[%s4736_s0] sm:$0xff] %v3605_v20  ;;  %3608 = vst [vmem:[%s4736_s0 + $0x8] sm:$0xff] %v3607_v37  ;;  %v3611_v22 = vld [vmem:[%s4740_s1 + $0x108] sm:$0xff]  ;;  %p3614_p13 = scmp.ge.s32.totalorder %s3613_s16, %s7749_s2  ;;  %p3598_p0 = scmp.ge.s32.totalorder %s3599_s21, %s7749_s2 }
 0x3dd   : >> { %3610 = vst [vmem:[%s4736_s0 + $0x7c0] sm:$0xff] %v3609_v14  ;;  %3612 = vst [vmem:[%s4736_s0 + $0x7c8] sm:$0xff] %v3611_v22 }
 0x3de   : >> { %s8598_s16 = smov (%p3614_p13, %s3613_s16), 0  ;;  %3601 = sbr.rel (!%p3598_p0) target bundleno = 987 (0x3db), region = 309 }
 0x3df   : >> { %s3983_s26 = sshll.u32 %s8598_s16, 4  ;;  %s4743_s11 = smov %s8598_s16  }
 0x3e0   : >> { %s3618_s1 = scalar_lea.vmem %s7753_s17, %s3983_s26 [#allocation6]   ;;  %s3619_s0 = scalar_lea.vmem %s7756_s19, %s3983_s26  }
 0x3e3 PF: > { %s19_s9 = sadd.s32 1, %s4684_s9   ;;  %s8575_s26 = smov %s4664_s27 }
 0x3e4   : > { %p16_p1 = scmp.ge.s32.totalorder %s19_s9, 10   ;;  %s8576_s27 = smov %s4854_s18 }
 0x3e5   : > { %s8577_s28 = smov %s4676_s30  ;;  %s8578_s29 = smov %s4680_s8 }
 0x3e6   : > { %s8579_s30 = smov %s8582_s5  ;;  %s8580_s8 = smov %s8586_s10 }
 0x3e7   :  { %18 = sbr.rel (!%p16_p1) target bundleno = 9 (0x9), region = 320 }

</bundles_post_ra>
